<compile_context>
chip_gen: v5e
topology: v5e:2x2
jax: 0.10.0
libtpu: 0.0.40
codegen_flags: <defaults>
</compile_context>

<pallas_src>
import functools

import jax
import jax.numpy as jnp
from jax.experimental import pallas as pl
from jax.experimental.pallas import tpu as pltpu

TM_MAX = 256  # max row tile (multiple of 8); per-call tile never exceeds the row count


def _cdiv(a, b):
    return (a + b - 1) // b


def _row_tile(m):
    # Single full-extent block for small M (always legal), otherwise TM_MAX (mult. of 8).
    return m if m < TM_MAX else TM_MAX


# ----------------------------- Pallas kernels -----------------------------

def _apply_act(y, act):
    if act == "relu":
        return jnp.maximum(y, 0.0)
    if act == "tanh":
        return jnp.tanh(y)
    return y


def _matmul_stats_kernel(a_ref, b_ref, o_ref, sum_ref, sq_ref, *, m_total, tm):
    """y = A @ B (bf16 in, f32 acc); also accumulates per-column sum / sum-of-squares
    across the whole M grid (resident (1, N) accumulator outputs) for BatchNorm."""
    i = pl.program_id(0)
    y = jnp.dot(a_ref[...], b_ref[...], preferred_element_type=jnp.float32)
    o_ref[...] = y  # out-of-range rows of a ragged last tile are masked on store

    if m_total % tm != 0:
        # Mask ragged-tail rows so garbage never leaks into the BN statistics.
        rows = jax.lax.broadcasted_iota(jnp.int32, y.shape, 0) + i * tm
        y = jnp.where(rows < m_total, y, 0.0)

    @pl.when(i == 0)
    def _():
        sum_ref[...] = jnp.zeros_like(sum_ref)
        sq_ref[...] = jnp.zeros_like(sq_ref)

    sum_ref[...] += jnp.sum(y, axis=0, keepdims=True)
    sq_ref[...] += jnp.sum(y * y, axis=0, keepdims=True)


def _matmul_bias_act_kernel(a_ref, b_ref, bias_ref, o_ref, *, act):
    y = jnp.dot(a_ref[...], b_ref[...], preferred_element_type=jnp.float32) + bias_ref[...]
    o_ref[...] = _apply_act(y, act)


def _affine_act_kernel(x_ref, s_ref, b_ref, o_ref, *, act):
    o_ref[...] = _apply_act(x_ref[...] * s_ref[...] + b_ref[...], act)


def _affine_act_res_kernel(x_ref, s_ref, b_ref, r_ref, o_ref, *, act):
    o_ref[...] = _apply_act(x_ref[...] * s_ref[...] + b_ref[...], act) + r_ref[...]


# --------------------------- Pallas call wrappers ---------------------------

def matmul_stats(a, b):
    """a: [M, K] bf16, b: [K, N] bf16 -> (y [M, N] f32, col_sum [N], col_sumsq [N])."""
    M, K = a.shape
    _, N = b.shape
    tm = _row_tile(M)
    y, s1, s2 = pl.pallas_call(
        functools.partial(_matmul_stats_kernel, m_total=M, tm=tm),
        out_shape=(jax.ShapeDtypeStruct((M, N), jnp.float32),
                   jax.ShapeDtypeStruct((1, N), jnp.float32),
                   jax.ShapeDtypeStruct((1, N), jnp.float32)),
        grid=(_cdiv(M, tm),),
        in_specs=[pl.BlockSpec((tm, K), lambda i: (i, 0)),
                  pl.BlockSpec((K, N), lambda i: (0, 0))],
        out_specs=[pl.BlockSpec((tm, N), lambda i: (i, 0)),
                   pl.BlockSpec((1, N), lambda i: (0, 0)),
                   pl.BlockSpec((1, N), lambda i: (0, 0))],
        compiler_params=pltpu.CompilerParams(dimension_semantics=("arbitrary",)),
    )(a, b)
    return y, s1[0], s2[0]


def matmul_bias_act(a, b, bias, act=None):
    """a: [M, K] bf16, b: [K, N] bf16, bias: [N] f32 -> act(A @ B + bias) in f32."""
    M, K = a.shape
    _, N = b.shape
    tm = _row_tile(M)
    return pl.pallas_call(
        functools.partial(_matmul_bias_act_kernel, act=act),
        out_shape=jax.ShapeDtypeStruct((M, N), jnp.float32),
        grid=(_cdiv(M, tm),),
        in_specs=[pl.BlockSpec((tm, K), lambda i: (i, 0)),
                  pl.BlockSpec((K, N), lambda i: (0, 0)),
                  pl.BlockSpec((1, N), lambda i: (0, 0))],
        out_specs=pl.BlockSpec((tm, N), lambda i: (i, 0)),
        compiler_params=pltpu.CompilerParams(dimension_semantics=("parallel",)),
    )(a, b, bias.reshape(1, N).astype(jnp.float32))


def affine_act(x, scale, shift, act, residual=None):
    """x: [M, C] f32; per-channel affine + activation (+ optional residual add)."""
    M, C = x.shape
    tm = _row_tile(M)
    row_spec = pl.BlockSpec((tm, C), lambda i: (i, 0))
    vec_spec = pl.BlockSpec((1, C), lambda i: (0, 0))
    cparams = pltpu.CompilerParams(dimension_semantics=("parallel",))
    s2 = scale.reshape(1, C).astype(jnp.float32)
    b2 = shift.reshape(1, C).astype(jnp.float32)
    if residual is None:
        return pl.pallas_call(
            functools.partial(_affine_act_kernel, act=act),
            out_shape=jax.ShapeDtypeStruct((M, C), jnp.float32),
            grid=(_cdiv(M, tm),),
            in_specs=[row_spec, vec_spec, vec_spec],
            out_specs=row_spec,
            compiler_params=cparams,
        )(x, s2, b2)
    return pl.pallas_call(
        functools.partial(_affine_act_res_kernel, act=act),
        out_shape=jax.ShapeDtypeStruct((M, C), jnp.float32),
        grid=(_cdiv(M, tm),),
        in_specs=[row_spec, vec_spec, vec_spec, row_spec],
        out_specs=row_spec,
        compiler_params=cparams,
    )(x, s2, b2, residual.astype(jnp.float32))


# ------------------------------ JAX glue ops -------------------------------

def _im2col(x, k, stride):
    # TODO(synk): fold patch extraction into the matmul kernel (manual DMA of shifted
    # windows) to avoid materializing the k*k patch blow-up in HBM for large shapes.
    N, H, W, C = x.shape
    Ho = (H - k) // stride + 1
    Wo = (W - k) // stride + 1
    cols = []
    for i in range(k):
        for j in range(k):
            cols.append(x[:, i:i + stride * (Ho - 1) + 1:stride,
                             j:j + stride * (Wo - 1) + 1:stride, :])
    return jnp.concatenate(cols, axis=-1), Ho, Wo


def _conv_patches(x, k, stride, pad, pad_mode):
    """Pad + im2col in bf16; returns flattened patch matrix [N*Ho*Wo, k*k*Cin]."""
    x = x.astype(jnp.bfloat16)
    if pad > 0:
        mode = "reflect" if pad_mode == "reflect" else "constant"
        x = jnp.pad(x, ((0, 0), (pad, pad), (pad, pad), (0, 0)), mode=mode)
    patches, Ho, Wo = _im2col(x, k, stride)
    N = patches.shape[0]
    return patches.reshape(N * Ho * Wo, -1), (N, Ho, Wo)


def _conv_weight_matrix(w_oihw):
    Cout, Cin, k, _ = w_oihw.shape
    return jnp.transpose(w_oihw, (2, 3, 1, 0)).reshape(k * k * Cin, Cout).astype(jnp.bfloat16)


def _bn_scale_shift(s1, s2, count, gamma, beta, eps):
    # Training-mode BatchNorm2d: batch statistics with biased variance (PyTorch default).
    mean = s1 / count
    var = jnp.maximum(s2 / count - mean * mean, 0.0)
    scale = gamma / jnp.sqrt(var + eps)
    shift = beta - mean * scale
    return scale, shift


def conv_bn_act(x, w_oihw, gamma, beta, *, stride, pad, pad_mode, act,
                residual=None, eps=1e-5):
    """Conv2d(bias=False) + BatchNorm(train mode) + activation (+ optional residual)."""
    Cout = w_oihw.shape[0]
    k = w_oihw.shape[2]
    A, (N, Ho, Wo) = _conv_patches(x, k, stride, pad, pad_mode)
    y, s1, s2 = matmul_stats(A, _conv_weight_matrix(w_oihw))
    M = y.shape[0]
    scale, shift = _bn_scale_shift(s1, s2, float(M), gamma, beta, eps)
    r2 = residual.reshape(M, Cout) if residual is not None else None
    out = affine_act(y, scale, shift, act, r2)
    return out.reshape(N, Ho, Wo, Cout)


def convT_bn_relu(x, w_iohw, gamma, beta, *, eps=1e-5):
    """ConvTranspose2d(k=3, stride=2, padding=1, output_padding=1, bias=False) + BN + ReLU,
    using the 4-phase sub-convolution decomposition (no zero-stuffed dilated input)."""
    N, H, W, Cin = x.shape
    _, Cout, k, _ = w_iohw.shape
    assert k == 3
    # Phase-packed weight: rows = (tap di,dj, ci), cols = (output phase pi,pj, co).
    # Output pixel (2r+pi, 2s+pj) receives x[r+di, s+dj] through W[:, :, ki, kj] with
    # ki = pi - 2*di + 1, kj = pj - 2*dj + 1 (when in range) — PyTorch semantics.
    wm = jnp.zeros((2, 2, Cin, 2, 2, Cout), jnp.float32)
    for di in range(2):
        for dj in range(2):
            for pi in range(2):
                for pj in range(2):
                    ki, kj = pi - 2 * di + 1, pj - 2 * dj + 1
                    if 0 <= ki < k and 0 <= kj < k:
                        wm = wm.at[di, dj, :, pi, pj, :].set(w_iohw[:, :, ki, kj])
    wm = wm.reshape(4 * Cin, 4 * Cout).astype(jnp.bfloat16)

    xp = jnp.pad(x.astype(jnp.bfloat16), ((0, 0), (0, 1), (0, 1), (0, 0)))
    patches, _, _ = _im2col(xp, 2, 1)                       # taps (di, dj), Ho=H, Wo=W
    A = patches.reshape(N * H * W, 4 * Cin)
    y, s1, s2 = matmul_stats(A, wm)                         # [N*H*W, 4*Cout], phase-packed

    # Combine BN statistics of the four phases per output channel.
    count = float(N * H * W * 4)
    scale, shift = _bn_scale_shift(s1.reshape(4, Cout).sum(0),
                                   s2.reshape(4, Cout).sum(0),
                                   count, gamma, beta, eps)
    # Apply affine+ReLU on the lane-dense phase-packed slab, then interleave phases.
    out = affine_act(y, jnp.tile(scale, 4), jnp.tile(shift, 4), "relu")
    out = out.reshape(N, H, W, 2, 2, Cout)
    out = jnp.transpose(out, (0, 1, 3, 2, 4, 5)).reshape(N, 2 * H, 2 * W, Cout)
    return out


def conv_bias_tanh(x, w_oihw, bias):
    """Final ReflectionPad2d(3) + Conv2d(7x7, bias=True) + Tanh (tanh fused in-kernel)."""
    Cout = w_oihw.shape[0]
    k = w_oihw.shape[2]
    A, (N, Ho, Wo) = _conv_patches(x, k, 1, 3, "reflect")
    y = matmul_bias_act(A, _conv_weight_matrix(w_oihw), bias, act="tanh")
    return y.reshape(N, Ho, Wo, Cout)


# --------------------------- parameters & forward ---------------------------

def init_params(key, input_nc, output_nc, ngf, n_blocks):
    # norm_layer == BatchNorm2d => use_bias=False for all convs except the final
    # Conv2d(ngf, output_nc, 7) which keeps its default bias=True.
    params = {}

    def nxt():
        nonlocal key
        key, sub = jax.random.split(key)
        return sub

    def conv_w(cout, cin, k):
        return 0.05 * jax.random.normal(nxt(), (cout, cin, k, k), jnp.float32)

    def convt_w(cin, cout, k):
        return 0.05 * jax.random.normal(nxt(), (cin, cout, k, k), jnp.float32)

    def bn(c):
        g = 1.0 + 0.1 * jax.random.normal(nxt(), (c,), jnp.float32)
        b = 0.1 * jax.random.normal(nxt(), (c,), jnp.float32)
        return (g, b)

    params["c0_w"] = conv_w(ngf, input_nc, 7)
    params["bn0"] = bn(ngf)
    for i in range(2):
        mult = 2 ** i
        params[f"down{i}_w"] = conv_w(ngf * mult * 2, ngf * mult, 3)
        params[f"down{i}_bn"] = bn(ngf * mult * 2)
    dim = ngf * 4
    for i in range(n_blocks):
        params[f"blk{i}_w1"] = conv_w(dim, dim, 3)
        params[f"blk{i}_bn1"] = bn(dim)
        params[f"blk{i}_w2"] = conv_w(dim, dim, 3)
        params[f"blk{i}_bn2"] = bn(dim)
    for i in range(2):
        m = 2 ** (2 - i)
        params[f"up{i}_w"] = convt_w(ngf * m, ngf * m // 2, 3)
        params[f"up{i}_bn"] = bn(ngf * m // 2)
    params["cf_w"] = conv_w(output_nc, ngf, 7)
    params["cf_b"] = 0.1 * jax.random.normal(nxt(), (output_nc,), jnp.float32)
    return params


def resnet_generator_forward(params, x_nchw, *, n_blocks):
    x = jnp.transpose(x_nchw, (0, 2, 3, 1))  # NCHW -> NHWC

    # ReflectionPad2d(3) + Conv(7x7) + BN + ReLU
    y = conv_bn_act(x, params["c0_w"], *params["bn0"],
                    stride=1, pad=3, pad_mode="reflect", act="relu")

    # two stride-2 downsampling convs
    for i in range(2):
        y = conv_bn_act(y, params[f"down{i}_w"], *params[f"down{i}_bn"],
                        stride=2, pad=1, pad_mode="zero", act="relu")

    # resnet blocks (reflect padding, use_dropout=False)
    for i in range(n_blocks):
        inp = y
        h = conv_bn_act(y, params[f"blk{i}_w1"], *params[f"blk{i}_bn1"],
                        stride=1, pad=1, pad_mode="reflect", act="relu")
        y = conv_bn_act(h, params[f"blk{i}_w2"], *params[f"blk{i}_bn2"],
                        stride=1, pad=1, pad_mode="reflect", act=None, residual=inp)

    # two stride-2 transposed convs (4-phase decomposition) + BN + ReLU
    for i in range(2):
        y = convT_bn_relu(y, params[f"up{i}_w"], *params[f"up{i}_bn"])

    # ReflectionPad2d(3) + Conv(7x7, bias=True) + Tanh (fused in matmul epilogue)
    y = conv_bias_tanh(y, params["cf_w"], params["cf_b"])

    return jnp.transpose(y, (0, 3, 1, 2))  # NHWC -> NCHW


if __name__ == "__main__":
    key = jax.random.PRNGKey(0)
    k_in, k_par = jax.random.split(key)

    # Small but consistent config: input_nc=3, output_nc=3, ngf=8, n_blocks=2.
    input_nc, output_nc, ngf, n_blocks = 3, 3, 8, 2
    x = jax.random.normal(k_in, (2, input_nc, 16, 16), jnp.float32)  # NCHW like PyTorch
    params = init_params(k_par, input_nc, output_nc, ngf, n_blocks)

    fwd = jax.jit(functools.partial(resnet_generator_forward, n_blocks=n_blocks))
    out = jax.block_until_ready(fwd(params, x))

    assert out.shape == (2, output_nc, 16, 16), out.shape
    assert bool(jnp.all(jnp.isfinite(out)))
    assert bool(jnp.all(jnp.abs(out) <= 1.0))  # tanh output range
    print("KERNEL_OK")
</pallas_src>

<mosaic_0001>
module attributes {stable_mosaic.version = 11 : i64} {
  func.func @_matmul_stats_kernel(%arg0: i32, %arg1: memref<256x147xbf16, #tpu.memory_space<vmem>>, %arg2: memref<147x8xbf16, #tpu.memory_space<vmem>>, %arg3: memref<256x8xf32, #tpu.memory_space<vmem>>, %arg4: memref<1x8xf32, #tpu.memory_space<vmem>>, %arg5: memref<1x8xf32, #tpu.memory_space<vmem>>) attributes {dimension_semantics = [#tpu.dimension_semantics<arbitrary>], iteration_bounds = array<i64: 2>, scalar_prefetch = 0 : i64, scratch_operands = 0 : i64, tpu.core_type = #tpu.core_type<tc>, window_params = [{transform_indices = @transform_0, window_bounds = array<i64: 256, 147>}, {pipeline_mode = #tpu.pipeline_mode<synchronous>, transform_indices = @transform_1, window_bounds = array<i64: 147, 8>}, {transform_indices = @transform_2, window_bounds = array<i64: 256, 8>}, {pipeline_mode = #tpu.pipeline_mode<synchronous>, transform_indices = @transform_3, window_bounds = array<i64: 1, 8>}, {pipeline_mode = #tpu.pipeline_mode<synchronous>, transform_indices = @transform_4, window_bounds = array<i64: 1, 8>}]} {
    %c0 = arith.constant 0 : index
    %c0_0 = arith.constant 0 : index
    %0 = vector.load %arg1[%c0, %c0_0] : memref<256x147xbf16, #tpu.memory_space<vmem>>, vector<256x147xbf16>
    %c0_1 = arith.constant 0 : index
    %c0_2 = arith.constant 0 : index
    %1 = vector.load %arg2[%c0_1, %c0_2] : memref<147x8xbf16, #tpu.memory_space<vmem>>, vector<147x8xbf16>
    %cst = arith.constant dense<0.000000e+00> : vector<256x8xf32>
    %2 = tpu.matmul %0, %1, %cst {dimension_numbers = #tpu.dot_dimension_numbers<[1], [0], [0], [1], [0, 0, 1, 1], [], []>} : vector<256x147xbf16>, vector<147x8xbf16>, vector<256x8xf32> -> vector<256x8xf32>
    %c0_3 = arith.constant 0 : index
    %c0_4 = arith.constant 0 : index
    %3 = vector.load %arg3[%c0_3, %c0_4] : memref<256x8xf32, #tpu.memory_space<vmem>>, vector<256x8xf32>
    tpu.vector_store %arg3[%c0_3, %c0_4], %2 {strides = array<i32>} : memref<256x8xf32, #tpu.memory_space<vmem>>, vector<256x8xf32>,
    %c0_i32 = arith.constant 0 : i32
    %4 = arith.cmpi eq, %arg0, %c0_i32 : i32
    %5 = arith.extui %4 : i1 to i32
    %c0_i32_5 = arith.constant 0 : i32
    %6 = arith.cmpi ne, %5, %c0_i32_5 : i32
    scf.if %6 {
      %cst_16 = arith.constant 0.000000e+00 : f32
      %18 = vector.broadcast %cst_16 : f32 to vector<1x8xf32>
      %c0_17 = arith.constant 0 : index
      %c0_18 = arith.constant 0 : index
      %19 = vector.load %arg4[%c0_17, %c0_18] : memref<1x8xf32, #tpu.memory_space<vmem>>, vector<1x8xf32>
      tpu.vector_store %arg4[%c0_17, %c0_18], %18 {strides = array<i32>} : memref<1x8xf32, #tpu.memory_space<vmem>>, vector<1x8xf32>,
      %cst_19 = arith.constant 0.000000e+00 : f32
      %20 = vector.broadcast %cst_19 : f32 to vector<1x8xf32>
      %c0_20 = arith.constant 0 : index
      %c0_21 = arith.constant 0 : index
      %21 = vector.load %arg5[%c0_20, %c0_21] : memref<1x8xf32, #tpu.memory_space<vmem>>, vector<1x8xf32>
      tpu.vector_store %arg5[%c0_20, %c0_21], %20 {strides = array<i32>} : memref<1x8xf32, #tpu.memory_space<vmem>>, vector<1x8xf32>,
    } else {
    }
    %c0_6 = arith.constant 0 : index
    %c0_7 = arith.constant 0 : index
    %7 = vector.load %arg4[%c0_6, %c0_7] : memref<1x8xf32, #tpu.memory_space<vmem>>, vector<1x8xf32>
    %cst_8 = arith.constant dense<0.000000e+00> : vector<8xf32>
    %8 = vector.multi_reduction <add>, %2, %cst_8 [0] : vector<256x8xf32> to vector<8xf32>
    %9 = vector.shape_cast %8 : vector<8xf32> to vector<1x8xf32>
    %10 = arith.addf %7, %9 : vector<1x8xf32>
    %c0_9 = arith.constant 0 : index
    %c0_10 = arith.constant 0 : index
    %11 = vector.load %arg4[%c0_9, %c0_10] : memref<1x8xf32, #tpu.memory_space<vmem>>, vector<1x8xf32>
    tpu.vector_store %arg4[%c0_9, %c0_10], %10 {strides = array<i32>} : memref<1x8xf32, #tpu.memory_space<vmem>>, vector<1x8xf32>,
    %c0_11 = arith.constant 0 : index
    %c0_12 = arith.constant 0 : index
    %12 = vector.load %arg5[%c0_11, %c0_12] : memref<1x8xf32, #tpu.memory_space<vmem>>, vector<1x8xf32>
    %13 = arith.mulf %2, %2 : vector<256x8xf32>
    %cst_13 = arith.constant dense<0.000000e+00> : vector<8xf32>
    %14 = vector.multi_reduction <add>, %13, %cst_13 [0] : vector<256x8xf32> to vector<8xf32>
    %15 = vector.shape_cast %14 : vector<8xf32> to vector<1x8xf32>
    %16 = arith.addf %12, %15 : vector<1x8xf32>
    %c0_14 = arith.constant 0 : index
    %c0_15 = arith.constant 0 : index
    %17 = vector.load %arg5[%c0_14, %c0_15] : memref<1x8xf32, #tpu.memory_space<vmem>>, vector<1x8xf32>
    tpu.vector_store %arg5[%c0_14, %c0_15], %16 {strides = array<i32>} : memref<1x8xf32, #tpu.memory_space<vmem>>, vector<1x8xf32>,
    return
  }
  func.func @transform_0(%arg0: i32) -> (i32, i32) {
    %c0_i32 = arith.constant 0 : i32
    %c0_i32_0 = arith.constant 0 : i32
    return %arg0, %c0_i32 : i32, i32
  }
  func.func @transform_1(%arg0: i32) -> (i32, i32) {
    %c0_i32 = arith.constant 0 : i32
    %c0_i32_0 = arith.constant 0 : i32
    %c0_i32_1 = arith.constant 0 : i32
    return %c0_i32, %c0_i32_0 : i32, i32
  }
  func.func @transform_2(%arg0: i32) -> (i32, i32) {
    %c0_i32 = arith.constant 0 : i32
    %c0_i32_0 = arith.constant 0 : i32
    return %arg0, %c0_i32 : i32, i32
  }
  func.func @transform_3(%arg0: i32) -> (i32, i32) {
    %c0_i32 = arith.constant 0 : i32
    %c0_i32_0 = arith.constant 0 : i32
    %c0_i32_1 = arith.constant 0 : i32
    return %c0_i32, %c0_i32_0 : i32, i32
  }
  func.func @transform_4(%arg0: i32) -> (i32, i32) {
    %c0_i32 = arith.constant 0 : i32
    %c0_i32_0 = arith.constant 0 : i32
    %c0_i32_1 = arith.constant 0 : i32
    return %c0_i32, %c0_i32_0 : i32, i32
  }
}

module attributes {stable_mosaic.version = 11 : i64} {
  func.func @_affine_act_kernel(%arg0: i32, %arg1: memref<256x8xf32, #tpu.memory_space<vmem>>, %arg2: memref<1x8xf32, #tpu.memory_space<vmem>>, %arg3: memref<1x8xf32, #tpu.memory_space<vmem>>, %arg4: memref<256x8xf32, #tpu.memory_space<vmem>>) attributes {dimension_semantics = [#tpu.dimension_semantics<parallel>], iteration_bounds = array<i64: 2>, scalar_prefetch = 0 : i64, scratch_operands = 0 : i64, tpu.core_type = #tpu.core_type<tc>, window_params = [{transform_indices = @transform_0, window_bounds = array<i64: 256, 8>}, {pipeline_mode = #tpu.pipeline_mode<synchronous>, transform_indices = @transform_1, window_bounds = array<i64: 1, 8>}, {pipeline_mode = #tpu.pipeline_mode<synchronous>, transform_indices = @transform_2, window_bounds = array<i64: 1, 8>}, {transform_indices = @transform_3, window_bounds = array<i64: 256, 8>}]} {
    %c0 = arith.constant 0 : index
    %c0_0 = arith.constant 0 : index
    %0 = vector.load %arg1[%c0, %c0_0] : memref<256x8xf32, #tpu.memory_space<vmem>>, vector<256x8xf32>
    %c0_1 = arith.constant 0 : index
    %c0_2 = arith.constant 0 : index
    %1 = vector.load %arg2[%c0_1, %c0_2] : memref<1x8xf32, #tpu.memory_space<vmem>>, vector<1x8xf32>
    %2 = vector.broadcast %1 : vector<1x8xf32> to vector<256x8xf32>
    %3 = arith.mulf %0, %2 : vector<256x8xf32>
    %c0_3 = arith.constant 0 : index
    %c0_4 = arith.constant 0 : index
    %4 = vector.load %arg3[%c0_3, %c0_4] : memref<1x8xf32, #tpu.memory_space<vmem>>, vector<1x8xf32>
    %5 = vector.broadcast %4 : vector<1x8xf32> to vector<256x8xf32>
    %6 = arith.addf %3, %5 : vector<256x8xf32>
    %cst = arith.constant 0.000000e+00 : f32
    %7 = vector.broadcast %cst : f32 to vector<256x8xf32>
    %8 = arith.maximumf %6, %7 : vector<256x8xf32>
    %c0_5 = arith.constant 0 : index
    %c0_6 = arith.constant 0 : index
    %9 = vector.load %arg4[%c0_5, %c0_6] : memref<256x8xf32, #tpu.memory_space<vmem>>, vector<256x8xf32>
    tpu.vector_store %arg4[%c0_5, %c0_6], %8 {strides = array<i32>} : memref<256x8xf32, #tpu.memory_space<vmem>>, vector<256x8xf32>,
    return
  }
  func.func @transform_0(%arg0: i32) -> (i32, i32) {
    %c0_i32 = arith.constant 0 : i32
    %c0_i32_0 = arith.constant 0 : i32
    return %arg0, %c0_i32 : i32, i32
  }
  func.func @transform_1(%arg0: i32) -> (i32, i32) {
    %c0_i32 = arith.constant 0 : i32
    %c0_i32_0 = arith.constant 0 : i32
    %c0_i32_1 = arith.constant 0 : i32
    return %c0_i32, %c0_i32_0 : i32, i32
  }
  func.func @transform_2(%arg0: i32) -> (i32, i32) {
    %c0_i32 = arith.constant 0 : i32
    %c0_i32_0 = arith.constant 0 : i32
    %c0_i32_1 = arith.constant 0 : i32
    return %c0_i32, %c0_i32_0 : i32, i32
  }
  func.func @transform_3(%arg0: i32) -> (i32, i32) {
    %c0_i32 = arith.constant 0 : i32
    %c0_i32_0 = arith.constant 0 : i32
    return %arg0, %c0_i32 : i32, i32
  }
}

module attributes {stable_mosaic.version = 11 : i64} {
  func.func @_matmul_stats_kernel(%arg0: i32, %arg1: memref<128x72xbf16, #tpu.memory_space<vmem>>, %arg2: memref<72x16xbf16, #tpu.memory_space<vmem>>, %arg3: memref<128x16xf32, #tpu.memory_space<vmem>>, %arg4: memref<1x16xf32, #tpu.memory_space<vmem>>, %arg5: memref<1x16xf32, #tpu.memory_space<vmem>>) attributes {dimension_semantics = [#tpu.dimension_semantics<arbitrary>], iteration_bounds = array<i64: 1>, scalar_prefetch = 0 : i64, scratch_operands = 0 : i64, tpu.core_type = #tpu.core_type<tc>, window_params = [{transform_indices = @transform_0, window_bounds = array<i64: 128, 72>}, {pipeline_mode = #tpu.pipeline_mode<synchronous>, transform_indices = @transform_1, window_bounds = array<i64: 72, 16>}, {transform_indices = @transform_2, window_bounds = array<i64: 128, 16>}, {pipeline_mode = #tpu.pipeline_mode<synchronous>, transform_indices = @transform_3, window_bounds = array<i64: 1, 16>}, {pipeline_mode = #tpu.pipeline_mode<synchronous>, transform_indices = @transform_4, window_bounds = array<i64: 1, 16>}]} {
    %c0 = arith.constant 0 : index
    %c0_0 = arith.constant 0 : index
    %0 = vector.load %arg1[%c0, %c0_0] : memref<128x72xbf16, #tpu.memory_space<vmem>>, vector<128x72xbf16>
    %c0_1 = arith.constant 0 : index
    %c0_2 = arith.constant 0 : index
    %1 = vector.load %arg2[%c0_1, %c0_2] : memref<72x16xbf16, #tpu.memory_space<vmem>>, vector<72x16xbf16>
    %cst = arith.constant dense<0.000000e+00> : vector<128x16xf32>
    %2 = tpu.matmul %0, %1, %cst {dimension_numbers = #tpu.dot_dimension_numbers<[1], [0], [0], [1], [0, 0, 1, 1], [], []>} : vector<128x72xbf16>, vector<72x16xbf16>, vector<128x16xf32> -> vector<128x16xf32>
    %c0_3 = arith.constant 0 : index
    %c0_4 = arith.constant 0 : index
    %3 = vector.load %arg3[%c0_3, %c0_4] : memref<128x16xf32, #tpu.memory_space<vmem>>, vector<128x16xf32>
    tpu.vector_store %arg3[%c0_3, %c0_4], %2 {strides = array<i32>} : memref<128x16xf32, #tpu.memory_space<vmem>>, vector<128x16xf32>,
    %c0_i32 = arith.constant 0 : i32
    %4 = arith.cmpi eq, %arg0, %c0_i32 : i32
    %5 = arith.extui %4 : i1 to i32
    %c0_i32_5 = arith.constant 0 : i32
    %6 = arith.cmpi ne, %5, %c0_i32_5 : i32
    scf.if %6 {
      %cst_16 = arith.constant 0.000000e+00 : f32
      %18 = vector.broadcast %cst_16 : f32 to vector<1x16xf32>
      %c0_17 = arith.constant 0 : index
      %c0_18 = arith.constant 0 : index
      %19 = vector.load %arg4[%c0_17, %c0_18] : memref<1x16xf32, #tpu.memory_space<vmem>>, vector<1x16xf32>
      tpu.vector_store %arg4[%c0_17, %c0_18], %18 {strides = array<i32>} : memref<1x16xf32, #tpu.memory_space<vmem>>, vector<1x16xf32>,
      %cst_19 = arith.constant 0.000000e+00 : f32
      %20 = vector.broadcast %cst_19 : f32 to vector<1x16xf32>
      %c0_20 = arith.constant 0 : index
      %c0_21 = arith.constant 0 : index
      %21 = vector.load %arg5[%c0_20, %c0_21] : memref<1x16xf32, #tpu.memory_space<vmem>>, vector<1x16xf32>
      tpu.vector_store %arg5[%c0_20, %c0_21], %20 {strides = array<i32>} : memref<1x16xf32, #tpu.memory_space<vmem>>, vector<1x16xf32>,
    } else {
    }
    %c0_6 = arith.constant 0 : index
    %c0_7 = arith.constant 0 : index
    %7 = vector.load %arg4[%c0_6, %c0_7] : memref<1x16xf32, #tpu.memory_space<vmem>>, vector<1x16xf32>
    %cst_8 = arith.constant dense<0.000000e+00> : vector<16xf32>
    %8 = vector.multi_reduction <add>, %2, %cst_8 [0] : vector<128x16xf32> to vector<16xf32>
    %9 = vector.shape_cast %8 : vector<16xf32> to vector<1x16xf32>
    %10 = arith.addf %7, %9 : vector<1x16xf32>
    %c0_9 = arith.constant 0 : index
    %c0_10 = arith.constant 0 : index
    %11 = vector.load %arg4[%c0_9, %c0_10] : memref<1x16xf32, #tpu.memory_space<vmem>>, vector<1x16xf32>
    tpu.vector_store %arg4[%c0_9, %c0_10], %10 {strides = array<i32>} : memref<1x16xf32, #tpu.memory_space<vmem>>, vector<1x16xf32>,
    %c0_11 = arith.constant 0 : index
    %c0_12 = arith.constant 0 : index
    %12 = vector.load %arg5[%c0_11, %c0_12] : memref<1x16xf32, #tpu.memory_space<vmem>>, vector<1x16xf32>
    %13 = arith.mulf %2, %2 : vector<128x16xf32>
    %cst_13 = arith.constant dense<0.000000e+00> : vector<16xf32>
    %14 = vector.multi_reduction <add>, %13, %cst_13 [0] : vector<128x16xf32> to vector<16xf32>
    %15 = vector.shape_cast %14 : vector<16xf32> to vector<1x16xf32>
    %16 = arith.addf %12, %15 : vector<1x16xf32>
    %c0_14 = arith.constant 0 : index
    %c0_15 = arith.constant 0 : index
    %17 = vector.load %arg5[%c0_14, %c0_15] : memref<1x16xf32, #tpu.memory_space<vmem>>, vector<1x16xf32>
    tpu.vector_store %arg5[%c0_14, %c0_15], %16 {strides = array<i32>} : memref<1x16xf32, #tpu.memory_space<vmem>>, vector<1x16xf32>,
    return
  }
  func.func @transform_0(%arg0: i32) -> (i32, i32) {
    %c0_i32 = arith.constant 0 : i32
    %c0_i32_0 = arith.constant 0 : i32
    return %arg0, %c0_i32 : i32, i32
  }
  func.func @transform_1(%arg0: i32) -> (i32, i32) {
    %c0_i32 = arith.constant 0 : i32
    %c0_i32_0 = arith.constant 0 : i32
    %c0_i32_1 = arith.constant 0 : i32
    return %c0_i32, %c0_i32_0 : i32, i32
  }
  func.func @transform_2(%arg0: i32) -> (i32, i32) {
    %c0_i32 = arith.constant 0 : i32
    %c0_i32_0 = arith.constant 0 : i32
    return %arg0, %c0_i32 : i32, i32
  }
  func.func @transform_3(%arg0: i32) -> (i32, i32) {
    %c0_i32 = arith.constant 0 : i32
    %c0_i32_0 = arith.constant 0 : i32
    %c0_i32_1 = arith.constant 0 : i32
    return %c0_i32, %c0_i32_0 : i32, i32
  }
  func.func @transform_4(%arg0: i32) -> (i32, i32) {
    %c0_i32 = arith.constant 0 : i32
    %c0_i32_0 = arith.constant 0 : i32
    %c0_i32_1 = arith.constant 0 : i32
    return %c0_i32, %c0_i32_0 : i32, i32
  }
}

module attributes {stable_mosaic.version = 11 : i64} {
  func.func @_affine_act_kernel(%arg0: i32, %arg1: memref<128x16xf32, #tpu.memory_space<vmem>>, %arg2: memref<1x16xf32, #tpu.memory_space<vmem>>, %arg3: memref<1x16xf32, #tpu.memory_space<vmem>>, %arg4: memref<128x16xf32, #tpu.memory_space<vmem>>) attributes {dimension_semantics = [#tpu.dimension_semantics<parallel>], iteration_bounds = array<i64: 1>, scalar_prefetch = 0 : i64, scratch_operands = 0 : i64, tpu.core_type = #tpu.core_type<tc>, window_params = [{transform_indices = @transform_0, window_bounds = array<i64: 128, 16>}, {pipeline_mode = #tpu.pipeline_mode<synchronous>, transform_indices = @transform_1, window_bounds = array<i64: 1, 16>}, {pipeline_mode = #tpu.pipeline_mode<synchronous>, transform_indices = @transform_2, window_bounds = array<i64: 1, 16>}, {transform_indices = @transform_3, window_bounds = array<i64: 128, 16>}]} {
    %c0 = arith.constant 0 : index
    %c0_0 = arith.constant 0 : index
    %0 = vector.load %arg1[%c0, %c0_0] : memref<128x16xf32, #tpu.memory_space<vmem>>, vector<128x16xf32>
    %c0_1 = arith.constant 0 : index
    %c0_2 = arith.constant 0 : index
    %1 = vector.load %arg2[%c0_1, %c0_2] : memref<1x16xf32, #tpu.memory_space<vmem>>, vector<1x16xf32>
    %2 = vector.broadcast %1 : vector<1x16xf32> to vector<128x16xf32>
    %3 = arith.mulf %0, %2 : vector<128x16xf32>
    %c0_3 = arith.constant 0 : index
    %c0_4 = arith.constant 0 : index
    %4 = vector.load %arg3[%c0_3, %c0_4] : memref<1x16xf32, #tpu.memory_space<vmem>>, vector<1x16xf32>
    %5 = vector.broadcast %4 : vector<1x16xf32> to vector<128x16xf32>
    %6 = arith.addf %3, %5 : vector<128x16xf32>
    %cst = arith.constant 0.000000e+00 : f32
    %7 = vector.broadcast %cst : f32 to vector<128x16xf32>
    %8 = arith.maximumf %6, %7 : vector<128x16xf32>
    %c0_5 = arith.constant 0 : index
    %c0_6 = arith.constant 0 : index
    %9 = vector.load %arg4[%c0_5, %c0_6] : memref<128x16xf32, #tpu.memory_space<vmem>>, vector<128x16xf32>
    tpu.vector_store %arg4[%c0_5, %c0_6], %8 {strides = array<i32>} : memref<128x16xf32, #tpu.memory_space<vmem>>, vector<128x16xf32>,
    return
  }
  func.func @transform_0(%arg0: i32) -> (i32, i32) {
    %c0_i32 = arith.constant 0 : i32
    %c0_i32_0 = arith.constant 0 : i32
    return %arg0, %c0_i32 : i32, i32
  }
  func.func @transform_1(%arg0: i32) -> (i32, i32) {
    %c0_i32 = arith.constant 0 : i32
    %c0_i32_0 = arith.constant 0 : i32
    %c0_i32_1 = arith.constant 0 : i32
    return %c0_i32, %c0_i32_0 : i32, i32
  }
  func.func @transform_2(%arg0: i32) -> (i32, i32) {
    %c0_i32 = arith.constant 0 : i32
    %c0_i32_0 = arith.constant 0 : i32
    %c0_i32_1 = arith.constant 0 : i32
    return %c0_i32, %c0_i32_0 : i32, i32
  }
  func.func @transform_3(%arg0: i32) -> (i32, i32) {
    %c0_i32 = arith.constant 0 : i32
    %c0_i32_0 = arith.constant 0 : i32
    return %arg0, %c0_i32 : i32, i32
  }
}

module attributes {stable_mosaic.version = 11 : i64} {
  func.func @_matmul_stats_kernel(%arg0: i32, %arg1: memref<32x144xbf16, #tpu.memory_space<vmem>>, %arg2: memref<144x32xbf16, #tpu.memory_space<vmem>>, %arg3: memref<32x32xf32, #tpu.memory_space<vmem>>, %arg4: memref<1x32xf32, #tpu.memory_space<vmem>>, %arg5: memref<1x32xf32, #tpu.memory_space<vmem>>) attributes {dimension_semantics = [#tpu.dimension_semantics<arbitrary>], iteration_bounds = array<i64: 1>, scalar_prefetch = 0 : i64, scratch_operands = 0 : i64, tpu.core_type = #tpu.core_type<tc>, window_params = [{transform_indices = @transform_0, window_bounds = array<i64: 32, 144>}, {pipeline_mode = #tpu.pipeline_mode<synchronous>, transform_indices = @transform_1, window_bounds = array<i64: 144, 32>}, {transform_indices = @transform_2, window_bounds = array<i64: 32, 32>}, {pipeline_mode = #tpu.pipeline_mode<synchronous>, transform_indices = @transform_3, window_bounds = array<i64: 1, 32>}, {pipeline_mode = #tpu.pipeline_mode<synchronous>, transform_indices = @transform_4, window_bounds = array<i64: 1, 32>}]} {
    %c0 = arith.constant 0 : index
    %c0_0 = arith.constant 0 : index
    %0 = vector.load %arg1[%c0, %c0_0] : memref<32x144xbf16, #tpu.memory_space<vmem>>, vector<32x144xbf16>
    %c0_1 = arith.constant 0 : index
    %c0_2 = arith.constant 0 : index
    %1 = vector.load %arg2[%c0_1, %c0_2] : memref<144x32xbf16, #tpu.memory_space<vmem>>, vector<144x32xbf16>
    %cst = arith.constant dense<0.000000e+00> : vector<32x32xf32>
    %2 = tpu.matmul %0, %1, %cst {dimension_numbers = #tpu.dot_dimension_numbers<[1], [0], [0], [1], [0, 0, 1, 1], [], []>} : vector<32x144xbf16>, vector<144x32xbf16>, vector<32x32xf32> -> vector<32x32xf32>
    %c0_3 = arith.constant 0 : index
    %c0_4 = arith.constant 0 : index
    %3 = vector.load %arg3[%c0_3, %c0_4] : memref<32x32xf32, #tpu.memory_space<vmem>>, vector<32x32xf32>
    tpu.vector_store %arg3[%c0_3, %c0_4], %2 {strides = array<i32>} : memref<32x32xf32, #tpu.memory_space<vmem>>, vector<32x32xf32>,
    %c0_i32 = arith.constant 0 : i32
    %4 = arith.cmpi eq, %arg0, %c0_i32 : i32
    %5 = arith.extui %4 : i1 to i32
    %c0_i32_5 = arith.constant 0 : i32
    %6 = arith.cmpi ne, %5, %c0_i32_5 : i32
    scf.if %6 {
      %cst_16 = arith.constant 0.000000e+00 : f32
      %18 = vector.broadcast %cst_16 : f32 to vector<1x32xf32>
      %c0_17 = arith.constant 0 : index
      %c0_18 = arith.constant 0 : index
      %19 = vector.load %arg4[%c0_17, %c0_18] : memref<1x32xf32, #tpu.memory_space<vmem>>, vector<1x32xf32>
      tpu.vector_store %arg4[%c0_17, %c0_18], %18 {strides = array<i32>} : memref<1x32xf32, #tpu.memory_space<vmem>>, vector<1x32xf32>,
      %cst_19 = arith.constant 0.000000e+00 : f32
      %20 = vector.broadcast %cst_19 : f32 to vector<1x32xf32>
      %c0_20 = arith.constant 0 : index
      %c0_21 = arith.constant 0 : index
      %21 = vector.load %arg5[%c0_20, %c0_21] : memref<1x32xf32, #tpu.memory_space<vmem>>, vector<1x32xf32>
      tpu.vector_store %arg5[%c0_20, %c0_21], %20 {strides = array<i32>} : memref<1x32xf32, #tpu.memory_space<vmem>>, vector<1x32xf32>,
    } else {
    }
    %c0_6 = arith.constant 0 : index
    %c0_7 = arith.constant 0 : index
    %7 = vector.load %arg4[%c0_6, %c0_7] : memref<1x32xf32, #tpu.memory_space<vmem>>, vector<1x32xf32>
    %cst_8 = arith.constant dense<0.000000e+00> : vector<32xf32>
    %8 = vector.multi_reduction <add>, %2, %cst_8 [0] : vector<32x32xf32> to vector<32xf32>
    %9 = vector.shape_cast %8 : vector<32xf32> to vector<1x32xf32>
    %10 = arith.addf %7, %9 : vector<1x32xf32>
    %c0_9 = arith.constant 0 : index
    %c0_10 = arith.constant 0 : index
    %11 = vector.load %arg4[%c0_9, %c0_10] : memref<1x32xf32, #tpu.memory_space<vmem>>, vector<1x32xf32>
    tpu.vector_store %arg4[%c0_9, %c0_10], %10 {strides = array<i32>} : memref<1x32xf32, #tpu.memory_space<vmem>>, vector<1x32xf32>,
    %c0_11 = arith.constant 0 : index
    %c0_12 = arith.constant 0 : index
    %12 = vector.load %arg5[%c0_11, %c0_12] : memref<1x32xf32, #tpu.memory_space<vmem>>, vector<1x32xf32>
    %13 = arith.mulf %2, %2 : vector<32x32xf32>
    %cst_13 = arith.constant dense<0.000000e+00> : vector<32xf32>
    %14 = vector.multi_reduction <add>, %13, %cst_13 [0] : vector<32x32xf32> to vector<32xf32>
    %15 = vector.shape_cast %14 : vector<32xf32> to vector<1x32xf32>
    %16 = arith.addf %12, %15 : vector<1x32xf32>
    %c0_14 = arith.constant 0 : index
    %c0_15 = arith.constant 0 : index
    %17 = vector.load %arg5[%c0_14, %c0_15] : memref<1x32xf32, #tpu.memory_space<vmem>>, vector<1x32xf32>
    tpu.vector_store %arg5[%c0_14, %c0_15], %16 {strides = array<i32>} : memref<1x32xf32, #tpu.memory_space<vmem>>, vector<1x32xf32>,
    return
  }
  func.func @transform_0(%arg0: i32) -> (i32, i32) {
    %c0_i32 = arith.constant 0 : i32
    %c0_i32_0 = arith.constant 0 : i32
    return %arg0, %c0_i32 : i32, i32
  }
  func.func @transform_1(%arg0: i32) -> (i32, i32) {
    %c0_i32 = arith.constant 0 : i32
    %c0_i32_0 = arith.constant 0 : i32
    %c0_i32_1 = arith.constant 0 : i32
    return %c0_i32, %c0_i32_0 : i32, i32
  }
  func.func @transform_2(%arg0: i32) -> (i32, i32) {
    %c0_i32 = arith.constant 0 : i32
    %c0_i32_0 = arith.constant 0 : i32
    return %arg0, %c0_i32 : i32, i32
  }
  func.func @transform_3(%arg0: i32) -> (i32, i32) {
    %c0_i32 = arith.constant 0 : i32
    %c0_i32_0 = arith.constant 0 : i32
    %c0_i32_1 = arith.constant 0 : i32
    return %c0_i32, %c0_i32_0 : i32, i32
  }
  func.func @transform_4(%arg0: i32) -> (i32, i32) {
    %c0_i32 = arith.constant 0 : i32
    %c0_i32_0 = arith.constant 0 : i32
    %c0_i32_1 = arith.constant 0 : i32
    return %c0_i32, %c0_i32_0 : i32, i32
  }
}

module attributes {stable_mosaic.version = 11 : i64} {
  func.func @_affine_act_kernel(%arg0: i32, %arg1: memref<32x32xf32, #tpu.memory_space<vmem>>, %arg2: memref<1x32xf32, #tpu.memory_space<vmem>>, %arg3: memref<1x32xf32, #tpu.memory_space<vmem>>, %arg4: memref<32x32xf32, #tpu.memory_space<vmem>>) attributes {dimension_semantics = [#tpu.dimension_semantics<parallel>], iteration_bounds = array<i64: 1>, scalar_prefetch = 0 : i64, scratch_operands = 0 : i64, tpu.core_type = #tpu.core_type<tc>, window_params = [{transform_indices = @transform_0, window_bounds = array<i64: 32, 32>}, {pipeline_mode = #tpu.pipeline_mode<synchronous>, transform_indices = @transform_1, window_bounds = array<i64: 1, 32>}, {pipeline_mode = #tpu.pipeline_mode<synchronous>, transform_indices = @transform_2, window_bounds = array<i64: 1, 32>}, {transform_indices = @transform_3, window_bounds = array<i64: 32, 32>}]} {
    %c0 = arith.constant 0 : index
    %c0_0 = arith.constant 0 : index
    %0 = vector.load %arg1[%c0, %c0_0] : memref<32x32xf32, #tpu.memory_space<vmem>>, vector<32x32xf32>
    %c0_1 = arith.constant 0 : index
    %c0_2 = arith.constant 0 : index
    %1 = vector.load %arg2[%c0_1, %c0_2] : memref<1x32xf32, #tpu.memory_space<vmem>>, vector<1x32xf32>
    %2 = vector.broadcast %1 : vector<1x32xf32> to vector<32x32xf32>
    %3 = arith.mulf %0, %2 : vector<32x32xf32>
    %c0_3 = arith.constant 0 : index
    %c0_4 = arith.constant 0 : index
    %4 = vector.load %arg3[%c0_3, %c0_4] : memref<1x32xf32, #tpu.memory_space<vmem>>, vector<1x32xf32>
    %5 = vector.broadcast %4 : vector<1x32xf32> to vector<32x32xf32>
    %6 = arith.addf %3, %5 : vector<32x32xf32>
    %cst = arith.constant 0.000000e+00 : f32
    %7 = vector.broadcast %cst : f32 to vector<32x32xf32>
    %8 = arith.maximumf %6, %7 : vector<32x32xf32>
    %c0_5 = arith.constant 0 : index
    %c0_6 = arith.constant 0 : index
    %9 = vector.load %arg4[%c0_5, %c0_6] : memref<32x32xf32, #tpu.memory_space<vmem>>, vector<32x32xf32>
    tpu.vector_store %arg4[%c0_5, %c0_6], %8 {strides = array<i32>} : memref<32x32xf32, #tpu.memory_space<vmem>>, vector<32x32xf32>,
    return
  }
  func.func @transform_0(%arg0: i32) -> (i32, i32) {
    %c0_i32 = arith.constant 0 : i32
    %c0_i32_0 = arith.constant 0 : i32
    return %arg0, %c0_i32 : i32, i32
  }
  func.func @transform_1(%arg0: i32) -> (i32, i32) {
    %c0_i32 = arith.constant 0 : i32
    %c0_i32_0 = arith.constant 0 : i32
    %c0_i32_1 = arith.constant 0 : i32
    return %c0_i32, %c0_i32_0 : i32, i32
  }
  func.func @transform_2(%arg0: i32) -> (i32, i32) {
    %c0_i32 = arith.constant 0 : i32
    %c0_i32_0 = arith.constant 0 : i32
    %c0_i32_1 = arith.constant 0 : i32
    return %c0_i32, %c0_i32_0 : i32, i32
  }
  func.func @transform_3(%arg0: i32) -> (i32, i32) {
    %c0_i32 = arith.constant 0 : i32
    %c0_i32_0 = arith.constant 0 : i32
    return %arg0, %c0_i32 : i32, i32
  }
}

module attributes {stable_mosaic.version = 11 : i64} {
  func.func @_matmul_stats_kernel(%arg0: i32, %arg1: memref<32x288xbf16, #tpu.memory_space<vmem>>, %arg2: memref<288x32xbf16, #tpu.memory_space<vmem>>, %arg3: memref<32x32xf32, #tpu.memory_space<vmem>>, %arg4: memref<1x32xf32, #tpu.memory_space<vmem>>, %arg5: memref<1x32xf32, #tpu.memory_space<vmem>>) attributes {dimension_semantics = [#tpu.dimension_semantics<arbitrary>], iteration_bounds = array<i64: 1>, scalar_prefetch = 0 : i64, scratch_operands = 0 : i64, tpu.core_type = #tpu.core_type<tc>, window_params = [{transform_indices = @transform_0, window_bounds = array<i64: 32, 288>}, {pipeline_mode = #tpu.pipeline_mode<synchronous>, transform_indices = @transform_1, window_bounds = array<i64: 288, 32>}, {transform_indices = @transform_2, window_bounds = array<i64: 32, 32>}, {pipeline_mode = #tpu.pipeline_mode<synchronous>, transform_indices = @transform_3, window_bounds = array<i64: 1, 32>}, {pipeline_mode = #tpu.pipeline_mode<synchronous>, transform_indices = @transform_4, window_bounds = array<i64: 1, 32>}]} {
    %c0 = arith.constant 0 : index
    %c0_0 = arith.constant 0 : index
    %0 = vector.load %arg1[%c0, %c0_0] : memref<32x288xbf16, #tpu.memory_space<vmem>>, vector<32x288xbf16>
    %c0_1 = arith.constant 0 : index
    %c0_2 = arith.constant 0 : index
    %1 = vector.load %arg2[%c0_1, %c0_2] : memref<288x32xbf16, #tpu.memory_space<vmem>>, vector<288x32xbf16>
    %cst = arith.constant dense<0.000000e+00> : vector<32x32xf32>
    %2 = tpu.matmul %0, %1, %cst {dimension_numbers = #tpu.dot_dimension_numbers<[1], [0], [0], [1], [0, 0, 1, 1], [], []>} : vector<32x288xbf16>, vector<288x32xbf16>, vector<32x32xf32> -> vector<32x32xf32>
    %c0_3 = arith.constant 0 : index
    %c0_4 = arith.constant 0 : index
    %3 = vector.load %arg3[%c0_3, %c0_4] : memref<32x32xf32, #tpu.memory_space<vmem>>, vector<32x32xf32>
    tpu.vector_store %arg3[%c0_3, %c0_4], %2 {strides = array<i32>} : memref<32x32xf32, #tpu.memory_space<vmem>>, vector<32x32xf32>,
    %c0_i32 = arith.constant 0 : i32
    %4 = arith.cmpi eq, %arg0, %c0_i32 : i32
    %5 = arith.extui %4 : i1 to i32
    %c0_i32_5 = arith.constant 0 : i32
    %6 = arith.cmpi ne, %5, %c0_i32_5 : i32
    scf.if %6 {
      %cst_16 = arith.constant 0.000000e+00 : f32
      %18 = vector.broadcast %cst_16 : f32 to vector<1x32xf32>
      %c0_17 = arith.constant 0 : index
      %c0_18 = arith.constant 0 : index
      %19 = vector.load %arg4[%c0_17, %c0_18] : memref<1x32xf32, #tpu.memory_space<vmem>>, vector<1x32xf32>
      tpu.vector_store %arg4[%c0_17, %c0_18], %18 {strides = array<i32>} : memref<1x32xf32, #tpu.memory_space<vmem>>, vector<1x32xf32>,
      %cst_19 = arith.constant 0.000000e+00 : f32
      %20 = vector.broadcast %cst_19 : f32 to vector<1x32xf32>
      %c0_20 = arith.constant 0 : index
      %c0_21 = arith.constant 0 : index
      %21 = vector.load %arg5[%c0_20, %c0_21] : memref<1x32xf32, #tpu.memory_space<vmem>>, vector<1x32xf32>
      tpu.vector_store %arg5[%c0_20, %c0_21], %20 {strides = array<i32>} : memref<1x32xf32, #tpu.memory_space<vmem>>, vector<1x32xf32>,
    } else {
    }
    %c0_6 = arith.constant 0 : index
    %c0_7 = arith.constant 0 : index
    %7 = vector.load %arg4[%c0_6, %c0_7] : memref<1x32xf32, #tpu.memory_space<vmem>>, vector<1x32xf32>
    %cst_8 = arith.constant dense<0.000000e+00> : vector<32xf32>
    %8 = vector.multi_reduction <add>, %2, %cst_8 [0] : vector<32x32xf32> to vector<32xf32>
    %9 = vector.shape_cast %8 : vector<32xf32> to vector<1x32xf32>
    %10 = arith.addf %7, %9 : vector<1x32xf32>
    %c0_9 = arith.constant 0 : index
    %c0_10 = arith.constant 0 : index
    %11 = vector.load %arg4[%c0_9, %c0_10] : memref<1x32xf32, #tpu.memory_space<vmem>>, vector<1x32xf32>
    tpu.vector_store %arg4[%c0_9, %c0_10], %10 {strides = array<i32>} : memref<1x32xf32, #tpu.memory_space<vmem>>, vector<1x32xf32>,
    %c0_11 = arith.constant 0 : index
    %c0_12 = arith.constant 0 : index
    %12 = vector.load %arg5[%c0_11, %c0_12] : memref<1x32xf32, #tpu.memory_space<vmem>>, vector<1x32xf32>
    %13 = arith.mulf %2, %2 : vector<32x32xf32>
    %cst_13 = arith.constant dense<0.000000e+00> : vector<32xf32>
    %14 = vector.multi_reduction <add>, %13, %cst_13 [0] : vector<32x32xf32> to vector<32xf32>
    %15 = vector.shape_cast %14 : vector<32xf32> to vector<1x32xf32>
    %16 = arith.addf %12, %15 : vector<1x32xf32>
    %c0_14 = arith.constant 0 : index
    %c0_15 = arith.constant 0 : index
    %17 = vector.load %arg5[%c0_14, %c0_15] : memref<1x32xf32, #tpu.memory_space<vmem>>, vector<1x32xf32>
    tpu.vector_store %arg5[%c0_14, %c0_15], %16 {strides = array<i32>} : memref<1x32xf32, #tpu.memory_space<vmem>>, vector<1x32xf32>,
    return
  }
  func.func @transform_0(%arg0: i32) -> (i32, i32) {
    %c0_i32 = arith.constant 0 : i32
    %c0_i32_0 = arith.constant 0 : i32
    return %arg0, %c0_i32 : i32, i32
  }
  func.func @transform_1(%arg0: i32) -> (i32, i32) {
    %c0_i32 = arith.constant 0 : i32
    %c0_i32_0 = arith.constant 0 : i32
    %c0_i32_1 = arith.constant 0 : i32
    return %c0_i32, %c0_i32_0 : i32, i32
  }
  func.func @transform_2(%arg0: i32) -> (i32, i32) {
    %c0_i32 = arith.constant 0 : i32
    %c0_i32_0 = arith.constant 0 : i32
    return %arg0, %c0_i32 : i32, i32
  }
  func.func @transform_3(%arg0: i32) -> (i32, i32) {
    %c0_i32 = arith.constant 0 : i32
    %c0_i32_0 = arith.constant 0 : i32
    %c0_i32_1 = arith.constant 0 : i32
    return %c0_i32, %c0_i32_0 : i32, i32
  }
  func.func @transform_4(%arg0: i32) -> (i32, i32) {
    %c0_i32 = arith.constant 0 : i32
    %c0_i32_0 = arith.constant 0 : i32
    %c0_i32_1 = arith.constant 0 : i32
    return %c0_i32, %c0_i32_0 : i32, i32
  }
}

module attributes {stable_mosaic.version = 11 : i64} {
  func.func @_affine_act_res_kernel(%arg0: i32, %arg1: memref<32x32xf32, #tpu.memory_space<vmem>>, %arg2: memref<1x32xf32, #tpu.memory_space<vmem>>, %arg3: memref<1x32xf32, #tpu.memory_space<vmem>>, %arg4: memref<32x32xf32, #tpu.memory_space<vmem>>, %arg5: memref<32x32xf32, #tpu.memory_space<vmem>>) attributes {dimension_semantics = [#tpu.dimension_semantics<parallel>], iteration_bounds = array<i64: 1>, scalar_prefetch = 0 : i64, scratch_operands = 0 : i64, tpu.core_type = #tpu.core_type<tc>, window_params = [{transform_indices = @transform_0, window_bounds = array<i64: 32, 32>}, {pipeline_mode = #tpu.pipeline_mode<synchronous>, transform_indices = @transform_1, window_bounds = array<i64: 1, 32>}, {pipeline_mode = #tpu.pipeline_mode<synchronous>, transform_indices = @transform_2, window_bounds = array<i64: 1, 32>}, {transform_indices = @transform_3, window_bounds = array<i64: 32, 32>}, {transform_indices = @transform_4, window_bounds = array<i64: 32, 32>}]} {
    %c0 = arith.constant 0 : index
    %c0_0 = arith.constant 0 : index
    %0 = vector.load %arg1[%c0, %c0_0] : memref<32x32xf32, #tpu.memory_space<vmem>>, vector<32x32xf32>
    %c0_1 = arith.constant 0 : index
    %c0_2 = arith.constant 0 : index
    %1 = vector.load %arg2[%c0_1, %c0_2] : memref<1x32xf32, #tpu.memory_space<vmem>>, vector<1x32xf32>
    %2 = vector.broadcast %1 : vector<1x32xf32> to vector<32x32xf32>
    %3 = arith.mulf %0, %2 : vector<32x32xf32>
    %c0_3 = arith.constant 0 : index
    %c0_4 = arith.constant 0 : index
    %4 = vector.load %arg3[%c0_3, %c0_4] : memref<1x32xf32, #tpu.memory_space<vmem>>, vector<1x32xf32>
    %5 = vector.broadcast %4 : vector<1x32xf32> to vector<32x32xf32>
    %6 = arith.addf %3, %5 : vector<32x32xf32>
    %c0_5 = arith.constant 0 : index
    %c0_6 = arith.constant 0 : index
    %7 = vector.load %arg4[%c0_5, %c0_6] : memref<32x32xf32, #tpu.memory_space<vmem>>, vector<32x32xf32>
    %8 = arith.addf %6, %7 : vector<32x32xf32>
    %c0_7 = arith.constant 0 : index
    %c0_8 = arith.constant 0 : index
    %9 = vector.load %arg5[%c0_7, %c0_8] : memref<32x32xf32, #tpu.memory_space<vmem>>, vector<32x32xf32>
    tpu.vector_store %arg5[%c0_7, %c0_8], %8 {strides = array<i32>} : memref<32x32xf32, #tpu.memory_space<vmem>>, vector<32x32xf32>,
    return
  }
  func.func @transform_0(%arg0: i32) -> (i32, i32) {
    %c0_i32 = arith.constant 0 : i32
    %c0_i32_0 = arith.constant 0 : i32
    return %arg0, %c0_i32 : i32, i32
  }
  func.func @transform_1(%arg0: i32) -> (i32, i32) {
    %c0_i32 = arith.constant 0 : i32
    %c0_i32_0 = arith.constant 0 : i32
    %c0_i32_1 = arith.constant 0 : i32
    return %c0_i32, %c0_i32_0 : i32, i32
  }
  func.func @transform_2(%arg0: i32) -> (i32, i32) {
    %c0_i32 = arith.constant 0 : i32
    %c0_i32_0 = arith.constant 0 : i32
    %c0_i32_1 = arith.constant 0 : i32
    return %c0_i32, %c0_i32_0 : i32, i32
  }
  func.func @transform_3(%arg0: i32) -> (i32, i32) {
    %c0_i32 = arith.constant 0 : i32
    %c0_i32_0 = arith.constant 0 : i32
    return %arg0, %c0_i32 : i32, i32
  }
  func.func @transform_4(%arg0: i32) -> (i32, i32) {
    %c0_i32 = arith.constant 0 : i32
    %c0_i32_0 = arith.constant 0 : i32
    return %arg0, %c0_i32 : i32, i32
  }
}

module attributes {stable_mosaic.version = 11 : i64} {
  func.func @_matmul_stats_kernel(%arg0: i32, %arg1: memref<32x128xbf16, #tpu.memory_space<vmem>>, %arg2: memref<128x64xbf16, #tpu.memory_space<vmem>>, %arg3: memref<32x64xf32, #tpu.memory_space<vmem>>, %arg4: memref<1x64xf32, #tpu.memory_space<vmem>>, %arg5: memref<1x64xf32, #tpu.memory_space<vmem>>) attributes {dimension_semantics = [#tpu.dimension_semantics<arbitrary>], iteration_bounds = array<i64: 1>, scalar_prefetch = 0 : i64, scratch_operands = 0 : i64, tpu.core_type = #tpu.core_type<tc>, window_params = [{transform_indices = @transform_0, window_bounds = array<i64: 32, 128>}, {pipeline_mode = #tpu.pipeline_mode<synchronous>, transform_indices = @transform_1, window_bounds = array<i64: 128, 64>}, {transform_indices = @transform_2, window_bounds = array<i64: 32, 64>}, {pipeline_mode = #tpu.pipeline_mode<synchronous>, transform_indices = @transform_3, window_bounds = array<i64: 1, 64>}, {pipeline_mode = #tpu.pipeline_mode<synchronous>, transform_indices = @transform_4, window_bounds = array<i64: 1, 64>}]} {
    %c0 = arith.constant 0 : index
    %c0_0 = arith.constant 0 : index
    %0 = vector.load %arg1[%c0, %c0_0] : memref<32x128xbf16, #tpu.memory_space<vmem>>, vector<32x128xbf16>
    %c0_1 = arith.constant 0 : index
    %c0_2 = arith.constant 0 : index
    %1 = vector.load %arg2[%c0_1, %c0_2] : memref<128x64xbf16, #tpu.memory_space<vmem>>, vector<128x64xbf16>
    %cst = arith.constant dense<0.000000e+00> : vector<32x64xf32>
    %2 = tpu.matmul %0, %1, %cst {dimension_numbers = #tpu.dot_dimension_numbers<[1], [0], [0], [1], [0, 0, 1, 1], [], []>} : vector<32x128xbf16>, vector<128x64xbf16>, vector<32x64xf32> -> vector<32x64xf32>
    %c0_3 = arith.constant 0 : index
    %c0_4 = arith.constant 0 : index
    %3 = vector.load %arg3[%c0_3, %c0_4] : memref<32x64xf32, #tpu.memory_space<vmem>>, vector<32x64xf32>
    tpu.vector_store %arg3[%c0_3, %c0_4], %2 {strides = array<i32>} : memref<32x64xf32, #tpu.memory_space<vmem>>, vector<32x64xf32>,
    %c0_i32 = arith.constant 0 : i32
    %4 = arith.cmpi eq, %arg0, %c0_i32 : i32
    %5 = arith.extui %4 : i1 to i32
    %c0_i32_5 = arith.constant 0 : i32
    %6 = arith.cmpi ne, %5, %c0_i32_5 : i32
    scf.if %6 {
      %cst_16 = arith.constant 0.000000e+00 : f32
      %18 = vector.broadcast %cst_16 : f32 to vector<1x64xf32>
      %c0_17 = arith.constant 0 : index
      %c0_18 = arith.constant 0 : index
      %19 = vector.load %arg4[%c0_17, %c0_18] : memref<1x64xf32, #tpu.memory_space<vmem>>, vector<1x64xf32>
      tpu.vector_store %arg4[%c0_17, %c0_18], %18 {strides = array<i32>} : memref<1x64xf32, #tpu.memory_space<vmem>>, vector<1x64xf32>,
      %cst_19 = arith.constant 0.000000e+00 : f32
      %20 = vector.broadcast %cst_19 : f32 to vector<1x64xf32>
      %c0_20 = arith.constant 0 : index
      %c0_21 = arith.constant 0 : index
      %21 = vector.load %arg5[%c0_20, %c0_21] : memref<1x64xf32, #tpu.memory_space<vmem>>, vector<1x64xf32>
      tpu.vector_store %arg5[%c0_20, %c0_21], %20 {strides = array<i32>} : memref<1x64xf32, #tpu.memory_space<vmem>>, vector<1x64xf32>,
    } else {
    }
    %c0_6 = arith.constant 0 : index
    %c0_7 = arith.constant 0 : index
    %7 = vector.load %arg4[%c0_6, %c0_7] : memref<1x64xf32, #tpu.memory_space<vmem>>, vector<1x64xf32>
    %cst_8 = arith.constant dense<0.000000e+00> : vector<64xf32>
    %8 = vector.multi_reduction <add>, %2, %cst_8 [0] : vector<32x64xf32> to vector<64xf32>
    %9 = vector.shape_cast %8 : vector<64xf32> to vector<1x64xf32>
    %10 = arith.addf %7, %9 : vector<1x64xf32>
    %c0_9 = arith.constant 0 : index
    %c0_10 = arith.constant 0 : index
    %11 = vector.load %arg4[%c0_9, %c0_10] : memref<1x64xf32, #tpu.memory_space<vmem>>, vector<1x64xf32>
    tpu.vector_store %arg4[%c0_9, %c0_10], %10 {strides = array<i32>} : memref<1x64xf32, #tpu.memory_space<vmem>>, vector<1x64xf32>,
    %c0_11 = arith.constant 0 : index
    %c0_12 = arith.constant 0 : index
    %12 = vector.load %arg5[%c0_11, %c0_12] : memref<1x64xf32, #tpu.memory_space<vmem>>, vector<1x64xf32>
    %13 = arith.mulf %2, %2 : vector<32x64xf32>
    %cst_13 = arith.constant dense<0.000000e+00> : vector<64xf32>
    %14 = vector.multi_reduction <add>, %13, %cst_13 [0] : vector<32x64xf32> to vector<64xf32>
    %15 = vector.shape_cast %14 : vector<64xf32> to vector<1x64xf32>
    %16 = arith.addf %12, %15 : vector<1x64xf32>
    %c0_14 = arith.constant 0 : index
    %c0_15 = arith.constant 0 : index
    %17 = vector.load %arg5[%c0_14, %c0_15] : memref<1x64xf32, #tpu.memory_space<vmem>>, vector<1x64xf32>
    tpu.vector_store %arg5[%c0_14, %c0_15], %16 {strides = array<i32>} : memref<1x64xf32, #tpu.memory_space<vmem>>, vector<1x64xf32>,
    return
  }
  func.func @transform_0(%arg0: i32) -> (i32, i32) {
    %c0_i32 = arith.constant 0 : i32
    %c0_i32_0 = arith.constant 0 : i32
    return %arg0, %c0_i32 : i32, i32
  }
  func.func @transform_1(%arg0: i32) -> (i32, i32) {
    %c0_i32 = arith.constant 0 : i32
    %c0_i32_0 = arith.constant 0 : i32
    %c0_i32_1 = arith.constant 0 : i32
    return %c0_i32, %c0_i32_0 : i32, i32
  }
  func.func @transform_2(%arg0: i32) -> (i32, i32) {
    %c0_i32 = arith.constant 0 : i32
    %c0_i32_0 = arith.constant 0 : i32
    return %arg0, %c0_i32 : i32, i32
  }
  func.func @transform_3(%arg0: i32) -> (i32, i32) {
    %c0_i32 = arith.constant 0 : i32
    %c0_i32_0 = arith.constant 0 : i32
    %c0_i32_1 = arith.constant 0 : i32
    return %c0_i32, %c0_i32_0 : i32, i32
  }
  func.func @transform_4(%arg0: i32) -> (i32, i32) {
    %c0_i32 = arith.constant 0 : i32
    %c0_i32_0 = arith.constant 0 : i32
    %c0_i32_1 = arith.constant 0 : i32
    return %c0_i32, %c0_i32_0 : i32, i32
  }
}

module attributes {stable_mosaic.version = 11 : i64} {
  func.func @_affine_act_kernel(%arg0: i32, %arg1: memref<32x64xf32, #tpu.memory_space<vmem>>, %arg2: memref<1x64xf32, #tpu.memory_space<vmem>>, %arg3: memref<1x64xf32, #tpu.memory_space<vmem>>, %arg4: memref<32x64xf32, #tpu.memory_space<vmem>>) attributes {dimension_semantics = [#tpu.dimension_semantics<parallel>], iteration_bounds = array<i64: 1>, scalar_prefetch = 0 : i64, scratch_operands = 0 : i64, tpu.core_type = #tpu.core_type<tc>, window_params = [{transform_indices = @transform_0, window_bounds = array<i64: 32, 64>}, {pipeline_mode = #tpu.pipeline_mode<synchronous>, transform_indices = @transform_1, window_bounds = array<i64: 1, 64>}, {pipeline_mode = #tpu.pipeline_mode<synchronous>, transform_indices = @transform_2, window_bounds = array<i64: 1, 64>}, {transform_indices = @transform_3, window_bounds = array<i64: 32, 64>}]} {
    %c0 = arith.constant 0 : index
    %c0_0 = arith.constant 0 : index
    %0 = vector.load %arg1[%c0, %c0_0] : memref<32x64xf32, #tpu.memory_space<vmem>>, vector<32x64xf32>
    %c0_1 = arith.constant 0 : index
    %c0_2 = arith.constant 0 : index
    %1 = vector.load %arg2[%c0_1, %c0_2] : memref<1x64xf32, #tpu.memory_space<vmem>>, vector<1x64xf32>
    %2 = vector.broadcast %1 : vector<1x64xf32> to vector<32x64xf32>
    %3 = arith.mulf %0, %2 : vector<32x64xf32>
    %c0_3 = arith.constant 0 : index
    %c0_4 = arith.constant 0 : index
    %4 = vector.load %arg3[%c0_3, %c0_4] : memref<1x64xf32, #tpu.memory_space<vmem>>, vector<1x64xf32>
    %5 = vector.broadcast %4 : vector<1x64xf32> to vector<32x64xf32>
    %6 = arith.addf %3, %5 : vector<32x64xf32>
    %cst = arith.constant 0.000000e+00 : f32
    %7 = vector.broadcast %cst : f32 to vector<32x64xf32>
    %8 = arith.maximumf %6, %7 : vector<32x64xf32>
    %c0_5 = arith.constant 0 : index
    %c0_6 = arith.constant 0 : index
    %9 = vector.load %arg4[%c0_5, %c0_6] : memref<32x64xf32, #tpu.memory_space<vmem>>, vector<32x64xf32>
    tpu.vector_store %arg4[%c0_5, %c0_6], %8 {strides = array<i32>} : memref<32x64xf32, #tpu.memory_space<vmem>>, vector<32x64xf32>,
    return
  }
  func.func @transform_0(%arg0: i32) -> (i32, i32) {
    %c0_i32 = arith.constant 0 : i32
    %c0_i32_0 = arith.constant 0 : i32
    return %arg0, %c0_i32 : i32, i32
  }
  func.func @transform_1(%arg0: i32) -> (i32, i32) {
    %c0_i32 = arith.constant 0 : i32
    %c0_i32_0 = arith.constant 0 : i32
    %c0_i32_1 = arith.constant 0 : i32
    return %c0_i32, %c0_i32_0 : i32, i32
  }
  func.func @transform_2(%arg0: i32) -> (i32, i32) {
    %c0_i32 = arith.constant 0 : i32
    %c0_i32_0 = arith.constant 0 : i32
    %c0_i32_1 = arith.constant 0 : i32
    return %c0_i32, %c0_i32_0 : i32, i32
  }
  func.func @transform_3(%arg0: i32) -> (i32, i32) {
    %c0_i32 = arith.constant 0 : i32
    %c0_i32_0 = arith.constant 0 : i32
    return %arg0, %c0_i32 : i32, i32
  }
}

module attributes {stable_mosaic.version = 11 : i64} {
  func.func @_affine_act_kernel(%arg0: i32, %arg1: memref<128x32xf32, #tpu.memory_space<vmem>>, %arg2: memref<1x32xf32, #tpu.memory_space<vmem>>, %arg3: memref<1x32xf32, #tpu.memory_space<vmem>>, %arg4: memref<128x32xf32, #tpu.memory_space<vmem>>) attributes {dimension_semantics = [#tpu.dimension_semantics<parallel>], iteration_bounds = array<i64: 1>, scalar_prefetch = 0 : i64, scratch_operands = 0 : i64, tpu.core_type = #tpu.core_type<tc>, window_params = [{transform_indices = @transform_0, window_bounds = array<i64: 128, 32>}, {pipeline_mode = #tpu.pipeline_mode<synchronous>, transform_indices = @transform_1, window_bounds = array<i64: 1, 32>}, {pipeline_mode = #tpu.pipeline_mode<synchronous>, transform_indices = @transform_2, window_bounds = array<i64: 1, 32>}, {transform_indices = @transform_3, window_bounds = array<i64: 128, 32>}]} {
    %c0 = arith.constant 0 : index
    %c0_0 = arith.constant 0 : index
    %0 = vector.load %arg1[%c0, %c0_0] : memref<128x32xf32, #tpu.memory_space<vmem>>, vector<128x32xf32>
    %c0_1 = arith.constant 0 : index
    %c0_2 = arith.constant 0 : index
    %1 = vector.load %arg2[%c0_1, %c0_2] : memref<1x32xf32, #tpu.memory_space<vmem>>, vector<1x32xf32>
    %2 = vector.broadcast %1 : vector<1x32xf32> to vector<128x32xf32>
    %3 = arith.mulf %0, %2 : vector<128x32xf32>
    %c0_3 = arith.constant 0 : index
    %c0_4 = arith.constant 0 : index
    %4 = vector.load %arg3[%c0_3, %c0_4] : memref<1x32xf32, #tpu.memory_space<vmem>>, vector<1x32xf32>
    %5 = vector.broadcast %4 : vector<1x32xf32> to vector<128x32xf32>
    %6 = arith.addf %3, %5 : vector<128x32xf32>
    %cst = arith.constant 0.000000e+00 : f32
    %7 = vector.broadcast %cst : f32 to vector<128x32xf32>
    %8 = arith.maximumf %6, %7 : vector<128x32xf32>
    %c0_5 = arith.constant 0 : index
    %c0_6 = arith.constant 0 : index
    %9 = vector.load %arg4[%c0_5, %c0_6] : memref<128x32xf32, #tpu.memory_space<vmem>>, vector<128x32xf32>
    tpu.vector_store %arg4[%c0_5, %c0_6], %8 {strides = array<i32>} : memref<128x32xf32, #tpu.memory_space<vmem>>, vector<128x32xf32>,
    return
  }
  func.func @transform_0(%arg0: i32) -> (i32, i32) {
    %c0_i32 = arith.constant 0 : i32
    %c0_i32_0 = arith.constant 0 : i32
    return %arg0, %c0_i32 : i32, i32
  }
  func.func @transform_1(%arg0: i32) -> (i32, i32) {
    %c0_i32 = arith.constant 0 : i32
    %c0_i32_0 = arith.constant 0 : i32
    %c0_i32_1 = arith.constant 0 : i32
    return %c0_i32, %c0_i32_0 : i32, i32
  }
  func.func @transform_2(%arg0: i32) -> (i32, i32) {
    %c0_i32 = arith.constant 0 : i32
    %c0_i32_0 = arith.constant 0 : i32
    %c0_i32_1 = arith.constant 0 : i32
    return %c0_i32, %c0_i32_0 : i32, i32
  }
  func.func @transform_3(%arg0: i32) -> (i32, i32) {
    %c0_i32 = arith.constant 0 : i32
    %c0_i32_0 = arith.constant 0 : i32
    return %arg0, %c0_i32 : i32, i32
  }
}

module attributes {stable_mosaic.version = 11 : i64} {
  func.func @_matmul_stats_kernel(%arg0: i32, %arg1: memref<128x64xbf16, #tpu.memory_space<vmem>>, %arg2: memref<64x32xbf16, #tpu.memory_space<vmem>>, %arg3: memref<128x32xf32, #tpu.memory_space<vmem>>, %arg4: memref<1x32xf32, #tpu.memory_space<vmem>>, %arg5: memref<1x32xf32, #tpu.memory_space<vmem>>) attributes {dimension_semantics = [#tpu.dimension_semantics<arbitrary>], iteration_bounds = array<i64: 1>, scalar_prefetch = 0 : i64, scratch_operands = 0 : i64, tpu.core_type = #tpu.core_type<tc>, window_params = [{transform_indices = @transform_0, window_bounds = array<i64: 128, 64>}, {pipeline_mode = #tpu.pipeline_mode<synchronous>, transform_indices = @transform_1, window_bounds = array<i64: 64, 32>}, {transform_indices = @transform_2, window_bounds = array<i64: 128, 32>}, {pipeline_mode = #tpu.pipeline_mode<synchronous>, transform_indices = @transform_3, window_bounds = array<i64: 1, 32>}, {pipeline_mode = #tpu.pipeline_mode<synchronous>, transform_indices = @transform_4, window_bounds = array<i64: 1, 32>}]} {
    %c0 = arith.constant 0 : index
    %c0_0 = arith.constant 0 : index
    %0 = vector.load %arg1[%c0, %c0_0] : memref<128x64xbf16, #tpu.memory_space<vmem>>, vector<128x64xbf16>
    %c0_1 = arith.constant 0 : index
    %c0_2 = arith.constant 0 : index
    %1 = vector.load %arg2[%c0_1, %c0_2] : memref<64x32xbf16, #tpu.memory_space<vmem>>, vector<64x32xbf16>
    %cst = arith.constant dense<0.000000e+00> : vector<128x32xf32>
    %2 = tpu.matmul %0, %1, %cst {dimension_numbers = #tpu.dot_dimension_numbers<[1], [0], [0], [1], [0, 0, 1, 1], [], []>} : vector<128x64xbf16>, vector<64x32xbf16>, vector<128x32xf32> -> vector<128x32xf32>
    %c0_3 = arith.constant 0 : index
    %c0_4 = arith.constant 0 : index
    %3 = vector.load %arg3[%c0_3, %c0_4] : memref<128x32xf32, #tpu.memory_space<vmem>>, vector<128x32xf32>
    tpu.vector_store %arg3[%c0_3, %c0_4], %2 {strides = array<i32>} : memref<128x32xf32, #tpu.memory_space<vmem>>, vector<128x32xf32>,
    %c0_i32 = arith.constant 0 : i32
    %4 = arith.cmpi eq, %arg0, %c0_i32 : i32
    %5 = arith.extui %4 : i1 to i32
    %c0_i32_5 = arith.constant 0 : i32
    %6 = arith.cmpi ne, %5, %c0_i32_5 : i32
    scf.if %6 {
      %cst_16 = arith.constant 0.000000e+00 : f32
      %18 = vector.broadcast %cst_16 : f32 to vector<1x32xf32>
      %c0_17 = arith.constant 0 : index
      %c0_18 = arith.constant 0 : index
      %19 = vector.load %arg4[%c0_17, %c0_18] : memref<1x32xf32, #tpu.memory_space<vmem>>, vector<1x32xf32>
      tpu.vector_store %arg4[%c0_17, %c0_18], %18 {strides = array<i32>} : memref<1x32xf32, #tpu.memory_space<vmem>>, vector<1x32xf32>,
      %cst_19 = arith.constant 0.000000e+00 : f32
      %20 = vector.broadcast %cst_19 : f32 to vector<1x32xf32>
      %c0_20 = arith.constant 0 : index
      %c0_21 = arith.constant 0 : index
      %21 = vector.load %arg5[%c0_20, %c0_21] : memref<1x32xf32, #tpu.memory_space<vmem>>, vector<1x32xf32>
      tpu.vector_store %arg5[%c0_20, %c0_21], %20 {strides = array<i32>} : memref<1x32xf32, #tpu.memory_space<vmem>>, vector<1x32xf32>,
    } else {
    }
    %c0_6 = arith.constant 0 : index
    %c0_7 = arith.constant 0 : index
    %7 = vector.load %arg4[%c0_6, %c0_7] : memref<1x32xf32, #tpu.memory_space<vmem>>, vector<1x32xf32>
    %cst_8 = arith.constant dense<0.000000e+00> : vector<32xf32>
    %8 = vector.multi_reduction <add>, %2, %cst_8 [0] : vector<128x32xf32> to vector<32xf32>
    %9 = vector.shape_cast %8 : vector<32xf32> to vector<1x32xf32>
    %10 = arith.addf %7, %9 : vector<1x32xf32>
    %c0_9 = arith.constant 0 : index
    %c0_10 = arith.constant 0 : index
    %11 = vector.load %arg4[%c0_9, %c0_10] : memref<1x32xf32, #tpu.memory_space<vmem>>, vector<1x32xf32>
    tpu.vector_store %arg4[%c0_9, %c0_10], %10 {strides = array<i32>} : memref<1x32xf32, #tpu.memory_space<vmem>>, vector<1x32xf32>,
    %c0_11 = arith.constant 0 : index
    %c0_12 = arith.constant 0 : index
    %12 = vector.load %arg5[%c0_11, %c0_12] : memref<1x32xf32, #tpu.memory_space<vmem>>, vector<1x32xf32>
    %13 = arith.mulf %2, %2 : vector<128x32xf32>
    %cst_13 = arith.constant dense<0.000000e+00> : vector<32xf32>
    %14 = vector.multi_reduction <add>, %13, %cst_13 [0] : vector<128x32xf32> to vector<32xf32>
    %15 = vector.shape_cast %14 : vector<32xf32> to vector<1x32xf32>
    %16 = arith.addf %12, %15 : vector<1x32xf32>
    %c0_14 = arith.constant 0 : index
    %c0_15 = arith.constant 0 : index
    %17 = vector.load %arg5[%c0_14, %c0_15] : memref<1x32xf32, #tpu.memory_space<vmem>>, vector<1x32xf32>
    tpu.vector_store %arg5[%c0_14, %c0_15], %16 {strides = array<i32>} : memref<1x32xf32, #tpu.memory_space<vmem>>, vector<1x32xf32>,
    return
  }
  func.func @transform_0(%arg0: i32) -> (i32, i32) {
    %c0_i32 = arith.constant 0 : i32
    %c0_i32_0 = arith.constant 0 : i32
    return %arg0, %c0_i32 : i32, i32
  }
  func.func @transform_1(%arg0: i32) -> (i32, i32) {
    %c0_i32 = arith.constant 0 : i32
    %c0_i32_0 = arith.constant 0 : i32
    %c0_i32_1 = arith.constant 0 : i32
    return %c0_i32, %c0_i32_0 : i32, i32
  }
  func.func @transform_2(%arg0: i32) -> (i32, i32) {
    %c0_i32 = arith.constant 0 : i32
    %c0_i32_0 = arith.constant 0 : i32
    return %arg0, %c0_i32 : i32, i32
  }
  func.func @transform_3(%arg0: i32) -> (i32, i32) {
    %c0_i32 = arith.constant 0 : i32
    %c0_i32_0 = arith.constant 0 : i32
    %c0_i32_1 = arith.constant 0 : i32
    return %c0_i32, %c0_i32_0 : i32, i32
  }
  func.func @transform_4(%arg0: i32) -> (i32, i32) {
    %c0_i32 = arith.constant 0 : i32
    %c0_i32_0 = arith.constant 0 : i32
    %c0_i32_1 = arith.constant 0 : i32
    return %c0_i32, %c0_i32_0 : i32, i32
  }
}

module attributes {stable_mosaic.version = 11 : i64} {
  func.func @_matmul_bias_act_kernel(%arg0: i32, %arg1: memref<256x392xbf16, #tpu.memory_space<vmem>>, %arg2: memref<392x3xbf16, #tpu.memory_space<vmem>>, %arg3: memref<1x3xf32, #tpu.memory_space<vmem>>, %arg4: memref<256x3xf32, #tpu.memory_space<vmem>>) attributes {dimension_semantics = [#tpu.dimension_semantics<parallel>], iteration_bounds = array<i64: 2>, scalar_prefetch = 0 : i64, scratch_operands = 0 : i64, tpu.core_type = #tpu.core_type<tc>, window_params = [{transform_indices = @transform_0, window_bounds = array<i64: 256, 392>}, {pipeline_mode = #tpu.pipeline_mode<synchronous>, transform_indices = @transform_1, window_bounds = array<i64: 392, 3>}, {pipeline_mode = #tpu.pipeline_mode<synchronous>, transform_indices = @transform_2, window_bounds = array<i64: 1, 3>}, {transform_indices = @transform_3, window_bounds = array<i64: 256, 3>}]} {
    %c0 = arith.constant 0 : index
    %c0_0 = arith.constant 0 : index
    %0 = vector.load %arg1[%c0, %c0_0] : memref<256x392xbf16, #tpu.memory_space<vmem>>, vector<256x392xbf16>
    %c0_1 = arith.constant 0 : index
    %c0_2 = arith.constant 0 : index
    %1 = vector.load %arg2[%c0_1, %c0_2] : memref<392x3xbf16, #tpu.memory_space<vmem>>, vector<392x3xbf16>
    %cst = arith.constant dense<0.000000e+00> : vector<256x3xf32>
    %2 = tpu.matmul %0, %1, %cst {dimension_numbers = #tpu.dot_dimension_numbers<[1], [0], [0], [1], [0, 0, 1, 1], [], []>} : vector<256x392xbf16>, vector<392x3xbf16>, vector<256x3xf32> -> vector<256x3xf32>
    %c0_3 = arith.constant 0 : index
    %c0_4 = arith.constant 0 : index
    %3 = vector.load %arg3[%c0_3, %c0_4] : memref<1x3xf32, #tpu.memory_space<vmem>>, vector<1x3xf32>
    %4 = vector.broadcast %3 : vector<1x3xf32> to vector<256x3xf32>
    %5 = arith.addf %2, %4 : vector<256x3xf32>
    %6 = math.tanh %5 : vector<256x3xf32>
    %c0_5 = arith.constant 0 : index
    %c0_6 = arith.constant 0 : index
    %7 = vector.load %arg4[%c0_5, %c0_6] : memref<256x3xf32, #tpu.memory_space<vmem>>, vector<256x3xf32>
    tpu.vector_store %arg4[%c0_5, %c0_6], %6 {strides = array<i32>} : memref<256x3xf32, #tpu.memory_space<vmem>>, vector<256x3xf32>,
    return
  }
  func.func @transform_0(%arg0: i32) -> (i32, i32) {
    %c0_i32 = arith.constant 0 : i32
    %c0_i32_0 = arith.constant 0 : i32
    return %arg0, %c0_i32 : i32, i32
  }
  func.func @transform_1(%arg0: i32) -> (i32, i32) {
    %c0_i32 = arith.constant 0 : i32
    %c0_i32_0 = arith.constant 0 : i32
    %c0_i32_1 = arith.constant 0 : i32
    return %c0_i32, %c0_i32_0 : i32, i32
  }
  func.func @transform_2(%arg0: i32) -> (i32, i32) {
    %c0_i32 = arith.constant 0 : i32
    %c0_i32_0 = arith.constant 0 : i32
    %c0_i32_1 = arith.constant 0 : i32
    return %c0_i32, %c0_i32_0 : i32, i32
  }
  func.func @transform_3(%arg0: i32) -> (i32, i32) {
    %c0_i32 = arith.constant 0 : i32
    %c0_i32_0 = arith.constant 0 : i32
    return %arg0, %c0_i32 : i32, i32
  }
}

</mosaic_0001>

<bundles_post_ra>
// kernel: resnet_generator_forward.20
= control target key start
LH: loop header
LB: loop body
LE: loop exit
PB: predicated region body
PF: predicated region fallthrough
CT: control target
= control target key end

     0   :  { %s448_s12 = smov 0   ;;  %s639_s0 = inlined_call_operand.vmem [shape: f32[512,8], index: 0, kind: input, shape index: {}]   ;;  %s640_s1 = inlined_call_operand.vmem [shape: f32[1,8], index: 1, kind: input, shape index: {}]   ;;  %s641_s2 = inlined_call_operand.vmem [shape: f32[1,8], index: 2, kind: input, shape index: {}]   ;;  %s642_s3 = inlined_call_operand.vmem [shape: f32[512,8], index: 3, kind: output, shape index: {}]  }
   0x1 LB: > { %s399_s13 = sadd.s32 4294967295, %s426_s12   ;;  %p403_p0 = scmp.ge.s32.totalorder %s426_s12, 1  ;;  %s426_s12 = sphi %s448_s12, %s13_s12  }
   0x2   : > { %p138_p1 = scmp.lt.s32.totalorder %s426_s12, 3 }
   0x4   : > { %p139_p2 = pnand %p403_p0, %p138_p1 }
   0x5   : > { %s404_s14 = sshll.u32 (!%p139_p2), %s399_s13, 5 }
   0x6   : > { %142 = sbr.rel (%p139_p2) target bundleno = 53 (0x35), region = 32  ;;  %p163_p3 = scmp.lt.s32.totalorder (!%p139_p2), %s404_s14, 63 }
   0xb   : > { %s644_s14 = smov (!%p163_p3, %s404_s14), 63  ;;  %v459_v0 = vld [vmem:[%s640_s1] ss:$0 sm:$0xff]  ;;  %vm310_vm0 = vcmask 64512  }
   0xc   : > { %s405_s17 = sshll.u32 %s644_s14, 3  ;;  %v469_v1 = vld [vmem:[%s641_s2] ss:$0 sm:$0xff] }
   0xd   : > { %s464_s20 = scalar_lea.vmem %s639_s0, %s405_s17  ;;  %s492_s25 = scalar_lea.vmem %s642_s3, %s405_s17 }
   0xe   : > { %v174_v2 = vld [vmem:[%s464_s20] sm:$0xff]  ;;  %v175_v3 = vld [vmem:[%s464_s20 + $0x8] sm:$0xff]  ;;  %v176_v4 = vld [vmem:[%s464_s20 + $0x10] sm:$0xff] }
   0xf   : > { %v210_v5 = vmul.f32 %v459_v0, %v174_v2  ;;  %v211_v6 = vmul.f32 %v459_v0, %v175_v3  ;;  %v212_v7 = vmul.f32 %v459_v0, %v176_v4  ;;  %v177_v8 = vld [vmem:[%s464_s20 + $0x18] sm:$0xff]  ;;  %v178_v9 = vld [vmem:[%s464_s20 + $0x20] sm:$0xff]  ;;  %v179_v10 = vld [vmem:[%s464_s20 + $0x28] sm:$0xff] }
  0x10   : > { %v213_v11 = vmul.f32 %v459_v0, %v177_v8  ;;  %v214_v12 = vmul.f32 %v459_v0, %v178_v9  ;;  %v215_v13 = vmul.f32 %v459_v0, %v179_v10  ;;  %v180_v14 = vld [vmem:[%s464_s20 + $0x30] sm:$0xff]  ;;  %v181_v15 = vld [vmem:[%s464_s20 + $0x38] sm:$0xff]  ;;  %v182_v24 = vld [vmem:[%s464_s20 + $0x40] sm:$0xff] }
  0x11   : > { %v246_v16 = vadd.f32 %v469_v1, %v210_v5  ;;  %v247_v17 = vadd.f32 %v469_v1, %v211_v6  ;;  %v248_v18 = vadd.f32 %v469_v1, %v212_v7  ;;  %v216_v19 = vmul.f32 %v459_v0, %v180_v14  ;;  %v183_v25 = vld [vmem:[%s464_s20 + $0x48] sm:$0xff]  ;;  %v184_v26 = vld [vmem:[%s464_s20 + $0x50] sm:$0xff]  ;;  %v185_v31 = vld [vmem:[%s464_s20 + $0x58] sm:$0xff] }
  0x12   : > { %v249_v20 = vadd.f32 %v469_v1, %v213_v11  ;;  %v250_v21 = vadd.f32 %v469_v1, %v214_v12  ;;  %v251_v22 = vadd.f32 %v469_v1, %v215_v13  ;;  %v217_v23 = vmul.f32 %v459_v0, %v181_v15  ;;  %v186_v32 = vld [vmem:[%s464_s20 + $0x60] sm:$0xff]  ;;  %v187_v33 = vld [vmem:[%s464_s20 + $0x68] sm:$0xff]  ;;  %v188_v37 = vld [vmem:[%s464_s20 + $0x70] sm:$0xff] }
  0x13   : > { %v278_v27 = vmax.f32 %v246_v16, 0.0  ;;  %v279_v28 = vmax.f32 %v247_v17, 0.0  ;;  %v280_v29 = vmax.f32 %v248_v18, 0.0  ;;  %v252_v30 = vadd.f32 %v469_v1, %v216_v19  ;;  %v189_v42 = vld [vmem:[%s464_s20 + $0x78] sm:$0xff]  ;;  %v190_v54 = vld [vmem:[%s464_s20 + $0x80] sm:$0xff]  ;;  %v191_v55 = vld [vmem:[%s464_s20 + $0x88] sm:$0xff] }
  0x14   : > { %v281_v34 = vmax.f32 %v249_v20, 0.0  ;;  %v282_v35 = vmax.f32 %v250_v21, 0.0  ;;  %v253_v36 = vadd.f32 %v469_v1, %v217_v23  ;;  %v283_v38 = vmax.f32 %v251_v22, 0.0  ;;  %v192_v56 = vld [vmem:[%s464_s20 + $0x90] sm:$0xff]  ;;  %v193_v59 = vld [vmem:[%s464_s20 + $0x98] sm:$0xff]  ;;  %v194_v63 = vld [vmem:[%s464_s20 + $0xa0] sm:$0xff] }
  0x15   : > { %311 = vst.msk [vmem:[%s492_s25] sm:$0xff] %vm310_vm0, %v278_v27  ;;  %v218_v39 = vmul.f32 %v459_v0, %v182_v24  ;;  %v219_v40 = vmul.f32 %v459_v0, %v183_v25  ;;  %v220_v41 = vmul.f32 %v459_v0, %v184_v26  ;;  %v284_v43 = vmax.f32 %v252_v30, 0.0  ;;  %v195_v6 = vld [vmem:[%s464_s20 + $0xa8] sm:$0xff]  ;;  %v196_v10 = vld [vmem:[%s464_s20 + $0xb0] sm:$0xff]  ;;  %v197_v14 = vld [vmem:[%s464_s20 + $0xb8] sm:$0xff] }
  0x16   : > { %312 = vst.msk [vmem:[%s492_s25 + $0x8] sm:$0xff] %vm310_vm0, %v279_v28  ;;  %v221_v44 = vmul.f32 %v459_v0, %v185_v31  ;;  %v222_v45 = vmul.f32 %v459_v0, %v186_v32  ;;  %v223_v46 = vmul.f32 %v459_v0, %v187_v33  ;;  %v224_v50 = vmul.f32 %v459_v0, %v188_v37  ;;  %v198_v18 = vld [vmem:[%s464_s20 + $0xc0] sm:$0xff]  ;;  %v199_v22 = vld [vmem:[%s464_s20 + $0xc8] sm:$0xff]  ;;  %v200_v26 = vld [vmem:[%s464_s20 + $0xd0] sm:$0xff] }
  0x17   : > { %313 = vst.msk [vmem:[%s492_s25 + $0x10] sm:$0xff] %vm310_vm0, %v280_v29  ;;  %v254_v47 = vadd.f32 %v469_v1, %v218_v39  ;;  %v255_v48 = vadd.f32 %v469_v1, %v219_v40  ;;  %v256_v49 = vadd.f32 %v469_v1, %v220_v41  ;;  %v285_v51 = vmax.f32 %v253_v36, 0.0  ;;  %v201_v30 = vld [vmem:[%s464_s20 + $0xd8] sm:$0xff] }
  0x18   : > { %314 = vst.msk [vmem:[%s492_s25 + $0x18] sm:$0xff] %vm310_vm0, %v281_v34  ;;  %v257_v52 = vadd.f32 %v469_v1, %v221_v44  ;;  %v225_v53 = vmul.f32 %v459_v0, %v189_v42  ;;  %v258_v58 = vadd.f32 %v469_v1, %v222_v45  ;;  %v259_v62 = vadd.f32 %v469_v1, %v223_v46  ;;  %v202_v34 = vld [vmem:[%s464_s20 + $0xe0] sm:$0xff]  ;;  %v204_v42 = vld [vmem:[%s464_s20 + $0xf0] sm:$0xff]  ;;  %v205_v46 = vld [vmem:[%s464_s20 + $0xf8] sm:$0xff] }
  0x19   : > { %315 = vst.msk [vmem:[%s492_s25 + $0x20] sm:$0xff] %vm310_vm0, %v282_v35  ;;  %v286_v57 = vmax.f32 %v254_v47, 0.0  ;;  %v287_v60 = vmax.f32 %v255_v48, 0.0  ;;  %v288_v61 = vmax.f32 %v256_v49, 0.0  ;;  %v260_v2 = vadd.f32 %v469_v1, %v224_v50 }
  0x1a   : > { %316 = vst.msk [vmem:[%s492_s25 + $0x28] sm:$0xff] %vm310_vm0, %v283_v38  ;;  %v226_v3 = vmul.f32 %v459_v0, %v190_v54  ;;  %v227_v4 = vmul.f32 %v459_v0, %v191_v55  ;;  %v228_v5 = vmul.f32 %v459_v0, %v192_v56  ;;  %v289_v7 = vmax.f32 %v257_v52, 0.0  ;;  %v203_v38 = vld [vmem:[%s464_s20 + $0xe8] sm:$0xff] }
  0x1b   : > { %317 = vst.msk [vmem:[%s492_s25 + $0x30] sm:$0xff] %vm310_vm0, %v284_v43  ;;  %v261_v8 = vadd.f32 %v469_v1, %v225_v53  ;;  %v229_v9 = vmul.f32 %v459_v0, %v193_v59  ;;  %v290_v11 = vmax.f32 %v258_v58, 0.0  ;;  %v230_v13 = vmul.f32 %v459_v0, %v194_v63 }
  0x1c   : > { %318 = vst.msk [vmem:[%s492_s25 + $0x38] sm:$0xff] %vm310_vm0, %v285_v51  ;;  %v262_v12 = vadd.f32 %v469_v1, %v226_v3  ;;  %v291_v15 = vmax.f32 %v259_v62, 0.0  ;;  %v263_v16 = vadd.f32 %v469_v1, %v227_v4  ;;  %v231_v17 = vmul.f32 %v459_v0, %v195_v6 }
  0x1d   : > { %319 = vst.msk [vmem:[%s492_s25 + $0x40] sm:$0xff] %vm310_vm0, %v286_v57  ;;  %v292_v19 = vmax.f32 %v260_v2, 0.0  ;;  %v264_v20 = vadd.f32 %v469_v1, %v228_v5  ;;  %v232_v21 = vmul.f32 %v459_v0, %v196_v10  ;;  %v293_v23 = vmax.f32 %v261_v8, 0.0 }
  0x1e   : > { %320 = vst.msk [vmem:[%s492_s25 + $0x48] sm:$0xff] %vm310_vm0, %v287_v60  ;;  %v265_v24 = vadd.f32 %v469_v1, %v229_v9  ;;  %v233_v25 = vmul.f32 %v459_v0, %v197_v14  ;;  %v294_v27 = vmax.f32 %v262_v12, 0.0  ;;  %v266_v28 = vadd.f32 %v469_v1, %v230_v13 }
  0x1f   : > { %321 = vst.msk [vmem:[%s492_s25 + $0x50] sm:$0xff] %vm310_vm0, %v288_v61  ;;  %v234_v29 = vmul.f32 %v459_v0, %v198_v18  ;;  %v295_v31 = vmax.f32 %v263_v16, 0.0  ;;  %v267_v32 = vadd.f32 %v469_v1, %v231_v17  ;;  %v235_v33 = vmul.f32 %v459_v0, %v199_v22 }
  0x20   : > { %322 = vst.msk [vmem:[%s492_s25 + $0x58] sm:$0xff] %vm310_vm0, %v289_v7  ;;  %v296_v35 = vmax.f32 %v264_v20, 0.0  ;;  %v268_v36 = vadd.f32 %v469_v1, %v232_v21  ;;  %v236_v37 = vmul.f32 %v459_v0, %v200_v26  ;;  %v297_v39 = vmax.f32 %v265_v24, 0.0 }
  0x21   : > { %323 = vst.msk [vmem:[%s492_s25 + $0x60] sm:$0xff] %vm310_vm0, %v290_v11  ;;  %v269_v40 = vadd.f32 %v469_v1, %v233_v25  ;;  %v237_v41 = vmul.f32 %v459_v0, %v201_v30  ;;  %v298_v43 = vmax.f32 %v266_v28, 0.0  ;;  %v270_v44 = vadd.f32 %v469_v1, %v234_v29 }
  0x22   : > { %324 = vst.msk [vmem:[%s492_s25 + $0x68] sm:$0xff] %vm310_vm0, %v291_v15  ;;  %v238_v45 = vmul.f32 %v459_v0, %v202_v34  ;;  %v299_v47 = vmax.f32 %v267_v32, 0.0  ;;  %v271_v48 = vadd.f32 %v469_v1, %v235_v33  ;;  %v239_v49 = vmul.f32 %v459_v0, %v203_v38 }
  0x23   : > { %325 = vst.msk [vmem:[%s492_s25 + $0x70] sm:$0xff] %vm310_vm0, %v292_v19  ;;  %v300_v50 = vmax.f32 %v268_v36, 0.0  ;;  %v272_v51 = vadd.f32 %v469_v1, %v236_v37  ;;  %v240_v52 = vmul.f32 %v459_v0, %v204_v42  ;;  %v301_v53 = vmax.f32 %v269_v40, 0.0 }
  0x24   : > { %326 = vst.msk [vmem:[%s492_s25 + $0x78] sm:$0xff] %vm310_vm0, %v293_v23  ;;  %v273_v54 = vadd.f32 %v469_v1, %v237_v41  ;;  %v241_v55 = vmul.f32 %v459_v0, %v205_v46  ;;  %v302_v56 = vmax.f32 %v270_v44, 0.0  ;;  %v274_v57 = vadd.f32 %v469_v1, %v238_v45 }
  0x25   : > { %327 = vst.msk [vmem:[%s492_s25 + $0x80] sm:$0xff] %vm310_vm0, %v294_v27  ;;  %v303_v58 = vmax.f32 %v271_v48, 0.0  ;;  %v275_v59 = vadd.f32 %v469_v1, %v239_v49  ;;  %v304_v60 = vmax.f32 %v272_v51, 0.0  ;;  %v276_v0 = vadd.f32 %v469_v1, %v240_v52 }
  0x26   : > { %328 = vst.msk [vmem:[%s492_s25 + $0x88] sm:$0xff] %vm310_vm0, %v295_v31  ;;  %v305_v61 = vmax.f32 %v273_v54, 0.0  ;;  %v277_v62 = vadd.f32 %v469_v1, %v241_v55  ;;  %v306_v63 = vmax.f32 %v274_v57, 0.0 }
  0x27   : > { %329 = vst.msk [vmem:[%s492_s25 + $0x90] sm:$0xff] %vm310_vm0, %v296_v35  ;;  %v307_v2 = vmax.f32 %v275_v59, 0.0  ;;  %v308_v3 = vmax.f32 %v276_v0, 0.0 }
  0x28   : > { %330 = vst.msk [vmem:[%s492_s25 + $0x98] sm:$0xff] %vm310_vm0, %v297_v39  ;;  %v309_v4 = vmax.f32 %v277_v62, 0.0 }
  0x29   : > { %331 = vst.msk [vmem:[%s492_s25 + $0xa0] sm:$0xff] %vm310_vm0, %v298_v43 }
  0x2a   : > { %332 = vst.msk [vmem:[%s492_s25 + $0xa8] sm:$0xff] %vm310_vm0, %v299_v47 }
  0x2b   : > { %333 = vst.msk [vmem:[%s492_s25 + $0xb0] sm:$0xff] %vm310_vm0, %v300_v50 }
  0x2c   : > { %334 = vst.msk [vmem:[%s492_s25 + $0xb8] sm:$0xff] %vm310_vm0, %v301_v53 }
  0x2d   : > { %335 = vst.msk [vmem:[%s492_s25 + $0xc0] sm:$0xff] %vm310_vm0, %v302_v56 }
  0x2e   : > { %336 = vst.msk [vmem:[%s492_s25 + $0xc8] sm:$0xff] %vm310_vm0, %v303_v58 }
  0x2f   : > { %337 = vst.msk [vmem:[%s492_s25 + $0xd0] sm:$0xff] %vm310_vm0, %v304_v60 }
  0x30   : > { %338 = vst.msk [vmem:[%s492_s25 + $0xd8] sm:$0xff] %vm310_vm0, %v305_v61 }
  0x31   : > { %339 = vst.msk [vmem:[%s492_s25 + $0xe0] sm:$0xff] %vm310_vm0, %v306_v63 }
  0x32   : > { %340 = vst.msk [vmem:[%s492_s25 + $0xe8] sm:$0xff] %vm310_vm0, %v307_v2 }
  0x33   : > { %341 = vst.msk [vmem:[%s492_s25 + $0xf0] sm:$0xff] %vm310_vm0, %v308_v3 }
  0x34   : > { %342 = vst.msk [vmem:[%s492_s25 + $0xf8] sm:$0xff] %vm310_vm0, %v309_v4 }
  0x35 PF: > { %s13_s12 = sadd.s32 1, %s426_s12  }
  0x36   : > { %p10_p4 = scmp.ge.s32.totalorder %s13_s12, 4  }
  0x38   :  { %12 = sbr.rel (!%p10_p4) target bundleno = 1 (0x1), region = 62 }

// kernel: resnet_generator_forward.19
= control target key start
LH: loop header
LB: loop body
LE: loop exit
PB: predicated region body
PF: predicated region fallthrough
CT: control target
= control target key end

     0   :  { %s1261_s15 = smov 0   ;;  %s1747_s0 = inlined_call_operand.vmem [shape: bf16[512,147], index: 0, kind: input, shape index: {}]   ;;  %s1748_s1 = inlined_call_operand.vmem [shape: bf16[147,8], index: 1, kind: input, shape index: {}]   ;;  %s1749_s2 = inlined_call_operand.vmem [shape: f32[512,8], index: 2, kind: output, shape index: {0}]   ;;  %s1750_s3 = inlined_call_operand.vmem [shape: f32[1,8], index: 3, kind: output, shape index: {1}]   ;;  %s1751_s4 = inlined_call_operand.vmem [shape: f32[1,8], index: 4, kind: output, shape index: {2}]  }
   0x1 LB: > { %s971_s16 = sadd.s32 4294967295, %s1232_s15   ;;  %p975_p0 = scmp.ge.s32.totalorder %s1232_s15, 1  ;;  %s1232_s15 = sphi %s1261_s15, %s15_s15  }
   0x2   : > { %p159_p1 = scmp.lt.s32.totalorder %s1232_s15, 3 }
   0x4   : > { %p160_p2 = pnand %p975_p0, %p159_p1 }
   0x5   : > { %s976_s21 = sshll.u32 (!%p160_p2), %s971_s16, 5  ;;  %p1161_p4 = scmp.ne.s32.totalorder (!%p160_p2), %s971_s16, 0 }
   0x6   : > { %163 = sbr.rel (%p160_p2) target bundleno = 383 (0x17f), region = 28  ;;  %p187_p3 = scmp.lt.s32.totalorder (!%p160_p2), %s976_s21, 63 }
   0xb   : > { %v1204_v0 = vld [vmem:[%s1748_s1 + $0x38] sm:$0xff]  ;;  %v250_v1 = vld [vmem:[%s1748_s1 + $0x48] sm:$0x3]  ;;  %vm501_vm0 = vcmask 1040384   ;;  %vm502_vm1 = vcmask 1041408   ;;  %v1203_v3 = vld [vmem:[%s1748_s1 + $0x30] sm:$0xff] }
   0xc   : > { %v432_v2 = vunpack.c.l.b16 %v250_v1  ;;  %508 = vmatpush.bf16.msra.mxu0 %v1204_v0  ;;  %1206 = vmatpush.bf16.msra.mxu2 %v1204_v0  ;;  %v1234_v4 = vmov 65535   ;;  %s1753_s21 = smov (!%p187_p3, %s976_s21), 63  ;;  %v1202_v9 = vld [vmem:[%s1748_s1 + $0x28] sm:$0xff]  ;;  %v1205_v10 = vld [vmem:[%s1748_s1 + $0x40] sm:$0xff]  ;;  %vm452_vm2 = vcmask 154624   ;;  %v1200_v18 = vld [vmem:[%s1748_s1 + $0x18] sm:$0xff] }
   0xd   : > { %v503_v5 = vsel %vm501_vm0, 4294967295, %v1234_v4  ;;  %s1164_s26 = sshll.u32 %s1753_s21, 3  ;;  %v1201_v14 = vld [vmem:[%s1748_s1 + $0x20] sm:$0xff]  ;;  %v1199_v19 = vld [vmem:[%s1748_s1 + $0x10] sm:$0xff]  ;;  %v1198_v20 = vld [vmem:[%s1748_s1 + $0x8] sm:$0xff]  ;;  %vm686_vm3 = vcmask 64512  }
   0xe   : > { %v442_v6 = vpack.c.b16 %v432_v2, %v432_v2  ;;  %v504_v7 = vsel %vm502_vm1, %v503_v5, 0  ;;  %s1294_s5 = scalar_lea.vmem %s1747_s0, %s1164_s26  ;;  %v1197_v26 = vld [vmem:[%s1748_s1] sm:$0xff]  ;;  %s1396_s20 = scalar_lea.vmem %s1749_s2, %s1164_s26 }
   0xf   : > { %v1165_v11 = vld [vmem:[%s1294_s5 + $0x4] sm:$0xf]  ;;  %v985_v12 = vld [vmem:[%s1294_s5 + $0x8] sm:$0xf0]  ;;  %v1183_v15 = vld [vmem:[%s1294_s5 + $0x94] sm:$0xf] }
  0x10   : > { %v506_v8 = vand.u32 %v504_v7, %v442_v6  ;;  %509 = vmatpush.bf16.msra.mxu0 %v1203_v3  ;;  %1207 = vmatpush.bf16.msra.mxu2 %v1203_v3  ;;  %v988_v13 = vor.u32 %v1165_v11, %v985_v12  ;;  %v1057_v16 = vld [vmem:[%s1294_s5 + $0x98] sm:$0xf0]  ;;  %v1167_v21 = vld [vmem:[%s1294_s5 + $0x14] sm:$0xf]  ;;  %v1185_v23 = vld [vmem:[%s1294_s5 + $0xa4] sm:$0xf] }
  0x11   : > { %v1060_v17 = vor.u32 %v1183_v15, %v1057_v16  ;;  %v993_v22 = vld [vmem:[%s1294_s5 + $0x18] sm:$0xf0]  ;;  %v1065_v24 = vld [vmem:[%s1294_s5 + $0xa8] sm:$0xf0]  ;;  %v983_v27 = vld [vmem:[%s1294_s5] sm:$0xf] }
  0x12   : > { %603 = vmatpush.bf16.msra.mxu1 %v506_v8  ;;  %1214 = vmatpush.bf16.msra.mxu3 %v506_v8  ;;  %v996_v25 = vor.u32 %v1167_v21, %v993_v22  ;;  %v1166_v28 = vld [vmem:[%s1294_s5 + $0x4] sm:$0xf0]  ;;  %v1047_v29 = vld [vmem:[%s1294_s5 + $0x80] sm:$0xf]  ;;  %v1068_v31 = vor.u32 %v1185_v23, %v1065_v24  ;;  %v1169_v34 = vld [vmem:[%s1294_s5 + $0x24] sm:$0xf] }
  0x13   : > { %v1182_v30 = vld [vmem:[%s1294_s5 + $0x84] sm:$0xf0]  ;;  %v984_v32 = vor.u32 %v1166_v28, %v983_v27  ;;  %v1001_v35 = vld [vmem:[%s1294_s5 + $0x28] sm:$0xf0]  ;;  %v1187_v36 = vld [vmem:[%s1294_s5 + $0xb4] sm:$0xf] }
  0x14   : > { %510 = vmatpush.bf16.msra.mxu0 %v1202_v9  ;;  %1208 = vmatpush.bf16.msra.mxu2 %v1202_v9  ;;  %v1048_v33 = vor.u32 %v1182_v30, %v1047_v29  ;;  %v1073_v37 = vld [vmem:[%s1294_s5 + $0xb8] sm:$0xf0]  ;;  %v1004_v38 = vor.u32 %v1169_v34, %v1001_v35  ;;  %v991_v39 = vld [vmem:[%s1294_s5 + $0x10] sm:$0xf]  ;;  %v1168_v40 = vld [vmem:[%s1294_s5 + $0x14] sm:$0xf0] }
  0x15   : > { %v1055_v41 = vld [vmem:[%s1294_s5 + $0x90] sm:$0xf]  ;;  %v1184_v42 = vld [vmem:[%s1294_s5 + $0x94] sm:$0xf0]  ;;  %v1076_v43 = vor.u32 %v1187_v36, %v1073_v37  ;;  %v992_v44 = vor.u32 %v1168_v40, %v991_v39  ;;  %v1171_v46 = vld [vmem:[%s1294_s5 + $0x34] sm:$0xf] }
  0x16   : > { %604 = vmatpush.bf16.msra.mxu1 %v1205_v10  ;;  %1215 = vmatpush.bf16.msra.mxu3 %v1205_v10  ;;  %v1056_v45 = vor.u32 %v1184_v42, %v1055_v41  ;;  %v1009_v47 = vld [vmem:[%s1294_s5 + $0x38] sm:$0xf0]  ;;  %v1189_v48 = vld [vmem:[%s1294_s5 + $0xc4] sm:$0xf]  ;;  %v1081_v49 = vld [vmem:[%s1294_s5 + $0xc8] sm:$0xf0] }
  0x17   : > { %v1012_v50 = vor.u32 %v1171_v46, %v1009_v47  ;;  %v999_v51 = vld [vmem:[%s1294_s5 + $0x20] sm:$0xf]  ;;  %v1170_v52 = vld [vmem:[%s1294_s5 + $0x24] sm:$0xf0]  ;;  %v1084_v55 = vor.u32 %v1189_v48, %v1081_v49  ;;  %v1173_v58 = vld [vmem:[%s1294_s5 + $0x44] sm:$0xf] }
  0x18   : > { %511 = vmatpush.bf16.msra.mxu0 %v1201_v14  ;;  %1209 = vmatpush.bf16.msra.mxu2 %v1201_v14  ;;  %v1063_v53 = vld [vmem:[%s1294_s5 + $0xa0] sm:$0xf]  ;;  %v1186_v54 = vld [vmem:[%s1294_s5 + $0xa4] sm:$0xf0]  ;;  %v1000_v56 = vor.u32 %v1170_v52, %v999_v51  ;;  %v1017_v59 = vld [vmem:[%s1294_s5 + $0x48] sm:$0xf0] }
  0x19   : > { %1145 = vmatmul.msk.bf16.vlgmr.msra.gmra.mxu1 %vm452_vm2, %v988_v13  ;;  %1154 = vmatmul.msk.bf16.vlgmr.msra.gmra.mxu3 %vm452_vm2, %v1060_v17  ;;  %v1064_v57 = vor.u32 %v1186_v54, %v1063_v53  ;;  %v1191_v60 = vld [vmem:[%s1294_s5 + $0xd4] sm:$0xf]  ;;  %v1089_v61 = vld [vmem:[%s1294_s5 + $0xd8] sm:$0xf0]  ;;  %v1020_v62 = vor.u32 %v1173_v58, %v1017_v59  ;;  %v1007_v63 = vld [vmem:[%s1294_s5 + $0x30] sm:$0xf] }
  0x1a   : > { %v1172_v0 = vld [vmem:[%s1294_s5 + $0x34] sm:$0xf0]  ;;  %v1071_v1 = vld [vmem:[%s1294_s5 + $0xb0] sm:$0xf]  ;;  %v1092_v3 = vor.u32 %v1191_v60, %v1089_v61  ;;  %v1175_v6 = vld [vmem:[%s1294_s5 + $0x54] sm:$0xf] }
  0x1b   : > { %v1188_v2 = vld [vmem:[%s1294_s5 + $0xb4] sm:$0xf0]  ;;  %v1008_v4 = vor.u32 %v1172_v0, %v1007_v63  ;;  %v1025_v7 = vld [vmem:[%s1294_s5 + $0x58] sm:$0xf0]  ;;  %v1193_v8 = vld [vmem:[%s1294_s5 + $0xe4] sm:$0xf] }
  0x1c   : > { %512 = vmatpush.bf16.msra.mxu0 %v1200_v18  ;;  %1210 = vmatpush.bf16.msra.mxu2 %v1200_v18  ;;  %v1072_v5 = vor.u32 %v1188_v2, %v1071_v1  ;;  %v1097_v9 = vld [vmem:[%s1294_s5 + $0xe8] sm:$0xf0]  ;;  %v1028_v10 = vor.u32 %v1175_v6, %v1025_v7  ;;  %v1015_v11 = vld [vmem:[%s1294_s5 + $0x40] sm:$0xf]  ;;  %v1174_v12 = vld [vmem:[%s1294_s5 + $0x44] sm:$0xf0] }
  0x1d   : > { %v1079_v13 = vld [vmem:[%s1294_s5 + $0xc0] sm:$0xf]  ;;  %v1190_v14 = vld [vmem:[%s1294_s5 + $0xc4] sm:$0xf0]  ;;  %v1100_v15 = vor.u32 %v1193_v8, %v1097_v9  ;;  %v1016_v16 = vor.u32 %v1174_v12, %v1015_v11  ;;  %v1177_v18 = vld [vmem:[%s1294_s5 + $0x64] sm:$0xf] }
  0x1e   : > { %v1080_v17 = vor.u32 %v1190_v14, %v1079_v13  ;;  %v1105_v21 = vld [vmem:[%s1294_s5 + $0xf8] sm:$0xf0]  ;;  %v1023_v23 = vld [vmem:[%s1294_s5 + $0x50] sm:$0xf]  ;;  %v1176_v24 = vld [vmem:[%s1294_s5 + $0x54] sm:$0xf0] }
  0x1f   : > { %v1024_v28 = vor.u32 %v1176_v24, %v1023_v23  ;;  %v1179_v30 = vld [vmem:[%s1294_s5 + $0x74] sm:$0xf]  ;;  %v1178_v34 = vld [vmem:[%s1294_s5 + $0x64] sm:$0xf0]  ;;  %v1095_v35 = vld [vmem:[%s1294_s5 + $0xe0] sm:$0xf] }
  0x20   : > { %513 = vmatpush.bf16.msra.mxu0 %v1199_v19  ;;  %1211 = vmatpush.bf16.msra.mxu2 %v1199_v19  ;;  %v1033_v19 = vld [vmem:[%s1294_s5 + $0x68] sm:$0xf0]  ;;  %v1194_v36 = vld [vmem:[%s1294_s5 + $0xe4] sm:$0xf0]  ;;  %v1181_v39 = vld [vmem:[%s1294_s5 + $0x84] sm:$0xf] }
  0x21   : > { %v1036_v22 = vor.u32 %v1177_v18, %v1033_v19  ;;  %v1049_v40 = vld [vmem:[%s1294_s5 + $0x88] sm:$0xf0]  ;;  %v1039_v42 = vld [vmem:[%s1294_s5 + $0x70] sm:$0xf]  ;;  %v1196_v46 = vld [vmem:[%s1294_s5 + $0xf4] sm:$0xf0] }
  0x22   : > { %v1052_v41 = vor.u32 %v1181_v39, %v1049_v40 }
  0x24   : > { %514 = vmatpush.bf16.msra.mxu0 %v1198_v20  ;;  %1212 = vmatpush.bf16.msra.mxu2 %v1198_v20  ;;  %v1195_v20 = vld [vmem:[%s1294_s5 + $0xf4] sm:$0xf] }
  0x25   : > { %v1108_v27 = vor.u32 %v1195_v20, %v1105_v21 }
  0x28   : > { %515 = vmatpush.bf16.msra.mxu0 %v1197_v26  ;;  %1213 = vmatpush.bf16.msra.mxu2 %v1197_v26  ;;  %v1192_v26 = vld [vmem:[%s1294_s5 + $0xd4] sm:$0xf0] }
  0x29   : > { %1146 = vmatmul.msk.bf16.gmra.mxu1 %vm452_vm2, %v996_v25  ;;  %1155 = vmatmul.msk.bf16.gmra.mxu3 %vm452_vm2, %v1068_v31  ;;  %v1087_v25 = vld [vmem:[%s1294_s5 + $0xd0] sm:$0xf]  ;;  %v1041_v31 = vld [vmem:[%s1294_s5 + $0x78] sm:$0xf0] }
  0x2a   : > { %v1088_v29 = vor.u32 %v1192_v26, %v1087_v25 }
  0x2b   : > { %516 = vmatmul.bf16.vlgmr.msra.gmra.mxu0 %v984_v32  ;;  %556 = vmatmul.bf16.vlgmr.msra.gmra.mxu2 %v1048_v33  ;;  %v1044_v32 = vor.u32 %v1179_v30, %v1041_v31  ;;  %v1031_v33 = vld [vmem:[%s1294_s5 + $0x60] sm:$0xf] }
  0x2c   : > { %v1032_v37 = vor.u32 %v1178_v34, %v1031_v33 }
  0x39   : > { %1147 = vmatmul.msk.bf16.gmra.mxu1 %vm452_vm2, %v1004_v38  ;;  %1156 = vmatmul.msk.bf16.gmra.mxu3 %vm452_vm2, %v1076_v43  ;;  %v1096_v38 = vor.u32 %v1194_v36, %v1095_v35  ;;  %v1180_v43 = vld [vmem:[%s1294_s5 + $0x74] sm:$0xf0] }
  0x3a   : > { %v1040_v47 = vor.u32 %v1180_v43, %v1039_v42 }
  0x3b   : > { %521 = vmatmul.bf16.gmra.mxu0 %v992_v44  ;;  %561 = vmatmul.bf16.gmra.mxu2 %v1056_v45  ;;  %v1103_v45 = vld [vmem:[%s1294_s5 + $0xf0] sm:$0xf] }
  0x3c   : > { %v1104_v48 = vor.u32 %v1196_v46, %v1103_v45 }
  0x49   : > { %1148 = vmatmul.msk.bf16.gmra.mxu1 %vm452_vm2, %v1012_v50  ;;  %1157 = vmatmul.msk.bf16.gmra.mxu3 %vm452_vm2, %v1084_v55 }
  0x4b   : > { %526 = vmatmul.bf16.gmra.mxu0 %v1000_v56  ;;  %566 = vmatmul.bf16.gmra.mxu2 %v1064_v57 }
  0x59   : > { %1149 = vmatmul.msk.bf16.gmra.mxu1 %vm452_vm2, %v1020_v62  ;;  %1158 = vmatmul.msk.bf16.gmra.mxu3 %vm452_vm2, %v1092_v3 }
  0x5b   : > { %531 = vmatmul.bf16.gmra.mxu0 %v1008_v4  ;;  %571 = vmatmul.bf16.gmra.mxu2 %v1072_v5 }
  0x69   : > { %1150 = vmatmul.msk.bf16.gmra.mxu1 %vm452_vm2, %v1028_v10  ;;  %1159 = vmatmul.msk.bf16.gmra.mxu3 %vm452_vm2, %v1100_v15 }
  0x6b   : > { %536 = vmatmul.bf16.gmra.mxu0 %v1016_v16  ;;  %576 = vmatmul.bf16.gmra.mxu2 %v1080_v17 }
  0x79   : > { %1151 = vmatmul.msk.bf16.gmra.mxu1 %vm452_vm2, %v1036_v22  ;;  %1160 = vmatmul.msk.bf16.gmra.mxu3 %vm452_vm2, %v1108_v27 }
  0x7b   : > { %541 = vmatmul.bf16.gmra.mxu0 %v1024_v28  ;;  %581 = vmatmul.bf16.gmra.mxu2 %v1088_v29 }
  0x89   : > { %1152 = vmatmul.msk.bf16.gmra.mxu1 %vm452_vm2, %v1044_v32 }
  0x8b   : > { %546 = vmatmul.bf16.gmra.mxu0 %v1032_v37  ;;  %586 = vmatmul.bf16.gmra.mxu2 %v1096_v38 }
  0x96   : > { %v606_v44 = vpop.f32.mrf.mxu1 }
  0x99   : > { %1153 = vmatmul.msk.bf16.gmra.mxu1 %vm452_vm2, %v1052_v41 }
  0x9b   : > { %551 = vmatmul.bf16.gmra.mxu0 %v1040_v47  ;;  %591 = vmatmul.bf16.gmra.mxu2 %v1104_v48 }
  0x9c   : > { %v651_v51 = vpop.f32.mrf.mxu3 }
  0x9e   : > { %v608_v49 = vpop.f32.mrf.mxu1 }
  0xa4   : > { %v653_v56 = vpop.f32.mrf.mxu3 }
  0xa6   : > { %v611_v50 = vpop.f32.mrf.mxu1 }
  0xa8   : > { %v517_v52 = vpop.f32.mrf.mxu0 }
  0xa9   : > { %v1398_v53 = vadd.f32 %v606_v44, %v517_v52 }
  0xab   : > { %687 = vst.msk [vmem:[%s1396_s20] sm:$0xff] %vm686_vm3, %v1398_v53 }
  0xac   : > { %v656_v63 = vpop.f32.mrf.mxu3 }
  0xae   : > { %v613_v54 = vpop.f32.mrf.mxu1  ;;  %v1403_v55 = vpop.f32.mrf.mxu2 }
  0xb0   : > { %v519_v57 = vpop.f32.mrf.mxu0 }
  0xb1   : > { %v1405_v58 = vadd.f32 %v608_v49, %v519_v57 }
  0xb3   : > { %688 = vst.msk [vmem:[%s1396_s20 + $0x8] sm:$0xff] %vm686_vm3, %v1405_v58 }
  0xb4   : > { %v658_v5 = vpop.f32.mrf.mxu3 }
  0xb6   : > { %v616_v59 = vpop.f32.mrf.mxu1  ;;  %v1410_v60 = vpop.f32.mrf.mxu2 }
  0xb8   : > { %v522_v61 = vpop.f32.mrf.mxu0 }
  0xb9   : > { %v1412_v62 = vadd.f32 %v611_v50, %v522_v61 }
  0xbb   : > { %689 = vst.msk [vmem:[%s1396_s20 + $0x10] sm:$0xff] %vm686_vm3, %v1412_v62 }
  0xbc   : > { %v661_v12 = vpop.f32.mrf.mxu3 }
  0xbe   : > { %v618_v0 = vpop.f32.mrf.mxu1  ;;  %v562_v1 = vpop.f32.mrf.mxu2 }
  0xbf   : > { %v1417_v2 = vadd.f32 %v651_v51, %v562_v1 }
  0xc0   : > { %v524_v3 = vpop.f32.mrf.mxu0 }
  0xc1   : > { %v1419_v4 = vadd.f32 %v613_v54, %v524_v3  ;;  %705 = vst.msk [vmem:[%s1396_s20 + $0x90] sm:$0xff] %vm686_vm3, %v1417_v2 }
  0xc3   : > { %690 = vst.msk [vmem:[%s1396_s20 + $0x18] sm:$0xff] %vm686_vm3, %v1419_v4 }
  0xc4   : > { %v663_v19 = vpop.f32.mrf.mxu3 }
  0xc6   : > { %v621_v6 = vpop.f32.mrf.mxu1  ;;  %v564_v7 = vpop.f32.mrf.mxu2 }
  0xc7   : > { %v1427_v8 = vadd.f32 %v653_v56, %v564_v7 }
  0xc8   : > { %v527_v9 = vpop.f32.mrf.mxu0 }
  0xc9   : > { %v1429_v10 = vadd.f32 %v616_v59, %v527_v9  ;;  %706 = vst.msk [vmem:[%s1396_s20 + $0x98] sm:$0xff] %vm686_vm3, %v1427_v8 }
  0xcb   : > { %691 = vst.msk [vmem:[%s1396_s20 + $0x20] sm:$0xff] %vm686_vm3, %v1429_v10 }
  0xcc   : > { %v666_v28 = vpop.f32.mrf.mxu3 }
  0xce   : > { %v623_v11 = vpop.f32.mrf.mxu1  ;;  %v567_v13 = vpop.f32.mrf.mxu2 }
  0xcf   : > { %v1437_v14 = vadd.f32 %v656_v63, %v567_v13 }
  0xd0   : > { %v529_v15 = vpop.f32.mrf.mxu0 }
  0xd1   : > { %v1439_v16 = vadd.f32 %v618_v0, %v529_v15  ;;  %707 = vst.msk [vmem:[%s1396_s20 + $0xa0] sm:$0xff] %vm686_vm3, %v1437_v14 }
  0xd3   : > { %692 = vst.msk [vmem:[%s1396_s20 + $0x28] sm:$0xff] %vm686_vm3, %v1439_v16 }
  0xd4   : > { %v668_v34 = vpop.f32.mrf.mxu3 }
  0xd6   : > { %v626_v17 = vpop.f32.mrf.mxu1  ;;  %v569_v18 = vpop.f32.mrf.mxu2 }
  0xd7   : > { %v1447_v20 = vadd.f32 %v658_v5, %v569_v18 }
  0xd8   : > { %v532_v21 = vpop.f32.mrf.mxu0 }
  0xd9   : > { %v1449_v22 = vadd.f32 %v621_v6, %v532_v21  ;;  %708 = vst.msk [vmem:[%s1396_s20 + $0xa8] sm:$0xff] %vm686_vm3, %v1447_v20 }
  0xdb   : > { %693 = vst.msk [vmem:[%s1396_s20 + $0x30] sm:$0xff] %vm686_vm3, %v1449_v22 }
  0xdc   : > { %v671_v41 = vpop.f32.mrf.mxu3 }
  0xde   : > { %v628_v23 = vpop.f32.mrf.mxu1  ;;  %v572_v24 = vpop.f32.mrf.mxu2 }
  0xdf   : > { %v1457_v25 = vadd.f32 %v661_v12, %v572_v24 }
  0xe0   : > { %v534_v26 = vpop.f32.mrf.mxu0 }
  0xe1   : > { %v1459_v27 = vadd.f32 %v623_v11, %v534_v26  ;;  %709 = vst.msk [vmem:[%s1396_s20 + $0xb0] sm:$0xff] %vm686_vm3, %v1457_v25 }
  0xe3   : > { %694 = vst.msk [vmem:[%s1396_s20 + $0x38] sm:$0xff] %vm686_vm3, %v1459_v27 }
  0xe4   : > { %v673_v48 = vpop.f32.mrf.mxu3 }
  0xe6   : > { %v631_v29 = vpop.f32.mrf.mxu1  ;;  %v574_v30 = vpop.f32.mrf.mxu2 }
  0xe7   : > { %v1467_v31 = vadd.f32 %v663_v19, %v574_v30 }
  0xe8   : > { %v537_v32 = vpop.f32.mrf.mxu0 }
  0xe9   : > { %v1469_v33 = vadd.f32 %v626_v17, %v537_v32  ;;  %710 = vst.msk [vmem:[%s1396_s20 + $0xb8] sm:$0xff] %vm686_vm3, %v1467_v31 }
  0xeb   : > { %695 = vst.msk [vmem:[%s1396_s20 + $0x40] sm:$0xff] %vm686_vm3, %v1469_v33 }
  0xec   : > { %v676_v59 = vpop.f32.mrf.mxu3 }
  0xee   : > { %v633_v35 = vpop.f32.mrf.mxu1  ;;  %v577_v36 = vpop.f32.mrf.mxu2 }
  0xef   : > { %v1477_v37 = vadd.f32 %v666_v28, %v577_v36 }
  0xf0   : > { %v539_v38 = vpop.f32.mrf.mxu0 }
  0xf1   : > { %v1479_v39 = vadd.f32 %v628_v23, %v539_v38  ;;  %711 = vst.msk [vmem:[%s1396_s20 + $0xc0] sm:$0xff] %vm686_vm3, %v1477_v37 }
  0xf3   : > { %696 = vst.msk [vmem:[%s1396_s20 + $0x48] sm:$0xff] %vm686_vm3, %v1479_v39 }
  0xf4   : > { %v678_v6 = vpop.f32.mrf.mxu3 }
  0xf6   : > { %v636_v40 = vpop.f32.mrf.mxu1  ;;  %v579_v42 = vpop.f32.mrf.mxu2 }
  0xf7   : > { %v1487_v43 = vadd.f32 %v668_v34, %v579_v42 }
  0xf8   : > { %v542_v44 = vpop.f32.mrf.mxu0 }
  0xf9   : > { %v1489_v45 = vadd.f32 %v631_v29, %v542_v44  ;;  %712 = vst.msk [vmem:[%s1396_s20 + $0xc8] sm:$0xff] %vm686_vm3, %v1487_v43 }
  0xfb   : > { %697 = vst.msk [vmem:[%s1396_s20 + $0x50] sm:$0xff] %vm686_vm3, %v1489_v45 }
  0xfe   : > { %v638_v46 = vpop.f32.mrf.mxu1  ;;  %v582_v47 = vpop.f32.mrf.mxu2 }
  0xff   : > { %v1497_v49 = vadd.f32 %v671_v41, %v582_v47 }
 0x100   : > { %v544_v50 = vpop.f32.mrf.mxu0 }
 0x101   : > { %v1499_v51 = vadd.f32 %v633_v35, %v544_v50  ;;  %713 = vst.msk [vmem:[%s1396_s20 + $0xd0] sm:$0xff] %vm686_vm3, %v1497_v49 }
 0x103   : > { %698 = vst.msk [vmem:[%s1396_s20 + $0x58] sm:$0xff] %vm686_vm3, %v1499_v51 }
 0x106   : > { %v641_v52 = vpop.f32.mrf.mxu1  ;;  %v584_v54 = vpop.f32.mrf.mxu2 }
 0x107   : > { %v1507_v56 = vadd.f32 %v673_v48, %v584_v54 }
 0x108   : > { %v547_v57 = vpop.f32.mrf.mxu0 }
 0x109   : > { %v1509_v61 = vadd.f32 %v636_v40, %v547_v57  ;;  %714 = vst.msk [vmem:[%s1396_s20 + $0xd8] sm:$0xff] %vm686_vm3, %v1507_v56 }
 0x10b   : > { %699 = vst.msk [vmem:[%s1396_s20 + $0x60] sm:$0xff] %vm686_vm3, %v1509_v61 }
 0x10e   : > { %v643_v63 = vpop.f32.mrf.mxu1  ;;  %v587_v0 = vpop.f32.mrf.mxu2 }
 0x10f   : > { %v1517_v1 = vadd.f32 %v676_v59, %v587_v0 }
 0x110   : > { %v549_v3 = vpop.f32.mrf.mxu0 }
 0x111   : > { %v1519_v5 = vadd.f32 %v638_v46, %v549_v3  ;;  %715 = vst.msk [vmem:[%s1396_s20 + $0xe0] sm:$0xff] %vm686_vm3, %v1517_v1 }
 0x113   : > { %700 = vst.msk [vmem:[%s1396_s20 + $0x68] sm:$0xff] %vm686_vm3, %v1519_v5 }
 0x116   : > { %v646_v7 = vpop.f32.mrf.mxu1  ;;  %v589_v11 = vpop.f32.mrf.mxu2 }
 0x117   : > { %v1528_v9 = vadd.f32 %v646_v7, %v1403_v55  ;;  %v1533_v12 = vadd.f32 %v678_v6, %v589_v11  ;;  %v681_v55 = vpop.f32.mrf.mxu3 }
 0x118   : > { %v552_v13 = vpop.f32.mrf.mxu0 }
 0x119   : > { %703 = vst.msk [vmem:[%s1396_s20 + $0x80] sm:$0xff] %vm686_vm3, %v1528_v9  ;;  %v1535_v15 = vadd.f32 %v641_v52, %v552_v13 }
 0x11a   : > { %716 = vst.msk [vmem:[%s1396_s20 + $0xe8] sm:$0xff] %vm686_vm3, %v1533_v12 }
 0x11b   : > { %701 = vst.msk [vmem:[%s1396_s20 + $0x70] sm:$0xff] %vm686_vm3, %v1535_v15 }
 0x11e   : > { %v648_v17 = vpop.f32.mrf.mxu1  ;;  %v592_v19 = vpop.f32.mrf.mxu2 }
 0x11f   : > { %v1544_v18 = vadd.f32 %v648_v17, %v1410_v60  ;;  %v1549_v21 = vadd.f32 %v681_v55, %v592_v19  ;;  %v683_v26 = vpop.f32.mrf.mxu3 }
 0x120   : > { %v554_v23 = vpop.f32.mrf.mxu0 }
 0x121   : > { %704 = vst.msk [vmem:[%s1396_s20 + $0x88] sm:$0xff] %vm686_vm3, %v1544_v18  ;;  %v1551_v24 = vadd.f32 %v643_v63, %v554_v23 }
 0x122   : > { %717 = vst.msk [vmem:[%s1396_s20 + $0xf0] sm:$0xff] %vm686_vm3, %v1549_v21 }
 0x123   : > { %702 = vst.msk [vmem:[%s1396_s20 + $0x78] sm:$0xff] %vm686_vm3, %v1551_v24 }
 0x125   : > { %722 = sbr.rel (%p1161_p4) target bundleno = 301 (0x12d), region = 32 }
 0x126   : > { %v594_v28 = vpop.f32.mrf.mxu2 }
 0x127   : > { %v1559_v29 = vadd.f32 %v683_v26, %v594_v28 }
 0x129   : > { %718 = vst.msk [vmem:[%s1396_s20 + $0xf8] sm:$0xff] %vm686_vm3, %v1559_v29 }
 0x12a   : > { %vm723_vm4 = vcmask 57344   ;;  %v1235_v60 = vmov 0.0  }
 0x12b   : > { %724 = vst.msk [vmem:[%s1750_s3] sm:$0x1] %vm723_vm4, %v1235_v60 }
 0x12c   : > { %725 = vst.msk [vmem:[%s1751_s4] sm:$0x1] %vm723_vm4, %v1235_v60 }
 0x12d PF: > { %v727_v30 = vsel %vm686_vm3, %v1398_v53, 0.0  ;;  %v728_v32 = vsel %vm686_vm3, %v1405_v58, 0.0  ;;  %v730_v34 = vsel %vm686_vm3, %v1412_v62, 0.0  ;;  %v732_v36 = vsel %vm686_vm3, %v1419_v4, 0.0 }
 0x12e   : > { %v729_v35 = vadd.f32 %v728_v32, %v727_v30  ;;  %v734_v40 = vsel %vm686_vm3, %v1429_v10, 0.0  ;;  %v736_v42 = vsel %vm686_vm3, %v1439_v16, 0.0  ;;  %v738_v46 = vsel %vm686_vm3, %v1449_v22, 0.0 }
 0x12f   : > { %v800_v47 = vmul.f32 %v1398_v53, %v1398_v53  ;;  %v801_v50 = vmul.f32 %v1405_v58, %v1405_v58  ;;  %v802_v52 = vmul.f32 %v1412_v62, %v1412_v62  ;;  %v740_v54 = vsel %vm686_vm3, %v1459_v27, 0.0 }
 0x130   : > { %v731_v38 = vadd.f32 %v730_v34, %v729_v35  ;;  %v803_v59 = vmul.f32 %v1419_v4, %v1419_v4  ;;  %v742_v63 = vsel %vm686_vm3, %v1469_v33, 0.0  ;;  %v804_v3 = vmul.f32 %v1429_v10, %v1429_v10 }
 0x131   : > { %v832_v0 = vsel %vm686_vm3, %v800_v47, 0.0  ;;  %v833_v58 = vsel %vm686_vm3, %v801_v50, 0.0  ;;  %v835_v62 = vsel %vm686_vm3, %v802_v52, 0.0  ;;  %v744_v6 = vsel %vm686_vm3, %v1479_v39, 0.0 }
 0x132   : > { %v733_v41 = vadd.f32 %v732_v36, %v731_v38  ;;  %v834_v7 = vadd.f32 %v833_v58, %v832_v0  ;;  %v805_v4 = vmul.f32 %v1439_v16, %v1439_v16  ;;  %v837_v13 = vsel %vm686_vm3, %v803_v59, 0.0 }
 0x133   : > { %v746_v55 = vsel %vm686_vm3, %v1489_v45, 0.0  ;;  %v806_v10 = vmul.f32 %v1449_v22, %v1449_v22  ;;  %v839_v23 = vsel %vm686_vm3, %v804_v3, 0.0  ;;  %v748_v26 = vsel %vm686_vm3, %v1499_v51, 0.0 }
 0x134   : > { %v735_v44 = vadd.f32 %v734_v40, %v733_v41  ;;  %v836_v17 = vadd.f32 %v835_v62, %v834_v7  ;;  %v807_v16 = vmul.f32 %v1459_v27, %v1459_v27  ;;  %v841_v30 = vsel %vm686_vm3, %v805_v4, 0.0 }
 0x135   : > { %v750_v32 = vsel %vm686_vm3, %v1509_v61, 0.0  ;;  %v808_v22 = vmul.f32 %v1469_v33, %v1469_v33  ;;  %v843_v36 = vsel %vm686_vm3, %v806_v10, 0.0  ;;  %v752_v38 = vsel %vm686_vm3, %v1519_v5, 0.0 }
 0x136   : > { %v737_v48 = vadd.f32 %v736_v42, %v735_v44  ;;  %v838_v28 = vadd.f32 %v837_v13, %v836_v17  ;;  %v809_v27 = vmul.f32 %v1479_v39, %v1479_v39  ;;  %v845_v42 = vsel %vm686_vm3, %v807_v16, 0.0 }
 0x137   : > { %v754_v44 = vsel %vm686_vm3, %v1535_v15, 0.0  ;;  %v810_v33 = vmul.f32 %v1489_v45, %v1489_v45  ;;  %v756_v50 = vsel %vm686_vm3, %v1551_v24, 0.0  ;;  %v811_v39 = vmul.f32 %v1499_v51, %v1499_v51 }
 0x138   : > { %v739_v57 = vadd.f32 %v738_v46, %v737_v48  ;;  %v840_v34 = vadd.f32 %v839_v23, %v838_v28  ;;  %v847_v48 = vsel %vm686_vm3, %v808_v22, 0.0  ;;  %v758_v59 = vsel %vm686_vm3, %v1528_v9, 0.0 }
 0x139   : > { %v812_v45 = vmul.f32 %v1509_v61, %v1509_v61  ;;  %v760_v3 = vsel %vm686_vm3, %v1544_v18, 0.0  ;;  %v813_v51 = vmul.f32 %v1519_v5, %v1519_v5  ;;  %v762_v7 = vsel %vm686_vm3, %v1417_v2, 0.0 }
 0x13a   : > { %v741_v53 = vadd.f32 %v740_v54, %v739_v57  ;;  %v842_v40 = vadd.f32 %v841_v30, %v840_v34  ;;  %v849_v57 = vsel %vm686_vm3, %v809_v27, 0.0  ;;  %v814_v61 = vmul.f32 %v1535_v15, %v1535_v15 }
 0x13b   : > { %v855_v13 = vsel %vm686_vm3, %v812_v45, 0.0  ;;  %v815_v5 = vmul.f32 %v1551_v24, %v1551_v24  ;;  %v857_v10 = vsel %vm686_vm3, %v813_v51, 0.0  ;;  %v766_v23 = vsel %vm686_vm3, %v1437_v14, 0.0 }
 0x13c   : > { %v743_v11 = vadd.f32 %v742_v63, %v741_v53  ;;  %v844_v46 = vadd.f32 %v843_v36, %v842_v40  ;;  %v851_v53 = vsel %vm686_vm3, %v810_v33, 0.0  ;;  %v816_v15 = vmul.f32 %v1528_v9, %v1528_v9 }
 0x13d   : > { %v768_v16 = vsel %vm686_vm3, %v1447_v20, 0.0  ;;  %v817_v24 = vmul.f32 %v1544_v18, %v1544_v18  ;;  %v861_v34 = vsel %vm686_vm3, %v815_v5, 0.0  ;;  %v818_v9 = vmul.f32 %v1417_v2, %v1417_v2 }
 0x13e   : > { %v745_v19 = vadd.f32 %v744_v6, %v743_v11  ;;  %v846_v52 = vadd.f32 %v845_v42, %v844_v46  ;;  %v853_v6 = vsel %vm686_vm3, %v811_v39, 0.0  ;;  %v772_v40 = vsel %vm686_vm3, %v1467_v31, 0.0 }
 0x13f   : > { %v819_v18 = vmul.f32 %v1427_v8, %v1427_v8  ;;  %v865_v42 = vsel %vm686_vm3, %v817_v24, 0.0  ;;  %v820_v2 = vmul.f32 %v1437_v14, %v1437_v14  ;;  %v867_v33 = vsel %vm686_vm3, %v818_v9, 0.0 }
 0x140   : > { %v747_v60 = vadd.f32 %v746_v55, %v745_v19  ;;  %v848_v63 = vadd.f32 %v847_v48, %v846_v52  ;;  %v764_v55 = vsel %vm686_vm3, %v1427_v8, 0.0  ;;  %v776_v48 = vsel %vm686_vm3, %v1487_v43, 0.0 }
 0x141   : > { %v821_v8 = vmul.f32 %v1447_v20, %v1447_v20  ;;  %v778_v39 = vsel %vm686_vm3, %v1497_v49, 0.0  ;;  %v822_v14 = vmul.f32 %v1457_v25, %v1457_v25  ;;  %v823_v20 = vmul.f32 %v1467_v31, %v1467_v31 }
 0x142   : > { %v749_v35 = vadd.f32 %v748_v26, %v747_v60  ;;  %v850_v58 = vadd.f32 %v849_v57, %v848_v63  ;;  %v859_v60 = vsel %vm686_vm3, %v814_v61, 0.0  ;;  %v871_v63 = vsel %vm686_vm3, %v820_v2, 0.0 }
 0x143   : > { %v825_v31 = vmul.f32 %v1487_v43, %v1487_v43  ;;  %v877_v61 = vsel %vm686_vm3, %v823_v20, 0.0  ;;  %v788_v5 = vsel %vm686_vm3, %v1559_v29, 0.0  ;;  %v827_v43 = vmul.f32 %v1507_v56, %v1507_v56 }
 0x144   : > { %v751_v41 = vadd.f32 %v750_v32, %v749_v35  ;;  %v852_v11 = vadd.f32 %v851_v53, %v850_v58  ;;  %v770_v35 = vsel %vm686_vm3, %v1457_v25, 0.0  ;;  %v782_v58 = vsel %vm686_vm3, %v1517_v1, 0.0 }
 0x145   : > { %v824_v25 = vmul.f32 %v1477_v37, %v1477_v37  ;;  %v885_v24 = vsel %vm686_vm3, %v827_v43, 0.0  ;;  %vm797_vm5 = vcmask 57344  }
 0x146   : > { %v753_v47 = vadd.f32 %v752_v38, %v751_v41  ;;  %v854_v17 = vadd.f32 %v853_v6, %v852_v11  ;;  %v863_v38 = vsel %vm686_vm3, %v816_v15, 0.0  ;;  %v875_v6 = vsel %vm686_vm3, %v822_v14, 0.0 }
 0x148   : > { %v755_v54 = vadd.f32 %v754_v44, %v753_v47  ;;  %v856_v26 = vadd.f32 %v855_v13, %v854_v17  ;;  %v774_v44 = vsel %vm686_vm3, %v1477_v37, 0.0  ;;  %v786_v13 = vsel %vm686_vm3, %v1549_v21, 0.0 }
 0x149   : > { %v826_v37 = vmul.f32 %v1497_v49, %v1497_v49 }
 0x14a   : > { %v757_v0 = vadd.f32 %v756_v50, %v755_v54  ;;  %v858_v30 = vadd.f32 %v857_v10, %v856_v26  ;;  %v869_v54 = vsel %vm686_vm3, %v819_v18, 0.0  ;;  %v881_v26 = vsel %vm686_vm3, %v825_v31, 0.0 }
 0x14c   : > { %v759_v62 = vadd.f32 %v758_v59, %v757_v0  ;;  %v860_v22 = vadd.f32 %v859_v60, %v858_v30  ;;  %v780_v0 = vsel %vm686_vm3, %v1507_v56, 0.0  ;;  %v828_v60 = vmul.f32 %v1517_v1, %v1517_v1 }
 0x14d   : > { %v830_v56 = vmul.f32 %v1549_v21, %v1549_v21  ;;  %v831_v1 = vmul.f32 %v1559_v29, %v1559_v29  ;;  %v726_v21 = vld [vmem:[%s1750_s3] sm:$0x1] }
 0x14e   : > { %v761_v4 = vadd.f32 %v760_v3, %v759_v62  ;;  %v862_v41 = vadd.f32 %v861_v34, %v860_v22  ;;  %v873_v3 = vsel %vm686_vm3, %v821_v8, 0.0  ;;  %v887_v22 = vsel %vm686_vm3, %v828_v60, 0.0  ;;  %v799_v8 = vld [vmem:[%s1751_s4] sm:$0x1] }
 0x150   : > { %v763_v19 = vadd.f32 %v762_v7, %v761_v4  ;;  %v864_v46 = vadd.f32 %v863_v38, %v862_v41  ;;  %v784_v7 = vsel %vm686_vm3, %v1533_v12, 0.0 }
 0x152   : > { %v765_v28 = vadd.f32 %v764_v55, %v763_v19  ;;  %v866_v50 = vadd.f32 %v865_v42, %v864_v46  ;;  %v879_v19 = vsel %vm686_vm3, %v824_v25, 0.0  ;;  %v893_v42 = vsel %vm686_vm3, %v831_v1, 0.0 }
 0x154   : > { %v767_v32 = vadd.f32 %v766_v23, %v765_v28  ;;  %v868_v57 = vadd.f32 %v867_v33, %v866_v50 }
 0x156   : > { %v769_v36 = vadd.f32 %v768_v16, %v767_v32  ;;  %v870_v45 = vadd.f32 %v869_v54, %v868_v57  ;;  %v883_v16 = vsel %vm686_vm3, %v826_v37, 0.0  ;;  %v829_v32 = vmul.f32 %v1533_v12, %v1533_v12 }
 0x157   : > { %v891_v12 = vsel %vm686_vm3, %v830_v56, 0.0 }
 0x158   : > { %v771_v27 = vadd.f32 %v770_v35, %v769_v36  ;;  %v872_v62 = vadd.f32 %v871_v63, %v870_v45  ;;  %v889_v38 = vsel %vm686_vm3, %v829_v32, 0.0 }
 0x15a   : > { %v773_v47 = vadd.f32 %v772_v40, %v771_v27  ;;  %v874_v11 = vadd.f32 %v873_v3, %v872_v62 }
 0x15c   : > { %v775_v52 = vadd.f32 %v774_v44, %v773_v47  ;;  %v876_v55 = vadd.f32 %v875_v6, %v874_v11 }
 0x15e   : > { %v777_v59 = vadd.f32 %v776_v48, %v775_v52  ;;  %v878_v10 = vadd.f32 %v877_v61, %v876_v55 }
 0x160   : > { %v779_v53 = vadd.f32 %v778_v39, %v777_v59  ;;  %v880_v28 = vadd.f32 %v879_v19, %v878_v10 }
 0x162   : > { %v781_v51 = vadd.f32 %v780_v0, %v779_v53  ;;  %v882_v49 = vadd.f32 %v881_v26, %v880_v28 }
 0x164   : > { %v783_v4 = vadd.f32 %v782_v58, %v781_v51  ;;  %v884_v34 = vadd.f32 %v883_v16, %v882_v49 }
 0x166   : > { %v785_v17 = vadd.f32 %v784_v7, %v783_v4  ;;  %v886_v36 = vadd.f32 %v885_v24, %v884_v34 }
 0x168   : > { %v787_v23 = vadd.f32 %v786_v13, %v785_v17  ;;  %v888_v40 = vadd.f32 %v887_v22, %v886_v36 }
 0x16a   : > { %v789_v15 = vadd.f32 %v788_v5, %v787_v23  ;;  %v890_v27 = vadd.f32 %v889_v38, %v888_v40 }
 0x16c   : > { %v790_v30 = vrot.slane %v789_v15, 4  ;;  %v892_v44 = vadd.f32 %v891_v12, %v890_v27 }
 0x16e   : > { %v791_v35 = vadd.f32 %v790_v30, %v789_v15  ;;  %v894_v47 = vadd.f32 %v893_v42, %v892_v44 }
 0x170   : > { %v792_v9 = vrot.slane %v791_v35, 2  ;;  %v895_v29 = vrot.slane %v894_v47, 4 }
 0x172   : > { %v793_v41 = vadd.f32 %v792_v9, %v791_v35  ;;  %v896_v33 = vadd.f32 %v895_v29, %v894_v47 }
 0x174   : > { %v794_v18 = vrot.slane %v793_v41, 1  ;;  %v897_v48 = vrot.slane %v896_v33, 2 }
 0x176   : > { %v795_v46 = vadd.f32 %v794_v18, %v793_v41  ;;  %v898_v50 = vadd.f32 %v897_v48, %v896_v33 }
 0x178   : > { %v796_v2 = vadd.f32 %v795_v46, %v726_v21  ;;  %v899_v52 = vrot.slane %v898_v50, 1 }
 0x17a   : > { %798 = vst.msk [vmem:[%s1750_s3] sm:$0x1] %vm797_vm5, %v796_v2  ;;  %v900_v54 = vadd.f32 %v899_v52, %v898_v50 }
 0x17c   : > { %v901_v39 = vadd.f32 %v900_v54, %v799_v8 }
 0x17e   : > { %902 = vst.msk [vmem:[%s1751_s4] sm:$0x1] %vm797_vm5, %v901_v39 }
 0x17f PF: > { %s15_s15 = sadd.s32 1, %s1232_s15  }
 0x180   : > { %p12_p5 = scmp.ge.s32.totalorder %s15_s15, 4  }
 0x182   :  { %14 = sbr.rel (!%p12_p5) target bundleno = 1 (0x1), region = 78 }

// kernel: resnet_generator_forward.21
= control target key start
LH: loop header
LB: loop body
LE: loop exit
PB: predicated region body
PF: predicated region fallthrough
CT: control target
= control target key end

     0   :  { %vm132_vm0 = vcmask 1043456   ;;  %vm107_vm1 = vcmask 588800   ;;  %vm185_vm2 = vcmask 130048   ;;  %vm206_vm3 = vcmask 122880   ;;  %s623_s1 = inlined_call_operand.vmem [shape: bf16[72,16], index: 1, kind: input, shape index: {}]   ;;  %s624_s0 = inlined_call_operand.vmem [shape: bf16[128,72], index: 0, kind: input, shape index: {}]   ;;  %s625_s2 = inlined_call_operand.vmem [shape: f32[128,16], index: 2, kind: output, shape index: {0}]   ;;  %s626_s3 = inlined_call_operand.vmem [shape: f32[1,16], index: 3, kind: output, shape index: {1}]   ;;  %s627_s4 = inlined_call_operand.vmem [shape: f32[1,16], index: 4, kind: output, shape index: {2}]  }
   0x1   :  { %v39_v0 = vld [vmem:[%s623_s1 + $0x20] sm:$0xf]  ;;  %v385_v4 = vld [vmem:[%s623_s1 + $0x18] sm:$0xff]  ;;  %v384_v5 = vld [vmem:[%s623_s1 + $0x10] sm:$0xff]  ;;  %v402_v30 = vmov 0.0  }
   0x2   :  { %v97_v1 = vunpack.c.l.b16 %v39_v0  ;;  %v383_v6 = vld [vmem:[%s623_s1 + $0x8] sm:$0xff]  ;;  %v382_v7 = vld [vmem:[%s623_s1] sm:$0xff]  ;;  %v376_v9 = vld [vmem:[%s624_s0 + $0x10] sm:$0xff]  ;;  %207 = vst.msk [vmem:[%s626_s3] sm:$0x1] %vm206_vm3, %v402_v30 }
   0x3   :  { %v374_v8 = vld [vmem:[%s624_s0] sm:$0xff]  ;;  %v380_v11 = vld [vmem:[%s624_s0 + $0x30] sm:$0xff]  ;;  %v375_v12 = vld [vmem:[%s624_s0 + $0x8] sm:$0xff]  ;;  %208 = vst.msk [vmem:[%s627_s4] sm:$0x1] %vm206_vm3, %v402_v30 }
   0x4   :  { %v102_v2 = vpack.c.b16 %v97_v1, %v97_v1  ;;  %v378_v10 = vld [vmem:[%s624_s0 + $0x20] sm:$0xff]  ;;  %v377_v13 = vld [vmem:[%s624_s0 + $0x18] sm:$0xff]  ;;  %v379_v14 = vld [vmem:[%s624_s0 + $0x28] sm:$0xff] }
   0x5   :  { %v381_v15 = vld [vmem:[%s624_s0 + $0x38] sm:$0xff] }
   0x6   :  { %v134_v3 = vsel %vm132_vm0, %v102_v2, 0 }
   0x7   :  { %139 = vmatpush.bf16.msra.mxu0 %v134_v3  ;;  %386 = vmatpush.bf16.msra.mxu1 %v134_v3 }
   0x8   :  { %387 = vmatpush.bf16.msra.mxu2 %v134_v3  ;;  %388 = vmatpush.bf16.msra.mxu3 %v134_v3 }
   0xb   :  { %140 = vmatpush.bf16.msra.mxu0 %v385_v4  ;;  %389 = vmatpush.bf16.msra.mxu1 %v385_v4 }
   0xc   :  { %390 = vmatpush.bf16.msra.mxu2 %v385_v4  ;;  %391 = vmatpush.bf16.msra.mxu3 %v385_v4 }
   0xf   :  { %141 = vmatpush.bf16.msra.mxu0 %v384_v5  ;;  %392 = vmatpush.bf16.msra.mxu1 %v384_v5 }
  0x10   :  { %393 = vmatpush.bf16.msra.mxu2 %v384_v5  ;;  %394 = vmatpush.bf16.msra.mxu3 %v384_v5 }
  0x13   :  { %142 = vmatpush.bf16.msra.mxu0 %v383_v6  ;;  %395 = vmatpush.bf16.msra.mxu1 %v383_v6 }
  0x14   :  { %396 = vmatpush.bf16.msra.mxu2 %v383_v6  ;;  %397 = vmatpush.bf16.msra.mxu3 %v383_v6 }
  0x17   :  { %143 = vmatpush.bf16.msra.mxu0 %v382_v7  ;;  %398 = vmatpush.bf16.msra.mxu1 %v382_v7 }
  0x18   :  { %399 = vmatpush.bf16.msra.mxu2 %v382_v7  ;;  %400 = vmatpush.bf16.msra.mxu3 %v382_v7 }
  0x1a   :  { %366 = vmatmul.msk.bf16.vlgmr.msra.gmra.mxu0 %vm107_vm1, %v374_v8  ;;  %368 = vmatmul.msk.bf16.vlgmr.msra.gmra.mxu1 %vm107_vm1, %v376_v9 }
  0x1b   :  { %370 = vmatmul.msk.bf16.vlgmr.msra.gmra.mxu2 %vm107_vm1, %v378_v10  ;;  %372 = vmatmul.msk.bf16.vlgmr.msra.gmra.mxu3 %vm107_vm1, %v380_v11 }
  0x2a   :  { %367 = vmatmul.msk.bf16.gmra.mxu0 %vm107_vm1, %v375_v12  ;;  %369 = vmatmul.msk.bf16.gmra.mxu1 %vm107_vm1, %v377_v13 }
  0x2b   :  { %371 = vmatmul.msk.bf16.gmra.mxu2 %vm107_vm1, %v379_v14  ;;  %373 = vmatmul.msk.bf16.gmra.mxu3 %vm107_vm1, %v381_v15 }
  0x97   :  { %v145_v16 = vpop.f32.mrf.mxu0  ;;  %v155_v17 = vpop.f32.mrf.mxu1 }
  0x98   :  { %186 = vst.msk [vmem:[%s625_s2] sm:$0xff] %vm185_vm2, %v145_v16  ;;  %v251_v27 = vmul.f32 %v145_v16, %v145_v16  ;;  %v210_v31 = vsel %vm185_vm2, %v145_v16, 0.0  ;;  %v255_v43 = vmul.f32 %v155_v17, %v155_v17  ;;  %v217_v48 = vsel %vm185_vm2, %v155_v17, 0.0 }
  0x99   :  { %190 = vst.msk [vmem:[%s625_s2 + $0x20] sm:$0xff] %vm185_vm2, %v155_v17 }
  0x9a   :  { %v267_v35 = vsel %vm185_vm2, %v251_v27, 0.0  ;;  %v274_v53 = vsel %vm185_vm2, %v255_v43, 0.0 }
  0x9e   :  { %v483_v18 = vpop.f32.mrf.mxu2  ;;  %v485_v19 = vpop.f32.mrf.mxu3 }
  0x9f   :  { %v147_v20 = vpop.f32.mrf.mxu0  ;;  %v157_v21 = vpop.f32.mrf.mxu1  ;;  %194 = vst.msk [vmem:[%s625_s2 + $0x40] sm:$0xff] %vm185_vm2, %v483_v18  ;;  %v259_v1 = vmul.f32 %v483_v18, %v483_v18  ;;  %v225_v6 = vsel %vm185_vm2, %v483_v18, 0.0 }
  0xa0   :  { %187 = vst.msk [vmem:[%s625_s2 + $0x8] sm:$0xff] %vm185_vm2, %v147_v20  ;;  %v252_v26 = vmul.f32 %v147_v20, %v147_v20  ;;  %v211_v28 = vsel %vm185_vm2, %v147_v20, 0.0  ;;  %v256_v49 = vmul.f32 %v157_v21, %v157_v21  ;;  %v219_v54 = vsel %vm185_vm2, %v157_v21, 0.0 }
  0xa1   :  { %191 = vst.msk [vmem:[%s625_s2 + $0x28] sm:$0xff] %vm185_vm2, %v157_v21  ;;  %v212_v34 = vadd.f32 %v211_v28, %v210_v31  ;;  %v282_v11 = vsel %vm185_vm2, %v259_v1, 0.0 }
  0xa2   :  { %198 = vst.msk [vmem:[%s625_s2 + $0x60] sm:$0xff] %vm185_vm2, %v485_v19  ;;  %v268_v32 = vsel %vm185_vm2, %v252_v26, 0.0  ;;  %v276_v58 = vsel %vm185_vm2, %v256_v49, 0.0 }
  0xa3   :  { %v269_v39 = vadd.f32 %v268_v32, %v267_v35 }
  0xa6   :  { %v505_v22 = vpop.f32.mrf.mxu2  ;;  %v507_v23 = vpop.f32.mrf.mxu3 }
  0xa7   :  { %v150_v24 = vpop.f32.mrf.mxu0  ;;  %v160_v25 = vpop.f32.mrf.mxu1  ;;  %195 = vst.msk [vmem:[%s625_s2 + $0x48] sm:$0xff] %vm185_vm2, %v505_v22  ;;  %v260_v7 = vmul.f32 %v505_v22, %v505_v22  ;;  %v227_v12 = vsel %vm185_vm2, %v505_v22, 0.0  ;;  %v233_v22 = vsel %vm185_vm2, %v485_v19, 0.0 }
  0xa8   :  { %188 = vst.msk [vmem:[%s625_s2 + $0x10] sm:$0xff] %vm185_vm2, %v150_v24  ;;  %v253_v29 = vmul.f32 %v150_v24, %v150_v24  ;;  %v213_v33 = vsel %vm185_vm2, %v150_v24, 0.0  ;;  %v257_v55 = vmul.f32 %v160_v25, %v160_v25  ;;  %v221_v59 = vsel %vm185_vm2, %v160_v25, 0.0 }
  0xa9   :  { %192 = vst.msk [vmem:[%s625_s2 + $0x30] sm:$0xff] %vm185_vm2, %v160_v25  ;;  %v214_v40 = vadd.f32 %v213_v33, %v212_v34  ;;  %v284_v16 = vsel %vm185_vm2, %v260_v7, 0.0  ;;  %v263_v24 = vmul.f32 %v485_v19, %v485_v19  ;;  %v235_v34 = vsel %vm185_vm2, %v507_v23, 0.0 }
  0xaa   :  { %199 = vst.msk [vmem:[%s625_s2 + $0x68] sm:$0xff] %vm185_vm2, %v507_v23  ;;  %v270_v36 = vsel %vm185_vm2, %v253_v29, 0.0  ;;  %v278_v2 = vsel %vm185_vm2, %v257_v55, 0.0  ;;  %v264_v29 = vmul.f32 %v507_v23, %v507_v23 }
  0xab   :  { %v271_v46 = vadd.f32 %v270_v36, %v269_v39  ;;  %v290_v33 = vsel %vm185_vm2, %v263_v24, 0.0 }
  0xac   :  { %v292_v39 = vsel %vm185_vm2, %v264_v29, 0.0 }
  0xae   :  { %v170_v37 = vpop.f32.mrf.mxu2  ;;  %v541_v38 = vpop.f32.mrf.mxu3 }
  0xaf   :  { %v152_v41 = vpop.f32.mrf.mxu0  ;;  %v162_v42 = vpop.f32.mrf.mxu1  ;;  %196 = vst.msk [vmem:[%s625_s2 + $0x50] sm:$0xff] %vm185_vm2, %v170_v37  ;;  %v261_v13 = vmul.f32 %v170_v37, %v170_v37  ;;  %v229_v17 = vsel %vm185_vm2, %v170_v37, 0.0  ;;  %v265_v35 = vmul.f32 %v541_v38, %v541_v38  ;;  %v237_v19 = vsel %vm185_vm2, %v541_v38, 0.0 }
  0xb0   :  { %189 = vst.msk [vmem:[%s625_s2 + $0x18] sm:$0xff] %vm185_vm2, %v152_v41  ;;  %v215_v44 = vsel %vm185_vm2, %v152_v41, 0.0  ;;  %v254_v45 = vmul.f32 %v152_v41, %v152_v41  ;;  %v258_v60 = vmul.f32 %v162_v42, %v162_v42  ;;  %v223_v3 = vsel %vm185_vm2, %v162_v42, 0.0 }
  0xb1   :  { %v216_v47 = vadd.f32 %v215_v44, %v214_v40  ;;  %193 = vst.msk [vmem:[%s625_s2 + $0x38] sm:$0xff] %vm185_vm2, %v162_v42  ;;  %v286_v25 = vsel %vm185_vm2, %v261_v13, 0.0  ;;  %v294_v43 = vsel %vm185_vm2, %v265_v35, 0.0 }
  0xb2   :  { %v272_v50 = vsel %vm185_vm2, %v254_v45, 0.0  ;;  %200 = vst.msk [vmem:[%s625_s2 + $0x70] sm:$0xff] %vm185_vm2, %v541_v38  ;;  %v280_v8 = vsel %vm185_vm2, %v258_v60, 0.0 }
  0xb3   :  { %v218_v51 = vadd.f32 %v217_v48, %v216_v47  ;;  %v273_v52 = vadd.f32 %v272_v50, %v271_v46 }
  0xb5   :  { %v275_v56 = vadd.f32 %v274_v53, %v273_v52  ;;  %v220_v57 = vadd.f32 %v219_v54, %v218_v51 }
  0xb6   :  { %v172_v61 = vpop.f32.mrf.mxu2  ;;  %v182_v62 = vpop.f32.mrf.mxu3 }
  0xb7   :  { %v222_v63 = vadd.f32 %v221_v59, %v220_v57  ;;  %v277_v0 = vadd.f32 %v276_v58, %v275_v56  ;;  %197 = vst.msk [vmem:[%s625_s2 + $0x58] sm:$0xff] %vm185_vm2, %v172_v61  ;;  %v262_v18 = vmul.f32 %v172_v61, %v172_v61  ;;  %v231_v26 = vsel %vm185_vm2, %v172_v61, 0.0  ;;  %v209_v56 = vld [vmem:[%s626_s3] sm:$0x1] }
  0xb8   :  { %201 = vst.msk [vmem:[%s625_s2 + $0x78] sm:$0xff] %vm185_vm2, %v182_v62  ;;  %v266_v40 = vmul.f32 %v182_v62, %v182_v62  ;;  %v239_v44 = vsel %vm185_vm2, %v182_v62, 0.0  ;;  %v250_v59 = vld [vmem:[%s627_s4] sm:$0x1] }
  0xb9   :  { %v224_v4 = vadd.f32 %v223_v3, %v222_v63  ;;  %v279_v5 = vadd.f32 %v278_v2, %v277_v0  ;;  %v288_v30 = vsel %vm185_vm2, %v262_v18, 0.0 }
  0xba   :  { %v296_v23 = vsel %vm185_vm2, %v266_v40, 0.0 }
  0xbb   :  { %v226_v9 = vadd.f32 %v225_v6, %v224_v4  ;;  %v281_v10 = vadd.f32 %v280_v8, %v279_v5 }
  0xbd   :  { %v283_v14 = vadd.f32 %v282_v11, %v281_v10  ;;  %v228_v15 = vadd.f32 %v227_v12, %v226_v9 }
  0xbf   :  { %v230_v20 = vadd.f32 %v229_v17, %v228_v15  ;;  %v285_v21 = vadd.f32 %v284_v16, %v283_v14 }
  0xc1   :  { %v287_v27 = vadd.f32 %v286_v25, %v285_v21  ;;  %v232_v28 = vadd.f32 %v231_v26, %v230_v20 }
  0xc3   :  { %v234_v31 = vadd.f32 %v233_v22, %v232_v28  ;;  %v289_v32 = vadd.f32 %v288_v30, %v287_v27 }
  0xc5   :  { %v291_v36 = vadd.f32 %v290_v33, %v289_v32  ;;  %v236_v37 = vadd.f32 %v235_v34, %v234_v31 }
  0xc7   :  { %v238_v41 = vadd.f32 %v237_v19, %v236_v37  ;;  %v293_v42 = vadd.f32 %v292_v39, %v291_v36 }
  0xc9   :  { %v295_v45 = vadd.f32 %v294_v43, %v293_v42  ;;  %v240_v46 = vadd.f32 %v239_v44, %v238_v41 }
  0xcb   :  { %v241_v47 = vrot.slane %v240_v46, 4  ;;  %v297_v48 = vadd.f32 %v296_v23, %v295_v45 }
  0xcd   :  { %v242_v49 = vadd.f32 %v241_v47, %v240_v46  ;;  %v298_v50 = vrot.slane %v297_v48, 4 }
  0xcf   :  { %v243_v51 = vrot.slane %v242_v49, 2  ;;  %v299_v52 = vadd.f32 %v298_v50, %v297_v48 }
  0xd1   :  { %v244_v53 = vadd.f32 %v243_v51, %v242_v49  ;;  %v300_v54 = vrot.slane %v299_v52, 2 }
  0xd3   :  { %v245_v38 = vrot.slane %v244_v53, 1  ;;  %v301_v55 = vadd.f32 %v300_v54, %v299_v52 }
  0xd5   :  { %v246_v57 = vadd.f32 %v245_v38, %v244_v53  ;;  %v302_v58 = vrot.slane %v301_v55, 1 }
  0xd7   :  { %v247_v60 = vadd.f32 %v246_v57, %v209_v56  ;;  %v303_v61 = vadd.f32 %v302_v58, %v301_v55 }
  0xd9   :  { %249 = vst.msk [vmem:[%s626_s3] sm:$0x1] %vm206_vm3, %v247_v60  ;;  %v304_v62 = vadd.f32 %v303_v61, %v250_v59 }
  0xdb   :  { %305 = vst.msk [vmem:[%s627_s4] sm:$0x1] %vm206_vm3, %v304_v62 }

// kernel: resnet_generator_forward.22
= control target key start
LH: loop header
LB: loop body
LE: loop exit
PB: predicated region body
PF: predicated region fallthrough
CT: control target
= control target key end

     0   :  { %vm86_vm0 = vcmask 130048   ;;  %s265_s0 = inlined_call_operand.vmem [shape: f32[128,16], index: 0, kind: input, shape index: {}]   ;;  %s266_s1 = inlined_call_operand.vmem [shape: f32[1,16], index: 1, kind: input, shape index: {}]   ;;  %s267_s2 = inlined_call_operand.vmem [shape: f32[1,16], index: 2, kind: input, shape index: {}]   ;;  %s268_s3 = inlined_call_operand.vmem [shape: f32[128,16], index: 3, kind: output, shape index: {}]  }
   0x1   :  { %v14_v0 = vld [vmem:[%s265_s0] sm:$0xff]  ;;  %v15_v3 = vld [vmem:[%s265_s0 + $0x8] sm:$0xff]  ;;  %v16_v6 = vld [vmem:[%s265_s0 + $0x10] sm:$0xff] }
   0x2   :  { %v107_v1 = vld [vmem:[%s266_s1] ss:$0 sm:$0xff]  ;;  %v17_v7 = vld [vmem:[%s265_s0 + $0x18] sm:$0xff]  ;;  %v19_v12 = vld [vmem:[%s265_s0 + $0x28] sm:$0xff] }
   0x3   :  { %v138_v2 = vld [vmem:[%s267_s2] ss:$0 sm:$0xff]  ;;  %v34_v4 = vmul.f32 %v107_v1, %v14_v0  ;;  %v35_v5 = vmul.f32 %v107_v1, %v15_v3  ;;  %v36_v9 = vmul.f32 %v107_v1, %v16_v6  ;;  %v37_v10 = vmul.f32 %v107_v1, %v17_v7  ;;  %v20_v13 = vld [vmem:[%s265_s0 + $0x30] sm:$0xff]  ;;  %v21_v14 = vld [vmem:[%s265_s0 + $0x38] sm:$0xff] }
   0x4   :  { %v18_v8 = vld [vmem:[%s265_s0 + $0x20] sm:$0xff]  ;;  %v39_v17 = vmul.f32 %v107_v1, %v19_v12  ;;  %v40_v18 = vmul.f32 %v107_v1, %v20_v13  ;;  %v41_v22 = vmul.f32 %v107_v1, %v21_v14  ;;  %v23_v24 = vld [vmem:[%s265_s0 + $0x48] sm:$0xff]  ;;  %v24_v29 = vld [vmem:[%s265_s0 + $0x50] sm:$0xff] }
   0x5   :  { %v38_v11 = vmul.f32 %v107_v1, %v18_v8  ;;  %v54_v15 = vadd.f32 %v138_v2, %v34_v4  ;;  %v55_v16 = vadd.f32 %v138_v2, %v35_v5  ;;  %v56_v19 = vadd.f32 %v138_v2, %v36_v9  ;;  %v22_v23 = vld [vmem:[%s265_s0 + $0x40] sm:$0xff]  ;;  %v25_v30 = vld [vmem:[%s265_s0 + $0x58] sm:$0xff]  ;;  %v27_v35 = vld [vmem:[%s265_s0 + $0x68] sm:$0xff] }
   0x6   :  { %v57_v20 = vadd.f32 %v138_v2, %v37_v10  ;;  %v59_v27 = vadd.f32 %v138_v2, %v39_v17  ;;  %v60_v28 = vadd.f32 %v138_v2, %v40_v18  ;;  %v26_v31 = vld [vmem:[%s265_s0 + $0x60] sm:$0xff]  ;;  %v61_v34 = vadd.f32 %v138_v2, %v41_v22  ;;  %v28_v36 = vld [vmem:[%s265_s0 + $0x70] sm:$0xff]  ;;  %v29_v41 = vld [vmem:[%s265_s0 + $0x78] sm:$0xff] }
   0x7   :  { %v58_v21 = vadd.f32 %v138_v2, %v38_v11  ;;  %v70_v25 = vmax.f32 %v54_v15, 0.0  ;;  %v71_v26 = vmax.f32 %v55_v16, 0.0  ;;  %v72_v32 = vmax.f32 %v56_v19, 0.0 }
   0x8   :  { %v73_v33 = vmax.f32 %v57_v20, 0.0  ;;  %v75_v38 = vmax.f32 %v59_v27, 0.0  ;;  %v42_v39 = vmul.f32 %v107_v1, %v22_v23  ;;  %v43_v40 = vmul.f32 %v107_v1, %v23_v24 }
   0x9   :  { %87 = vst.msk [vmem:[%s268_s3] sm:$0xff] %vm86_vm0, %v70_v25  ;;  %v74_v37 = vmax.f32 %v58_v21, 0.0  ;;  %v76_v42 = vmax.f32 %v60_v28, 0.0  ;;  %v44_v43 = vmul.f32 %v107_v1, %v24_v29  ;;  %v45_v44 = vmul.f32 %v107_v1, %v25_v30 }
   0xa   :  { %88 = vst.msk [vmem:[%s268_s3 + $0x8] sm:$0xff] %vm86_vm0, %v71_v26  ;;  %v46_v45 = vmul.f32 %v107_v1, %v26_v31  ;;  %v62_v46 = vadd.f32 %v138_v2, %v42_v39  ;;  %v63_v47 = vadd.f32 %v138_v2, %v43_v40  ;;  %v47_v48 = vmul.f32 %v107_v1, %v27_v35 }
   0xb   :  { %89 = vst.msk [vmem:[%s268_s3 + $0x10] sm:$0xff] %vm86_vm0, %v72_v32  ;;  %v48_v49 = vmul.f32 %v107_v1, %v28_v36  ;;  %v77_v50 = vmax.f32 %v61_v34, 0.0  ;;  %v64_v51 = vadd.f32 %v138_v2, %v44_v43  ;;  %v65_v52 = vadd.f32 %v138_v2, %v45_v44 }
   0xc   :  { %90 = vst.msk [vmem:[%s268_s3 + $0x18] sm:$0xff] %vm86_vm0, %v73_v33  ;;  %v49_v53 = vmul.f32 %v107_v1, %v29_v41  ;;  %v78_v54 = vmax.f32 %v62_v46, 0.0  ;;  %v66_v55 = vadd.f32 %v138_v2, %v46_v45  ;;  %v79_v56 = vmax.f32 %v63_v47, 0.0 }
   0xd   :  { %91 = vst.msk [vmem:[%s268_s3 + $0x20] sm:$0xff] %vm86_vm0, %v74_v37  ;;  %v67_v57 = vadd.f32 %v138_v2, %v47_v48  ;;  %v80_v58 = vmax.f32 %v64_v51, 0.0  ;;  %v68_v59 = vadd.f32 %v138_v2, %v48_v49  ;;  %v81_v60 = vmax.f32 %v65_v52, 0.0 }
   0xe   :  { %92 = vst.msk [vmem:[%s268_s3 + $0x28] sm:$0xff] %vm86_vm0, %v75_v38  ;;  %v69_v61 = vadd.f32 %v138_v2, %v49_v53  ;;  %v82_v62 = vmax.f32 %v66_v55, 0.0 }
   0xf   :  { %93 = vst.msk [vmem:[%s268_s3 + $0x30] sm:$0xff] %vm86_vm0, %v76_v42  ;;  %v83_v63 = vmax.f32 %v67_v57, 0.0  ;;  %v84_v0 = vmax.f32 %v68_v59, 0.0 }
  0x10   :  { %94 = vst.msk [vmem:[%s268_s3 + $0x38] sm:$0xff] %vm86_vm0, %v77_v50  ;;  %v85_v1 = vmax.f32 %v69_v61, 0.0 }
  0x11   :  { %95 = vst.msk [vmem:[%s268_s3 + $0x40] sm:$0xff] %vm86_vm0, %v78_v54 }
  0x12   :  { %96 = vst.msk [vmem:[%s268_s3 + $0x48] sm:$0xff] %vm86_vm0, %v79_v56 }
  0x13   :  { %97 = vst.msk [vmem:[%s268_s3 + $0x50] sm:$0xff] %vm86_vm0, %v80_v58 }
  0x14   :  { %98 = vst.msk [vmem:[%s268_s3 + $0x58] sm:$0xff] %vm86_vm0, %v81_v60 }
  0x15   :  { %99 = vst.msk [vmem:[%s268_s3 + $0x60] sm:$0xff] %vm86_vm0, %v82_v62 }
  0x16   :  { %100 = vst.msk [vmem:[%s268_s3 + $0x68] sm:$0xff] %vm86_vm0, %v83_v63 }
  0x17   :  { %101 = vst.msk [vmem:[%s268_s3 + $0x70] sm:$0xff] %vm86_vm0, %v84_v0 }
  0x18   :  { %102 = vst.msk [vmem:[%s268_s3 + $0x78] sm:$0xff] %vm86_vm0, %v85_v1 }

// kernel: resnet_generator_forward.24
= control target key start
LH: loop header
LB: loop body
LE: loop exit
PB: predicated region body
PF: predicated region fallthrough
CT: control target
= control target key end

     0   :  { %vm38_vm0 = vcmask 261120   ;;  %s99_s0 = inlined_call_operand.vmem [shape: f32[32,32], index: 0, kind: input, shape index: {}]   ;;  %s100_s1 = inlined_call_operand.vmem [shape: f32[1,32], index: 1, kind: input, shape index: {}]   ;;  %s101_s2 = inlined_call_operand.vmem [shape: f32[1,32], index: 2, kind: input, shape index: {}]   ;;  %s102_s3 = inlined_call_operand.vmem [shape: f32[32,32], index: 3, kind: output, shape index: {}]  }
   0x1   :  { %v14_v0 = vld [vmem:[%s99_s0] sm:$0xff]  ;;  %v15_v3 = vld [vmem:[%s99_s0 + $0x8] sm:$0xff]  ;;  %v16_v6 = vld [vmem:[%s99_s0 + $0x10] sm:$0xff] }
   0x2   :  { %v47_v1 = vld [vmem:[%s100_s1] ss:$0 sm:$0xff]  ;;  %v17_v7 = vld [vmem:[%s99_s0 + $0x18] sm:$0xff] }
   0x3   :  { %v48_v2 = vld [vmem:[%s101_s2] ss:$0 sm:$0xff]  ;;  %v22_v4 = vmul.f32 %v47_v1, %v14_v0  ;;  %v23_v5 = vmul.f32 %v47_v1, %v15_v3  ;;  %v24_v8 = vmul.f32 %v47_v1, %v16_v6  ;;  %v25_v9 = vmul.f32 %v47_v1, %v17_v7 }
   0x5   :  { %v30_v10 = vadd.f32 %v48_v2, %v22_v4  ;;  %v31_v11 = vadd.f32 %v48_v2, %v23_v5  ;;  %v32_v12 = vadd.f32 %v48_v2, %v24_v8  ;;  %v33_v13 = vadd.f32 %v48_v2, %v25_v9 }
   0x7   :  { %v34_v14 = vmax.f32 %v30_v10, 0.0  ;;  %v35_v15 = vmax.f32 %v31_v11, 0.0  ;;  %v36_v16 = vmax.f32 %v32_v12, 0.0  ;;  %v37_v17 = vmax.f32 %v33_v13, 0.0 }
   0x9   :  { %39 = vst.msk [vmem:[%s102_s3] sm:$0xff] %vm38_vm0, %v34_v14 }
   0xa   :  { %40 = vst.msk [vmem:[%s102_s3 + $0x8] sm:$0xff] %vm38_vm0, %v35_v15 }
   0xb   :  { %41 = vst.msk [vmem:[%s102_s3 + $0x10] sm:$0xff] %vm38_vm0, %v36_v16 }
   0xc   :  { %42 = vst.msk [vmem:[%s102_s3 + $0x18] sm:$0xff] %vm38_vm0, %v37_v17 }

// kernel: resnet_generator_forward.23
= control target key start
LH: loop header
LB: loop body
LE: loop exit
PB: predicated region body
PF: predicated region fallthrough
CT: control target
= control target key end

     0   :  { %vm109_vm0 = vcmask 130048   ;;  %vm163_vm1 = vcmask 253952   ;;  %v291_v22 = vmov 0.0   ;;  %vm154_vm2 = vcmask 261120   ;;  %s416_s1 = inlined_call_operand.vmem [shape: bf16[144,32], index: 1, kind: input, shape index: {}]   ;;  %s417_s0 = inlined_call_operand.vmem [shape: bf16[32,144], index: 0, kind: input, shape index: {}]   ;;  %s418_s3 = inlined_call_operand.vmem [shape: f32[1,32], index: 3, kind: output, shape index: {1}]   ;;  %s419_s4 = inlined_call_operand.vmem [shape: f32[1,32], index: 4, kind: output, shape index: {2}]   ;;  %s420_s2 = inlined_call_operand.vmem [shape: f32[32,32], index: 2, kind: output, shape index: {0}]  }
   0x1   :  { %v280_v0 = vld [vmem:[%s416_s1 + $0x38] sm:$0xff]  ;;  %v281_v1 = vld [vmem:[%s416_s1 + $0x40] sm:$0xff]  ;;  %v279_v3 = vld [vmem:[%s416_s1 + $0x30] sm:$0xff]  ;;  %164 = vst.msk [vmem:[%s418_s3] sm:$0x1] %vm163_vm1, %v291_v22 }
   0x2   :  { %v269_v2 = vld [vmem:[%s417_s0 + $0x4] sm:$0xf]  ;;  %116 = vmatpush.bf16.msra.mxu0 %v280_v0  ;;  %282 = vmatpush.bf16.msra.mxu2 %v280_v0  ;;  %v219_v4 = vld [vmem:[%s417_s0 + $0x8] sm:$0xf0]  ;;  %v276_v8 = vld [vmem:[%s416_s1 + $0x18] sm:$0xff] }
   0x3   :  { %142 = vmatpush.bf16.msra.mxu1 %v281_v1  ;;  %v222_v5 = vor.u32 %v269_v2, %v219_v4  ;;  %v278_v6 = vld [vmem:[%s416_s1 + $0x28] sm:$0xff]  ;;  %v277_v7 = vld [vmem:[%s416_s1 + $0x20] sm:$0xff]  ;;  %v271_v9 = vld [vmem:[%s417_s0 + $0x14] sm:$0xf]  ;;  %165 = vst.msk [vmem:[%s419_s4] sm:$0x1] %vm163_vm1, %v291_v22 }
   0x4   :  { %v227_v10 = vld [vmem:[%s417_s0 + $0x18] sm:$0xf0]  ;;  %v275_v11 = vld [vmem:[%s416_s1 + $0x10] sm:$0xff]  ;;  %v274_v13 = vld [vmem:[%s416_s1 + $0x8] sm:$0xff] }
   0x5   :  { %v230_v12 = vor.u32 %v271_v9, %v227_v10  ;;  %v273_v14 = vld [vmem:[%s416_s1] sm:$0xff]  ;;  %v270_v16 = vld [vmem:[%s417_s0 + $0x4] sm:$0xf0]  ;;  %v225_v17 = vld [vmem:[%s417_s0 + $0x10] sm:$0xf] }
   0x6   :  { %117 = vmatpush.bf16.msra.mxu0 %v279_v3  ;;  %283 = vmatpush.bf16.msra.mxu2 %v279_v3  ;;  %v217_v15 = vld [vmem:[%s417_s0] sm:$0xf]  ;;  %v272_v18 = vld [vmem:[%s417_s0 + $0x14] sm:$0xf0] }
   0x7   :  { %267 = vmatmul.msk.bf16.vlgmr.msra.gmra.mxu1 %vm109_vm0, %v222_v5  ;;  %v218_v19 = vor.u32 %v270_v16, %v217_v15  ;;  %v226_v20 = vor.u32 %v272_v18, %v225_v17 }
   0x8   :  { %v166_v61 = vld [vmem:[%s418_s3] sm:$0x1] }
   0xa   :  { %118 = vmatpush.bf16.msra.mxu0 %v278_v6  ;;  %284 = vmatpush.bf16.msra.mxu2 %v278_v6  ;;  %v183_v0 = vld [vmem:[%s419_s4] sm:$0x1] }
   0xe   :  { %119 = vmatpush.bf16.msra.mxu0 %v277_v7  ;;  %285 = vmatpush.bf16.msra.mxu2 %v277_v7 }
  0x12   :  { %120 = vmatpush.bf16.msra.mxu0 %v276_v8  ;;  %286 = vmatpush.bf16.msra.mxu2 %v276_v8 }
  0x16   :  { %121 = vmatpush.bf16.msra.mxu0 %v275_v11  ;;  %287 = vmatpush.bf16.msra.mxu2 %v275_v11 }
  0x17   :  { %268 = vmatmul.msk.bf16.gmra.mxu1 %vm109_vm0, %v230_v12 }
  0x1a   :  { %122 = vmatpush.bf16.msra.mxu0 %v274_v13  ;;  %288 = vmatpush.bf16.msra.mxu2 %v274_v13 }
  0x1e   :  { %123 = vmatpush.bf16.msra.mxu0 %v273_v14  ;;  %289 = vmatpush.bf16.msra.mxu2 %v273_v14 }
  0x21   :  { %124 = vmatmul.bf16.vlgmr.msra.gmra.mxu0 %v218_v19  ;;  %129 = vmatmul.bf16.vlgmr.msra.gmra.mxu2 %v226_v20 }
  0x84   :  { %v144_v21 = vpop.f32.mrf.mxu1 }
  0x8c   :  { %v146_v23 = vpop.f32.mrf.mxu1 }
  0x94   :  { %v149_v26 = vpop.f32.mrf.mxu1 }
  0x9c   :  { %v151_v39 = vpop.f32.mrf.mxu1 }
  0x9e   :  { %v125_v24 = vpop.f32.mrf.mxu0 }
  0x9f   :  { %v145_v25 = vadd.f32 %v144_v21, %v125_v24 }
  0xa1   :  { %155 = vst.msk [vmem:[%s420_s2] sm:$0xff] %vm154_vm2, %v145_v25  ;;  %v184_v30 = vmul.f32 %v145_v25, %v145_v25  ;;  %v167_v32 = vsel %vm154_vm2, %v145_v25, 0.0 }
  0xa3   :  { %v188_v36 = vsel %vm154_vm2, %v184_v30, 0.0 }
  0xa4   :  { %v130_v27 = vpop.f32.mrf.mxu2 }
  0xa5   :  { %v150_v28 = vadd.f32 %v149_v26, %v130_v27 }
  0xa6   :  { %v127_v29 = vpop.f32.mrf.mxu0 }
  0xa7   :  { %157 = vst.msk [vmem:[%s420_s2 + $0x10] sm:$0xff] %vm154_vm2, %v150_v28  ;;  %v147_v31 = vadd.f32 %v146_v23, %v127_v29  ;;  %v186_v37 = vmul.f32 %v150_v28, %v150_v28  ;;  %v170_v42 = vsel %vm154_vm2, %v150_v28, 0.0 }
  0xa9   :  { %156 = vst.msk [vmem:[%s420_s2 + $0x8] sm:$0xff] %vm154_vm2, %v147_v31  ;;  %v168_v33 = vsel %vm154_vm2, %v147_v31, 0.0  ;;  %v185_v34 = vmul.f32 %v147_v31, %v147_v31  ;;  %v191_v45 = vsel %vm154_vm2, %v186_v37, 0.0 }
  0xaa   :  { %v169_v35 = vadd.f32 %v168_v33, %v167_v32 }
  0xab   :  { %v189_v38 = vsel %vm154_vm2, %v185_v34, 0.0 }
  0xac   :  { %v190_v40 = vadd.f32 %v189_v38, %v188_v36  ;;  %v132_v41 = vpop.f32.mrf.mxu2  ;;  %v171_v44 = vadd.f32 %v170_v42, %v169_v35 }
  0xad   :  { %v152_v43 = vadd.f32 %v151_v39, %v132_v41 }
  0xae   :  { %v192_v49 = vadd.f32 %v191_v45, %v190_v40 }
  0xaf   :  { %158 = vst.msk [vmem:[%s420_s2 + $0x18] sm:$0xff] %vm154_vm2, %v152_v43  ;;  %v172_v46 = vsel %vm154_vm2, %v152_v43, 0.0  ;;  %v187_v47 = vmul.f32 %v152_v43, %v152_v43 }
  0xb0   :  { %v173_v48 = vadd.f32 %v172_v46, %v171_v44 }
  0xb1   :  { %v193_v50 = vsel %vm154_vm2, %v187_v47, 0.0 }
  0xb2   :  { %v174_v51 = vrot.slane %v173_v48, 4  ;;  %v194_v52 = vadd.f32 %v193_v50, %v192_v49 }
  0xb4   :  { %v175_v53 = vadd.f32 %v174_v51, %v173_v48  ;;  %v195_v54 = vrot.slane %v194_v52, 4 }
  0xb6   :  { %v176_v55 = vrot.slane %v175_v53, 2  ;;  %v196_v56 = vadd.f32 %v195_v54, %v194_v52 }
  0xb8   :  { %v177_v57 = vadd.f32 %v176_v55, %v175_v53  ;;  %v197_v58 = vrot.slane %v196_v56, 2 }
  0xba   :  { %v178_v59 = vrot.slane %v177_v57, 1  ;;  %v198_v60 = vadd.f32 %v197_v58, %v196_v56 }
  0xbc   :  { %v179_v62 = vadd.f32 %v178_v59, %v177_v57  ;;  %v199_v63 = vrot.slane %v198_v60, 1 }
  0xbe   :  { %v180_v1 = vadd.f32 %v179_v62, %v166_v61  ;;  %v200_v2 = vadd.f32 %v199_v63, %v198_v60 }
  0xc0   :  { %182 = vst.msk [vmem:[%s418_s3] sm:$0x1] %vm163_vm1, %v180_v1  ;;  %v201_v3 = vadd.f32 %v200_v2, %v183_v0 }
  0xc2   :  { %202 = vst.msk [vmem:[%s419_s4] sm:$0x1] %vm163_vm1, %v201_v3 }

// kernel: resnet_generator_forward.28
= control target key start
LH: loop header
LB: loop body
LE: loop exit
PB: predicated region body
PF: predicated region fallthrough
CT: control target
= control target key end

     0   :  { %vm45_vm0 = vcmask 261120   ;;  %s123_s0 = inlined_call_operand.vmem [shape: f32[32,32], index: 0, kind: input, shape index: {}]   ;;  %s124_s1 = inlined_call_operand.vmem [shape: f32[1,32], index: 1, kind: input, shape index: {}]   ;;  %s125_s2 = inlined_call_operand.vmem [shape: f32[1,32], index: 2, kind: input, shape index: {}]   ;;  %s126_s3 = inlined_call_operand.vmem [shape: f32[32,32], index: 3, kind: input, shape index: {}]   ;;  %s127_s4 = inlined_call_operand.vmem [shape: f32[32,32], index: 4, kind: output, shape index: {}]  }
   0x1   :  { %v17_v0 = vld [vmem:[%s123_s0] sm:$0xff]  ;;  %v18_v4 = vld [vmem:[%s123_s0 + $0x8] sm:$0xff]  ;;  %v19_v5 = vld [vmem:[%s123_s0 + $0x10] sm:$0xff] }
   0x2   :  { %v54_v1 = vld [vmem:[%s124_s1] ss:$0 sm:$0xff]  ;;  %v20_v9 = vld [vmem:[%s123_s0 + $0x18] sm:$0xff]  ;;  %v38_v11 = vld [vmem:[%s126_s3 + $0x8] sm:$0xff] }
   0x3   :  { %v55_v2 = vld [vmem:[%s125_s2] ss:$0 sm:$0xff]  ;;  %v25_v3 = vmul.f32 %v54_v1, %v17_v0  ;;  %v26_v7 = vmul.f32 %v54_v1, %v18_v4  ;;  %v27_v8 = vmul.f32 %v54_v1, %v19_v5  ;;  %v39_v12 = vld [vmem:[%s126_s3 + $0x10] sm:$0xff]  ;;  %v28_v13 = vmul.f32 %v54_v1, %v20_v9  ;;  %v40_v16 = vld [vmem:[%s126_s3 + $0x18] sm:$0xff] }
   0x4   :  { %v37_v6 = vld [vmem:[%s126_s3] sm:$0xff] }
   0x5   :  { %v33_v10 = vadd.f32 %v55_v2, %v25_v3  ;;  %v34_v14 = vadd.f32 %v55_v2, %v26_v7  ;;  %v35_v15 = vadd.f32 %v55_v2, %v27_v8  ;;  %v36_v18 = vadd.f32 %v55_v2, %v28_v13 }
   0x7   :  { %v41_v17 = vadd.f32 %v37_v6, %v33_v10  ;;  %v42_v19 = vadd.f32 %v38_v11, %v34_v14  ;;  %v43_v20 = vadd.f32 %v39_v12, %v35_v15  ;;  %v44_v21 = vadd.f32 %v40_v16, %v36_v18 }
   0x9   :  { %46 = vst.msk [vmem:[%s127_s4] sm:$0xff] %vm45_vm0, %v41_v17 }
   0xa   :  { %47 = vst.msk [vmem:[%s127_s4 + $0x8] sm:$0xff] %vm45_vm0, %v42_v19 }
   0xb   :  { %48 = vst.msk [vmem:[%s127_s4 + $0x10] sm:$0xff] %vm45_vm0, %v43_v20 }
   0xc   :  { %49 = vst.msk [vmem:[%s127_s4 + $0x18] sm:$0xff] %vm45_vm0, %v44_v21 }

// kernel: resnet_generator_forward.25
= control target key start
LH: loop header
LB: loop body
LE: loop exit
PB: predicated region body
PF: predicated region fallthrough
CT: control target
= control target key end

     0   :  { %vm197_vm0 = vcmask 261120   ;;  %vm269_vm1 = vcmask 253952   ;;  %v452_v37 = vmov 0.0   ;;  %s616_s1 = inlined_call_operand.vmem [shape: bf16[288,32], index: 1, kind: input, shape index: {}]   ;;  %s617_s0 = inlined_call_operand.vmem [shape: bf16[32,288], index: 0, kind: input, shape index: {}]   ;;  %s618_s3 = inlined_call_operand.vmem [shape: f32[1,32], index: 3, kind: output, shape index: {1}]   ;;  %s619_s4 = inlined_call_operand.vmem [shape: f32[1,32], index: 4, kind: output, shape index: {2}]   ;;  %s620_s2 = inlined_call_operand.vmem [shape: f32[32,32], index: 2, kind: output, shape index: {0}]  }
   0x1   :  { %v432_v0 = vld [vmem:[%s616_s1 + $0x38] sm:$0xff]  ;;  %v431_v2 = vld [vmem:[%s616_s1 + $0x30] sm:$0xff]  ;;  %v442_v4 = vld [vmem:[%s616_s1 + $0x88] sm:$0xff]  ;;  %270 = vst.msk [vmem:[%s618_s3] sm:$0x1] %vm269_vm1, %v452_v37 }
   0x2   :  { %v440_v1 = vld [vmem:[%s616_s1 + $0x78] sm:$0xff]  ;;  %204 = vmatpush.bf16.msra.mxu0 %v432_v0  ;;  %v439_v3 = vld [vmem:[%s616_s1 + $0x70] sm:$0xff]  ;;  %443 = vmatpush.bf16.msra.mxu3 %v432_v0  ;;  %v441_v5 = vld [vmem:[%s616_s1 + $0x80] sm:$0xff]  ;;  %271 = vst.msk [vmem:[%s619_s4] sm:$0x1] %vm269_vm1, %v452_v37 }
   0x3   :  { %223 = vmatpush.bf16.msra.mxu1 %v440_v1  ;;  %248 = vmatpush.bf16.msra.mxu2 %v442_v4  ;;  %v331_v6 = vld [vmem:[%s617_s0 + $0x8] sm:$0xf]  ;;  %v421_v7 = vld [vmem:[%s617_s0 + $0x10] sm:$0xf0]  ;;  %v429_v11 = vld [vmem:[%s616_s1 + $0x20] sm:$0xff] }
   0x4   :  { %v430_v8 = vld [vmem:[%s616_s1 + $0x28] sm:$0xff]  ;;  %v332_v10 = vor.u32 %v421_v7, %v331_v6  ;;  %v437_v12 = vld [vmem:[%s616_s1 + $0x60] sm:$0xff]  ;;  %v428_v13 = vld [vmem:[%s616_s1 + $0x18] sm:$0xff] }
   0x5   :  { %v438_v9 = vld [vmem:[%s616_s1 + $0x68] sm:$0xff]  ;;  %v436_v14 = vld [vmem:[%s616_s1 + $0x58] sm:$0xff]  ;;  %v427_v15 = vld [vmem:[%s616_s1 + $0x10] sm:$0xff] }
   0x6   :  { %205 = vmatpush.bf16.msra.mxu0 %v431_v2  ;;  %444 = vmatpush.bf16.msra.mxu3 %v431_v2  ;;  %v435_v16 = vld [vmem:[%s616_s1 + $0x50] sm:$0xff]  ;;  %v343_v17 = vld [vmem:[%s617_s0 + $0x20] sm:$0xf]  ;;  %v424_v18 = vld [vmem:[%s617_s0 + $0x28] sm:$0xf0] }
   0x7   :  { %224 = vmatpush.bf16.msra.mxu1 %v439_v3  ;;  %249 = vmatpush.bf16.msra.mxu2 %v441_v5  ;;  %v426_v19 = vld [vmem:[%s616_s1 + $0x8] sm:$0xff]  ;;  %v344_v21 = vor.u32 %v424_v18, %v343_v17  ;;  %v425_v22 = vld [vmem:[%s616_s1] sm:$0xff]  ;;  %v325_v27 = vld [vmem:[%s617_s0 + $0xc] sm:$0xf0] }
   0x8   :  { %v434_v20 = vld [vmem:[%s616_s1 + $0x48] sm:$0xff]  ;;  %v433_v23 = vld [vmem:[%s616_s1 + $0x40] sm:$0xff]  ;;  %v335_v28 = vld [vmem:[%s617_s0 + $0x18] sm:$0xf] }
   0x9   :  { %v323_v24 = vld [vmem:[%s617_s0] sm:$0xf]  ;;  %v420_v25 = vld [vmem:[%s617_s0 + $0x8] sm:$0xf0]  ;;  %v419_v26 = vld [vmem:[%s617_s0 + $0x4] sm:$0xf] }
   0xa   :  { %206 = vmatpush.bf16.msra.mxu0 %v430_v8  ;;  %445 = vmatpush.bf16.msra.mxu3 %v430_v8  ;;  %v423_v29 = vld [vmem:[%s617_s0 + $0x20] sm:$0xf0]  ;;  %v324_v30 = vor.u32 %v420_v25, %v323_v24  ;;  %v328_v31 = vor.u32 %v419_v26, %v325_v27  ;;  %v422_v33 = vld [vmem:[%s617_s0 + $0x1c] sm:$0xf]  ;;  %v337_v34 = vld [vmem:[%s617_s0 + $0x24] sm:$0xf0] }
   0xb   :  { %225 = vmatpush.bf16.msra.mxu1 %v438_v9  ;;  %417 = vmatmul.msk.bf16.vlgmr.msra.gmra.mxu2 %vm197_vm0, %v332_v10  ;;  %v336_v32 = vor.u32 %v423_v29, %v335_v28  ;;  %v340_v35 = vor.u32 %v422_v33, %v337_v34 }
   0xe   :  { %207 = vmatpush.bf16.msra.mxu0 %v429_v11  ;;  %446 = vmatpush.bf16.msra.mxu3 %v429_v11 }
   0xf   :  { %226 = vmatpush.bf16.msra.mxu1 %v437_v12 }
  0x12   :  { %208 = vmatpush.bf16.msra.mxu0 %v428_v13  ;;  %447 = vmatpush.bf16.msra.mxu3 %v428_v13 }
  0x13   :  { %227 = vmatpush.bf16.msra.mxu1 %v436_v14 }
  0x16   :  { %209 = vmatpush.bf16.msra.mxu0 %v427_v15  ;;  %448 = vmatpush.bf16.msra.mxu3 %v427_v15 }
  0x17   :  { %228 = vmatpush.bf16.msra.mxu1 %v435_v16 }
  0x1a   :  { %210 = vmatpush.bf16.msra.mxu0 %v426_v19  ;;  %449 = vmatpush.bf16.msra.mxu3 %v426_v19 }
  0x1b   :  { %229 = vmatpush.bf16.msra.mxu1 %v434_v20  ;;  %418 = vmatmul.msk.bf16.gmra.mxu2 %vm197_vm0, %v344_v21  ;;  %v272_v20 = vld [vmem:[%s618_s3] sm:$0x1] }
  0x1e   :  { %211 = vmatpush.bf16.msra.mxu0 %v425_v22  ;;  %450 = vmatpush.bf16.msra.mxu3 %v425_v22 }
  0x1f   :  { %230 = vmatpush.bf16.msra.mxu1 %v433_v23  ;;  %v289_v23 = vld [vmem:[%s619_s4] sm:$0x1] }
  0x21   :  { %212 = vmatmul.bf16.vlgmr.msra.gmra.mxu0 %v324_v30  ;;  %217 = vmatmul.bf16.vlgmr.msra.gmra.mxu3 %v336_v32 }
  0x22   :  { %231 = vmatmul.bf16.vlgmr.msra.gmra.mxu1 %v328_v31 }
  0x32   :  { %236 = vmatmul.bf16.gmra.mxu1 %v340_v35 }
  0x8e   :  { %v251_v36 = vpop.f32.mrf.mxu2 }
  0x96   :  { %v253_v42 = vpop.f32.mrf.mxu2 }
  0x9e   :  { %v213_v38 = vpop.f32.mrf.mxu0  ;;  %v256_v48 = vpop.f32.mrf.mxu2 }
  0x9f   :  { %v232_v39 = vpop.f32.mrf.mxu1 }
  0xa0   :  { %v233_v40 = vadd.f32 %v232_v39, %v213_v38 }
  0xa2   :  { %v252_v41 = vadd.f32 %v251_v36, %v233_v40 }
  0xa4   :  { %261 = vst.msk [vmem:[%s620_s2] sm:$0xff] %vm197_vm0, %v252_v41  ;;  %v218_v47 = vpop.f32.mrf.mxu3  ;;  %v290_v53 = vmul.f32 %v252_v41, %v252_v41  ;;  %v273_v58 = vsel %vm197_vm0, %v252_v41, 0.0 }
  0xa6   :  { %v215_v43 = vpop.f32.mrf.mxu0  ;;  %v258_v63 = vpop.f32.mrf.mxu2  ;;  %v294_v0 = vsel %vm197_vm0, %v290_v53, 0.0 }
  0xa7   :  { %v234_v44 = vpop.f32.mrf.mxu1 }
  0xa8   :  { %v235_v45 = vadd.f32 %v234_v44, %v215_v43 }
  0xaa   :  { %v254_v46 = vadd.f32 %v253_v42, %v235_v45 }
  0xac   :  { %262 = vst.msk [vmem:[%s620_s2 + $0x8] sm:$0xff] %vm197_vm0, %v254_v46  ;;  %v291_v52 = vmul.f32 %v254_v46, %v254_v46  ;;  %v274_v54 = vsel %vm197_vm0, %v254_v46, 0.0  ;;  %v220_v56 = vpop.f32.mrf.mxu3 }
  0xad   :  { %v275_v62 = vadd.f32 %v274_v54, %v273_v58 }
  0xae   :  { %v295_v59 = vsel %vm197_vm0, %v291_v52, 0.0 }
  0xaf   :  { %v237_v49 = vpop.f32.mrf.mxu1  ;;  %v296_v3 = vadd.f32 %v295_v59, %v294_v0 }
  0xb0   :  { %v238_v50 = vadd.f32 %v237_v49, %v218_v47 }
  0xb2   :  { %v257_v51 = vadd.f32 %v256_v48, %v238_v50 }
  0xb4   :  { %263 = vst.msk [vmem:[%s620_s2 + $0x10] sm:$0xff] %vm197_vm0, %v257_v51  ;;  %v292_v55 = vmul.f32 %v257_v51, %v257_v51  ;;  %v276_v60 = vsel %vm197_vm0, %v257_v51, 0.0 }
  0xb5   :  { %v277_v4 = vadd.f32 %v276_v60, %v275_v62 }
  0xb6   :  { %v297_v1 = vsel %vm197_vm0, %v292_v55, 0.0 }
  0xb7   :  { %v239_v57 = vpop.f32.mrf.mxu1  ;;  %v298_v7 = vadd.f32 %v297_v1, %v296_v3 }
  0xb8   :  { %v240_v61 = vadd.f32 %v239_v57, %v220_v56 }
  0xba   :  { %v259_v2 = vadd.f32 %v258_v63, %v240_v61 }
  0xbc   :  { %264 = vst.msk [vmem:[%s620_s2 + $0x18] sm:$0xff] %vm197_vm0, %v259_v2  ;;  %v278_v5 = vsel %vm197_vm0, %v259_v2, 0.0  ;;  %v293_v6 = vmul.f32 %v259_v2, %v259_v2 }
  0xbd   :  { %v279_v8 = vadd.f32 %v278_v5, %v277_v4 }
  0xbe   :  { %v299_v9 = vsel %vm197_vm0, %v293_v6, 0.0 }
  0xbf   :  { %v280_v10 = vrot.slane %v279_v8, 4  ;;  %v300_v11 = vadd.f32 %v299_v9, %v298_v7 }
  0xc1   :  { %v281_v12 = vadd.f32 %v280_v10, %v279_v8  ;;  %v301_v13 = vrot.slane %v300_v11, 4 }
  0xc3   :  { %v282_v14 = vrot.slane %v281_v12, 2  ;;  %v302_v15 = vadd.f32 %v301_v13, %v300_v11 }
  0xc5   :  { %v283_v16 = vadd.f32 %v282_v14, %v281_v12  ;;  %v303_v17 = vrot.slane %v302_v15, 2 }
  0xc7   :  { %v284_v18 = vrot.slane %v283_v16, 1  ;;  %v304_v19 = vadd.f32 %v303_v17, %v302_v15 }
  0xc9   :  { %v285_v21 = vadd.f32 %v284_v18, %v283_v16  ;;  %v305_v22 = vrot.slane %v304_v19, 1 }
  0xcb   :  { %v286_v24 = vadd.f32 %v285_v21, %v272_v20  ;;  %v306_v25 = vadd.f32 %v305_v22, %v304_v19 }
  0xcd   :  { %288 = vst.msk [vmem:[%s618_s3] sm:$0x1] %vm269_vm1, %v286_v24  ;;  %v307_v26 = vadd.f32 %v306_v25, %v289_v23 }
  0xcf   :  { %308 = vst.msk [vmem:[%s619_s4] sm:$0x1] %vm269_vm1, %v307_v26 }

// kernel: squeeze.59
= control target key start
LH: loop header
LB: loop body
LE: loop exit
PB: predicated region body
PF: predicated region fallthrough
CT: control target
= control target key end

     0   :  { %s37_s8 = smov 80   ;;  %s38_s9 = smov 96   ;;  %vm7_vm0 = vcmask 130048   ;;  %s55_s0 = inlined_call_operand.vmem [shape: f32[64], index: 0, kind: input, shape index: {}]   ;;  %s56_s1 = inlined_call_operand.vmem [shape: f32[4,16], index: 1, kind: output, shape index: {}]  }
   0x1   :  { %v4_v0 = vld [vmem:[%s55_s0] sm:$0x1]  ;;  %s36_s0 = smov 112  }
   0x2   :  { %5 = vst [vmem:[#allocation1] sm:$0x1] %v4_v0 }
   0x9   :  { %v9_v1 = vld [vmem:[#allocation1] sm:$0x1]  }
   0xa   :  { %v21_v2 = vld [vmem:[#allocation1] sm:$0x1]   ;;  %10 = vrot.lane.b32.xlu0 %v9_v1, %s36_s0 }
   0xb   :  { %22 = vrot.lane.b32.xlu1 %v21_v2, %s37_s8  ;;  %v15_v3 = vld [vmem:[#allocation1] sm:$0x1]  }
   0xc   :  { %v6_v4 = vld [vmem:[#allocation1] sm:$0x1]  }
   0xd   :  { %8 = vst.msk [vmem:[#allocation0] sm:$0x1] %vm7_vm0, %v6_v4  }
  0x12   :  { %16 = vrot.lane.b32.xlu0 %v15_v3, %s38_s9 }
  0x7c   :  { %v11_v5 = vpop.permute.xlu0 %10  }
  0x7d   :  { %v23_v6 = vpop.permute.xlu1 %22   ;;  %14 = vst.msk [vmem:[#allocation0 + $0x1] sm:$0x1] %vm7_vm0, %v11_v5  }
  0x7e   :  { %26 = vst.msk [vmem:[#allocation0 + $0x3] sm:$0x1] %vm7_vm0, %v23_v6  }
  0x84   :  { %v17_v7 = vpop.permute.xlu0 %16  }
  0x85   :  { %20 = vst.msk [vmem:[#allocation0 + $0x2] sm:$0x1] %vm7_vm0, %v17_v7  }
  0x8c   :  { %v29_v8 = vld [vmem:[#allocation0] sm:$0xf] }
  0x8d   :  { %32 = vst [vmem:[%s56_s1] sm:$0xf] %v29_v8 }

// kernel: tile.23
= control target key start
LH: loop header
LB: loop body
LE: loop exit
PB: predicated region body
PF: predicated region fallthrough
CT: control target
= control target key end

     0   :  { %s22_s0 = inlined_call_operand.vmem [shape: f32[16], index: 0, kind: input, shape index: {}]   ;;  %s23_s1 = inlined_call_operand.vmem [shape: f32[4,16], index: 1, kind: output, shape index: {}]  }
   0x1   :  { %v4_v0 = vld [vmem:[%s22_s0] ss:$0 sm:$0xff] }
   0x2   :  { %5 = vst [vmem:[%s23_s1] sm:$0xf] %v4_v0 }

// kernel: tile.28
= control target key start
LH: loop header
LB: loop body
LE: loop exit
PB: predicated region body
PF: predicated region fallthrough
CT: control target
= control target key end

     0   :  { %s37_s8 = smov 16   ;;  %s38_s9 = smov 32   ;;  %vm7_vm0 = vcmask 130048   ;;  %vm13_vm1 = vcmask 523648   ;;  %vm19_vm2 = vcmask 392448   ;;  %vm25_vm3 = vcmask 261248   ;;  %s55_s0 = inlined_call_operand.vmem [shape: f32[4,16], index: 0, kind: input, shape index: {}]   ;;  %s56_s1 = inlined_call_operand.vmem [shape: f32[1,64], index: 1, kind: output, shape index: {}]  }
   0x1   :  { %v4_v0 = vld [vmem:[%s55_s0] sm:$0xf]  ;;  %s36_s0 = smov 48  }
   0x2   :  { %5 = vst [vmem:[#allocation1] sm:$0xf] %v4_v0 }
   0x9   :  { %v10_v1 = vld [vmem:[#allocation1 + $0x3] sm:$0x1]   ;;  %v22_v2 = vld [vmem:[#allocation1 + $0x1] sm:$0x1]   ;;  %v16_v3 = vld [vmem:[#allocation1 + $0x2] sm:$0x1]  }
   0xa   :  { %11 = vrot.lane.b32.xlu0 %v10_v1, %s36_s0  ;;  %23 = vrot.lane.b32.xlu1 %v22_v2, %s37_s8  ;;  %v6_v4 = vld [vmem:[#allocation1] sm:$0x1]  }
   0xb   :  { %8 = vst.msk [vmem:[#allocation0] sm:$0x1] %vm7_vm0, %v6_v4  }
  0x12   :  { %17 = vrot.lane.b32.xlu0 %v16_v3, %s38_s9 }
  0x7c   :  { %v12_v5 = vpop.permute.xlu0 %11   ;;  %v24_v6 = vpop.permute.xlu1 %23  }
  0x7d   :  { %14 = vst.msk [vmem:[#allocation0] sm:$0x1] %vm13_vm1, %v12_v5  }
  0x84   :  { %v18_v7 = vpop.permute.xlu0 %17  }
  0x85   :  { %20 = vst.msk [vmem:[#allocation0] sm:$0x1] %vm19_vm2, %v18_v7  }
  0x86   :  { %26 = vst.msk [vmem:[#allocation0] sm:$0x1] %vm25_vm3, %v24_v6  }
  0x8d   :  { %v29_v8 = vld [vmem:[#allocation0] sm:$0x1] }
  0x8e   :  { %32 = vst [vmem:[%s56_s1] sm:$0x1] %v29_v8 }

// kernel: resnet_generator_forward.33
= control target key start
LH: loop header
LB: loop body
LE: loop exit
PB: predicated region body
PF: predicated region fallthrough
CT: control target
= control target key end

     0   :  { %vm122_vm0 = vcmask 516096   ;;  %v233_v10 = vmov 0.0   ;;  %vm113_vm1 = vcmask 523264   ;;  %s335_s1 = inlined_call_operand.vmem [shape: bf16[128,64], index: 1, kind: input, shape index: {}]   ;;  %s336_s0 = inlined_call_operand.vmem [shape: bf16[32,128], index: 0, kind: input, shape index: {}]   ;;  %s337_s3 = inlined_call_operand.vmem [shape: f32[1,64], index: 3, kind: output, shape index: {1}]   ;;  %s338_s4 = inlined_call_operand.vmem [shape: f32[1,64], index: 4, kind: output, shape index: {2}]   ;;  %s339_s2 = inlined_call_operand.vmem [shape: f32[32,64], index: 2, kind: output, shape index: {0}]  }
   0x1   :  { %v223_v0 = vld [vmem:[%s335_s1 + $0x38] sm:$0xff]  ;;  %v222_v1 = vld [vmem:[%s335_s1 + $0x30] sm:$0xff]  ;;  %v221_v2 = vld [vmem:[%s335_s1 + $0x28] sm:$0xff]  ;;  %123 = vst.msk [vmem:[%s337_s3] sm:$0x1] %vm122_vm0, %v233_v10 }
   0x2   :  { %94 = vmatpush.bf16.msra.mxu0 %v223_v0  ;;  %224 = vmatpush.bf16.msra.mxu1 %v223_v0  ;;  %v220_v3 = vld [vmem:[%s335_s1 + $0x20] sm:$0xff]  ;;  %v219_v4 = vld [vmem:[%s335_s1 + $0x18] sm:$0xff]  ;;  %v218_v5 = vld [vmem:[%s335_s1 + $0x10] sm:$0xff]  ;;  %124 = vst.msk [vmem:[%s338_s4] sm:$0x1] %vm122_vm0, %v233_v10 }
   0x3   :  { %v217_v6 = vld [vmem:[%s335_s1 + $0x8] sm:$0xff]  ;;  %v216_v7 = vld [vmem:[%s335_s1] sm:$0xff] }
   0x4   :  { %v214_v8 = vld [vmem:[%s336_s0] sm:$0xff]  ;;  %v215_v9 = vld [vmem:[%s336_s0 + $0x8] sm:$0xff] }
   0x6   :  { %95 = vmatpush.bf16.msra.mxu0 %v222_v1  ;;  %225 = vmatpush.bf16.msra.mxu1 %v222_v1 }
   0x8   :  { %v125_v42 = vld [vmem:[%s337_s3] sm:$0x1] }
   0x9   :  { %v142_v45 = vld [vmem:[%s338_s4] sm:$0x1] }
   0xa   :  { %96 = vmatpush.bf16.msra.mxu0 %v221_v2  ;;  %226 = vmatpush.bf16.msra.mxu1 %v221_v2 }
   0xe   :  { %97 = vmatpush.bf16.msra.mxu0 %v220_v3  ;;  %227 = vmatpush.bf16.msra.mxu1 %v220_v3 }
  0x12   :  { %98 = vmatpush.bf16.msra.mxu0 %v219_v4  ;;  %228 = vmatpush.bf16.msra.mxu1 %v219_v4 }
  0x16   :  { %99 = vmatpush.bf16.msra.mxu0 %v218_v5  ;;  %229 = vmatpush.bf16.msra.mxu1 %v218_v5 }
  0x1a   :  { %100 = vmatpush.bf16.msra.mxu0 %v217_v6  ;;  %230 = vmatpush.bf16.msra.mxu1 %v217_v6 }
  0x1e   :  { %101 = vmatpush.bf16.msra.mxu0 %v216_v7  ;;  %231 = vmatpush.bf16.msra.mxu1 %v216_v7 }
  0x21   :  { %102 = vmatmul.bf16.vlgmr.msra.gmra.mxu0 %v214_v8  ;;  %107 = vmatmul.bf16.vlgmr.msra.gmra.mxu1 %v215_v9 }
  0x9e   :  { %v103_v11 = vpop.f32.mrf.mxu0  ;;  %v108_v12 = vpop.f32.mrf.mxu1 }
  0x9f   :  { %114 = vst.msk [vmem:[%s339_s2] sm:$0xff] %vm113_vm1, %v103_v11  ;;  %v143_v13 = vmul.f32 %v103_v11, %v103_v11  ;;  %v126_v16 = vsel %vm113_vm1, %v103_v11, 0.0  ;;  %v145_v17 = vmul.f32 %v108_v12, %v108_v12  ;;  %v129_v22 = vsel %vm113_vm1, %v108_v12, 0.0 }
  0xa0   :  { %116 = vst.msk [vmem:[%s339_s2 + $0x10] sm:$0xff] %vm113_vm1, %v108_v12 }
  0xa1   :  { %v147_v21 = vsel %vm113_vm1, %v143_v13, 0.0  ;;  %v150_v27 = vsel %vm113_vm1, %v145_v17, 0.0 }
  0xa6   :  { %v105_v14 = vpop.f32.mrf.mxu0  ;;  %v110_v15 = vpop.f32.mrf.mxu1 }
  0xa7   :  { %115 = vst.msk [vmem:[%s339_s2 + $0x8] sm:$0xff] %vm113_vm1, %v105_v14  ;;  %v127_v18 = vsel %vm113_vm1, %v105_v14, 0.0  ;;  %v144_v19 = vmul.f32 %v105_v14, %v105_v14  ;;  %v146_v24 = vmul.f32 %v110_v15, %v110_v15  ;;  %v131_v28 = vsel %vm113_vm1, %v110_v15, 0.0 }
  0xa8   :  { %v128_v20 = vadd.f32 %v127_v18, %v126_v16  ;;  %117 = vst.msk [vmem:[%s339_s2 + $0x18] sm:$0xff] %vm113_vm1, %v110_v15 }
  0xa9   :  { %v148_v23 = vsel %vm113_vm1, %v144_v19, 0.0  ;;  %v152_v31 = vsel %vm113_vm1, %v146_v24, 0.0 }
  0xaa   :  { %v149_v25 = vadd.f32 %v148_v23, %v147_v21  ;;  %v130_v26 = vadd.f32 %v129_v22, %v128_v20 }
  0xac   :  { %v132_v29 = vadd.f32 %v131_v28, %v130_v26  ;;  %v151_v30 = vadd.f32 %v150_v27, %v149_v25 }
  0xae   :  { %v133_v32 = vrot.slane %v132_v29, 4  ;;  %v153_v33 = vadd.f32 %v152_v31, %v151_v30 }
  0xb0   :  { %v134_v34 = vadd.f32 %v133_v32, %v132_v29  ;;  %v154_v35 = vrot.slane %v153_v33, 4 }
  0xb2   :  { %v135_v36 = vrot.slane %v134_v34, 2  ;;  %v155_v37 = vadd.f32 %v154_v35, %v153_v33 }
  0xb4   :  { %v136_v38 = vadd.f32 %v135_v36, %v134_v34  ;;  %v156_v39 = vrot.slane %v155_v37, 2 }
  0xb6   :  { %v137_v40 = vrot.slane %v136_v38, 1  ;;  %v157_v41 = vadd.f32 %v156_v39, %v155_v37 }
  0xb8   :  { %v138_v43 = vadd.f32 %v137_v40, %v136_v38  ;;  %v158_v44 = vrot.slane %v157_v41, 1 }
  0xba   :  { %v139_v46 = vadd.f32 %v138_v43, %v125_v42  ;;  %v159_v47 = vadd.f32 %v158_v44, %v157_v41 }
  0xbc   :  { %141 = vst.msk [vmem:[%s337_s3] sm:$0x1] %vm122_vm0, %v139_v46  ;;  %v160_v48 = vadd.f32 %v159_v47, %v142_v45 }
  0xbe   :  { %161 = vst.msk [vmem:[%s338_s4] sm:$0x1] %vm122_vm0, %v160_v48 }

// kernel: resnet_generator_forward.34
= control target key start
LH: loop header
LB: loop body
LE: loop exit
PB: predicated region body
PF: predicated region fallthrough
CT: control target
= control target key end

     0   :  { %vm38_vm0 = vcmask 523264   ;;  %s99_s0 = inlined_call_operand.vmem [shape: f32[32,64], index: 0, kind: input, shape index: {}]   ;;  %s100_s1 = inlined_call_operand.vmem [shape: f32[1,64], index: 1, kind: input, shape index: {}]   ;;  %s101_s2 = inlined_call_operand.vmem [shape: f32[1,64], index: 2, kind: input, shape index: {}]   ;;  %s102_s3 = inlined_call_operand.vmem [shape: f32[32,64], index: 3, kind: output, shape index: {}]  }
   0x1   :  { %v14_v0 = vld [vmem:[%s99_s0] sm:$0xff]  ;;  %v15_v3 = vld [vmem:[%s99_s0 + $0x8] sm:$0xff]  ;;  %v16_v6 = vld [vmem:[%s99_s0 + $0x10] sm:$0xff] }
   0x2   :  { %v47_v1 = vld [vmem:[%s100_s1] ss:$0 sm:$0xff]  ;;  %v17_v7 = vld [vmem:[%s99_s0 + $0x18] sm:$0xff] }
   0x3   :  { %v48_v2 = vld [vmem:[%s101_s2] ss:$0 sm:$0xff]  ;;  %v22_v4 = vmul.f32 %v47_v1, %v14_v0  ;;  %v23_v5 = vmul.f32 %v47_v1, %v15_v3  ;;  %v24_v8 = vmul.f32 %v47_v1, %v16_v6  ;;  %v25_v9 = vmul.f32 %v47_v1, %v17_v7 }
   0x5   :  { %v30_v10 = vadd.f32 %v48_v2, %v22_v4  ;;  %v31_v11 = vadd.f32 %v48_v2, %v23_v5  ;;  %v32_v12 = vadd.f32 %v48_v2, %v24_v8  ;;  %v33_v13 = vadd.f32 %v48_v2, %v25_v9 }
   0x7   :  { %v34_v14 = vmax.f32 %v30_v10, 0.0  ;;  %v35_v15 = vmax.f32 %v31_v11, 0.0  ;;  %v36_v16 = vmax.f32 %v32_v12, 0.0  ;;  %v37_v17 = vmax.f32 %v33_v13, 0.0 }
   0x9   :  { %39 = vst.msk [vmem:[%s102_s3] sm:$0xff] %vm38_vm0, %v34_v14 }
   0xa   :  { %40 = vst.msk [vmem:[%s102_s3 + $0x8] sm:$0xff] %vm38_vm0, %v35_v15 }
   0xb   :  { %41 = vst.msk [vmem:[%s102_s3 + $0x10] sm:$0xff] %vm38_vm0, %v36_v16 }
   0xc   :  { %42 = vst.msk [vmem:[%s102_s3 + $0x18] sm:$0xff] %vm38_vm0, %v37_v17 }

// kernel: squeeze.71
= control target key start
LH: loop header
LB: loop body
LE: loop exit
PB: predicated region body
PF: predicated region fallthrough
CT: control target
= control target key end

     0   :  { %s37_s8 = smov 104   ;;  %s38_s9 = smov 112   ;;  %vm7_vm0 = vcmask 64512   ;;  %s55_s0 = inlined_call_operand.vmem [shape: f32[32], index: 0, kind: input, shape index: {}]   ;;  %s56_s1 = inlined_call_operand.vmem [shape: f32[4,8], index: 1, kind: output, shape index: {}]  }
   0x1   :  { %v4_v0 = vld [vmem:[%s55_s0] sm:$0x1]  ;;  %s36_s0 = smov 120  }
   0x2   :  { %5 = vst [vmem:[#allocation1] sm:$0x1] %v4_v0 }
   0x9   :  { %v9_v1 = vld [vmem:[#allocation1] sm:$0x1]  }
   0xa   :  { %v21_v2 = vld [vmem:[#allocation1] sm:$0x1]   ;;  %10 = vrot.lane.b32.xlu0 %v9_v1, %s36_s0 }
   0xb   :  { %22 = vrot.lane.b32.xlu1 %v21_v2, %s37_s8  ;;  %v15_v3 = vld [vmem:[#allocation1] sm:$0x1]  }
   0xc   :  { %v6_v4 = vld [vmem:[#allocation1] sm:$0x1]  }
   0xd   :  { %8 = vst.msk [vmem:[#allocation0] sm:$0x1] %vm7_vm0, %v6_v4  }
  0x12   :  { %16 = vrot.lane.b32.xlu0 %v15_v3, %s38_s9 }
  0x7c   :  { %v11_v5 = vpop.permute.xlu0 %10  }
  0x7d   :  { %v23_v6 = vpop.permute.xlu1 %22   ;;  %14 = vst.msk [vmem:[#allocation0 + $0x1] sm:$0x1] %vm7_vm0, %v11_v5  }
  0x7e   :  { %26 = vst.msk [vmem:[#allocation0 + $0x3] sm:$0x1] %vm7_vm0, %v23_v6  }
  0x84   :  { %v17_v7 = vpop.permute.xlu0 %16  }
  0x85   :  { %20 = vst.msk [vmem:[#allocation0 + $0x2] sm:$0x1] %vm7_vm0, %v17_v7  }
  0x8c   :  { %v29_v8 = vld [vmem:[#allocation0] sm:$0xf] }
  0x8d   :  { %32 = vst [vmem:[%s56_s1] sm:$0xf] %v29_v8 }

// kernel: tile.33
= control target key start
LH: loop header
LB: loop body
LE: loop exit
PB: predicated region body
PF: predicated region fallthrough
CT: control target
= control target key end

     0   :  { %s22_s0 = inlined_call_operand.vmem [shape: f32[8], index: 0, kind: input, shape index: {}]   ;;  %s23_s1 = inlined_call_operand.vmem [shape: f32[4,8], index: 1, kind: output, shape index: {}]  }
   0x1   :  { %v4_v0 = vld [vmem:[%s22_s0] ss:$0 sm:$0xff] }
   0x2   :  { %5 = vst [vmem:[%s23_s1] sm:$0xf] %v4_v0 }

// kernel: tile.38
= control target key start
LH: loop header
LB: loop body
LE: loop exit
PB: predicated region body
PF: predicated region fallthrough
CT: control target
= control target key end

     0   :  { %s37_s8 = smov 8   ;;  %s38_s9 = smov 16   ;;  %vm7_vm0 = vcmask 64512   ;;  %vm13_vm1 = vcmask 261312   ;;  %vm19_vm2 = vcmask 195712   ;;  %vm25_vm3 = vcmask 130112   ;;  %s55_s0 = inlined_call_operand.vmem [shape: f32[4,8], index: 0, kind: input, shape index: {}]   ;;  %s56_s1 = inlined_call_operand.vmem [shape: f32[1,32], index: 1, kind: output, shape index: {}]  }
   0x1   :  { %v4_v0 = vld [vmem:[%s55_s0] sm:$0xf]  ;;  %s36_s0 = smov 24  }
   0x2   :  { %5 = vst [vmem:[#allocation1] sm:$0xf] %v4_v0 }
   0x9   :  { %v10_v1 = vld [vmem:[#allocation1 + $0x3] sm:$0x1]   ;;  %v22_v2 = vld [vmem:[#allocation1 + $0x1] sm:$0x1]   ;;  %v16_v3 = vld [vmem:[#allocation1 + $0x2] sm:$0x1]  }
   0xa   :  { %11 = vrot.lane.b32.xlu0 %v10_v1, %s36_s0  ;;  %23 = vrot.lane.b32.xlu1 %v22_v2, %s37_s8  ;;  %v6_v4 = vld [vmem:[#allocation1] sm:$0x1]  }
   0xb   :  { %8 = vst.msk [vmem:[#allocation0] sm:$0x1] %vm7_vm0, %v6_v4  }
  0x12   :  { %17 = vrot.lane.b32.xlu0 %v16_v3, %s38_s9 }
  0x7c   :  { %v12_v5 = vpop.permute.xlu0 %11   ;;  %v24_v6 = vpop.permute.xlu1 %23  }
  0x7d   :  { %14 = vst.msk [vmem:[#allocation0] sm:$0x1] %vm13_vm1, %v12_v5  }
  0x84   :  { %v18_v7 = vpop.permute.xlu0 %17  }
  0x85   :  { %20 = vst.msk [vmem:[#allocation0] sm:$0x1] %vm19_vm2, %v18_v7  }
  0x86   :  { %26 = vst.msk [vmem:[#allocation0] sm:$0x1] %vm25_vm3, %v24_v6  }
  0x8d   :  { %v29_v8 = vld [vmem:[#allocation0] sm:$0x1] }
  0x8e   :  { %32 = vst [vmem:[%s56_s1] sm:$0x1] %v29_v8 }

// kernel: resnet_generator_forward.36
= control target key start
LH: loop header
LB: loop body
LE: loop exit
PB: predicated region body
PF: predicated region fallthrough
CT: control target
= control target key end

     0   :  { %vm86_vm0 = vcmask 261120   ;;  %s265_s0 = inlined_call_operand.vmem [shape: f32[128,32], index: 0, kind: input, shape index: {}]   ;;  %s266_s1 = inlined_call_operand.vmem [shape: f32[1,32], index: 1, kind: input, shape index: {}]   ;;  %s267_s2 = inlined_call_operand.vmem [shape: f32[1,32], index: 2, kind: input, shape index: {}]   ;;  %s268_s3 = inlined_call_operand.vmem [shape: f32[128,32], index: 3, kind: output, shape index: {}]  }
   0x1   :  { %v14_v0 = vld [vmem:[%s265_s0] sm:$0xff]  ;;  %v15_v3 = vld [vmem:[%s265_s0 + $0x8] sm:$0xff]  ;;  %v16_v6 = vld [vmem:[%s265_s0 + $0x10] sm:$0xff] }
   0x2   :  { %v107_v1 = vld [vmem:[%s266_s1] ss:$0 sm:$0xff]  ;;  %v17_v7 = vld [vmem:[%s265_s0 + $0x18] sm:$0xff]  ;;  %v19_v12 = vld [vmem:[%s265_s0 + $0x28] sm:$0xff] }
   0x3   :  { %v138_v2 = vld [vmem:[%s267_s2] ss:$0 sm:$0xff]  ;;  %v34_v4 = vmul.f32 %v107_v1, %v14_v0  ;;  %v35_v5 = vmul.f32 %v107_v1, %v15_v3  ;;  %v36_v9 = vmul.f32 %v107_v1, %v16_v6  ;;  %v37_v10 = vmul.f32 %v107_v1, %v17_v7  ;;  %v20_v13 = vld [vmem:[%s265_s0 + $0x30] sm:$0xff]  ;;  %v21_v14 = vld [vmem:[%s265_s0 + $0x38] sm:$0xff] }
   0x4   :  { %v18_v8 = vld [vmem:[%s265_s0 + $0x20] sm:$0xff]  ;;  %v39_v17 = vmul.f32 %v107_v1, %v19_v12  ;;  %v40_v18 = vmul.f32 %v107_v1, %v20_v13  ;;  %v41_v22 = vmul.f32 %v107_v1, %v21_v14  ;;  %v23_v24 = vld [vmem:[%s265_s0 + $0x48] sm:$0xff]  ;;  %v24_v29 = vld [vmem:[%s265_s0 + $0x50] sm:$0xff] }
   0x5   :  { %v38_v11 = vmul.f32 %v107_v1, %v18_v8  ;;  %v54_v15 = vadd.f32 %v138_v2, %v34_v4  ;;  %v55_v16 = vadd.f32 %v138_v2, %v35_v5  ;;  %v56_v19 = vadd.f32 %v138_v2, %v36_v9  ;;  %v22_v23 = vld [vmem:[%s265_s0 + $0x40] sm:$0xff]  ;;  %v25_v30 = vld [vmem:[%s265_s0 + $0x58] sm:$0xff]  ;;  %v27_v35 = vld [vmem:[%s265_s0 + $0x68] sm:$0xff] }
   0x6   :  { %v57_v20 = vadd.f32 %v138_v2, %v37_v10  ;;  %v59_v27 = vadd.f32 %v138_v2, %v39_v17  ;;  %v60_v28 = vadd.f32 %v138_v2, %v40_v18  ;;  %v26_v31 = vld [vmem:[%s265_s0 + $0x60] sm:$0xff]  ;;  %v61_v34 = vadd.f32 %v138_v2, %v41_v22  ;;  %v28_v36 = vld [vmem:[%s265_s0 + $0x70] sm:$0xff]  ;;  %v29_v41 = vld [vmem:[%s265_s0 + $0x78] sm:$0xff] }
   0x7   :  { %v58_v21 = vadd.f32 %v138_v2, %v38_v11  ;;  %v70_v25 = vmax.f32 %v54_v15, 0.0  ;;  %v71_v26 = vmax.f32 %v55_v16, 0.0  ;;  %v72_v32 = vmax.f32 %v56_v19, 0.0 }
   0x8   :  { %v73_v33 = vmax.f32 %v57_v20, 0.0  ;;  %v75_v38 = vmax.f32 %v59_v27, 0.0  ;;  %v42_v39 = vmul.f32 %v107_v1, %v22_v23  ;;  %v43_v40 = vmul.f32 %v107_v1, %v23_v24 }
   0x9   :  { %87 = vst.msk [vmem:[%s268_s3] sm:$0xff] %vm86_vm0, %v70_v25  ;;  %v74_v37 = vmax.f32 %v58_v21, 0.0  ;;  %v76_v42 = vmax.f32 %v60_v28, 0.0  ;;  %v44_v43 = vmul.f32 %v107_v1, %v24_v29  ;;  %v45_v44 = vmul.f32 %v107_v1, %v25_v30 }
   0xa   :  { %88 = vst.msk [vmem:[%s268_s3 + $0x8] sm:$0xff] %vm86_vm0, %v71_v26  ;;  %v46_v45 = vmul.f32 %v107_v1, %v26_v31  ;;  %v62_v46 = vadd.f32 %v138_v2, %v42_v39  ;;  %v63_v47 = vadd.f32 %v138_v2, %v43_v40  ;;  %v47_v48 = vmul.f32 %v107_v1, %v27_v35 }
   0xb   :  { %89 = vst.msk [vmem:[%s268_s3 + $0x10] sm:$0xff] %vm86_vm0, %v72_v32  ;;  %v48_v49 = vmul.f32 %v107_v1, %v28_v36  ;;  %v77_v50 = vmax.f32 %v61_v34, 0.0  ;;  %v64_v51 = vadd.f32 %v138_v2, %v44_v43  ;;  %v65_v52 = vadd.f32 %v138_v2, %v45_v44 }
   0xc   :  { %90 = vst.msk [vmem:[%s268_s3 + $0x18] sm:$0xff] %vm86_vm0, %v73_v33  ;;  %v49_v53 = vmul.f32 %v107_v1, %v29_v41  ;;  %v78_v54 = vmax.f32 %v62_v46, 0.0  ;;  %v66_v55 = vadd.f32 %v138_v2, %v46_v45  ;;  %v79_v56 = vmax.f32 %v63_v47, 0.0 }
   0xd   :  { %91 = vst.msk [vmem:[%s268_s3 + $0x20] sm:$0xff] %vm86_vm0, %v74_v37  ;;  %v67_v57 = vadd.f32 %v138_v2, %v47_v48  ;;  %v80_v58 = vmax.f32 %v64_v51, 0.0  ;;  %v68_v59 = vadd.f32 %v138_v2, %v48_v49  ;;  %v81_v60 = vmax.f32 %v65_v52, 0.0 }
   0xe   :  { %92 = vst.msk [vmem:[%s268_s3 + $0x28] sm:$0xff] %vm86_vm0, %v75_v38  ;;  %v69_v61 = vadd.f32 %v138_v2, %v49_v53  ;;  %v82_v62 = vmax.f32 %v66_v55, 0.0 }
   0xf   :  { %93 = vst.msk [vmem:[%s268_s3 + $0x30] sm:$0xff] %vm86_vm0, %v76_v42  ;;  %v83_v63 = vmax.f32 %v67_v57, 0.0  ;;  %v84_v0 = vmax.f32 %v68_v59, 0.0 }
  0x10   :  { %94 = vst.msk [vmem:[%s268_s3 + $0x38] sm:$0xff] %vm86_vm0, %v77_v50  ;;  %v85_v1 = vmax.f32 %v69_v61, 0.0 }
  0x11   :  { %95 = vst.msk [vmem:[%s268_s3 + $0x40] sm:$0xff] %vm86_vm0, %v78_v54 }
  0x12   :  { %96 = vst.msk [vmem:[%s268_s3 + $0x48] sm:$0xff] %vm86_vm0, %v79_v56 }
  0x13   :  { %97 = vst.msk [vmem:[%s268_s3 + $0x50] sm:$0xff] %vm86_vm0, %v80_v58 }
  0x14   :  { %98 = vst.msk [vmem:[%s268_s3 + $0x58] sm:$0xff] %vm86_vm0, %v81_v60 }
  0x15   :  { %99 = vst.msk [vmem:[%s268_s3 + $0x60] sm:$0xff] %vm86_vm0, %v82_v62 }
  0x16   :  { %100 = vst.msk [vmem:[%s268_s3 + $0x68] sm:$0xff] %vm86_vm0, %v83_v63 }
  0x17   :  { %101 = vst.msk [vmem:[%s268_s3 + $0x70] sm:$0xff] %vm86_vm0, %v84_v0 }
  0x18   :  { %102 = vst.msk [vmem:[%s268_s3 + $0x78] sm:$0xff] %vm86_vm0, %v85_v1 }

// kernel: resnet_generator_forward.35
= control target key start
LH: loop header
LB: loop body
LE: loop exit
PB: predicated region body
PF: predicated region fallthrough
CT: control target
= control target key end

     0   :  { %vm103_vm0 = vcmask 523264   ;;  %vm177_vm1 = vcmask 261120   ;;  %vm198_vm2 = vcmask 253952   ;;  %v391_v26 = vmov 0.0   ;;  %s609_s1 = inlined_call_operand.vmem [shape: bf16[64,32], index: 1, kind: input, shape index: {}]   ;;  %s610_s0 = inlined_call_operand.vmem [shape: bf16[128,64], index: 0, kind: input, shape index: {}]   ;;  %s611_s2 = inlined_call_operand.vmem [shape: f32[128,32], index: 2, kind: output, shape index: {0}]   ;;  %s612_s3 = inlined_call_operand.vmem [shape: f32[1,32], index: 3, kind: output, shape index: {1}]   ;;  %s613_s4 = inlined_call_operand.vmem [shape: f32[1,32], index: 4, kind: output, shape index: {2}]  }
   0x1   :  { %v377_v0 = vld [vmem:[%s609_s1 + $0x18] sm:$0xff]  ;;  %v376_v1 = vld [vmem:[%s609_s1 + $0x10] sm:$0xff]  ;;  %v375_v2 = vld [vmem:[%s609_s1 + $0x8] sm:$0xff]  ;;  %199 = vst.msk [vmem:[%s612_s3] sm:$0x1] %vm198_vm2, %v391_v26 }
   0x2   :  { %132 = vmatpush.bf16.msra.mxu0 %v377_v0  ;;  %378 = vmatpush.bf16.msra.mxu1 %v377_v0  ;;  %v374_v3 = vld [vmem:[%s609_s1] sm:$0xff]  ;;  %v368_v5 = vld [vmem:[%s610_s0 + $0x10] sm:$0xff]  ;;  %v367_v8 = vld [vmem:[%s610_s0 + $0x8] sm:$0xff]  ;;  %200 = vst.msk [vmem:[%s613_s4] sm:$0x1] %vm198_vm2, %v391_v26 }
   0x3   :  { %379 = vmatpush.bf16.msra.mxu2 %v377_v0  ;;  %380 = vmatpush.bf16.msra.mxu3 %v377_v0  ;;  %v366_v4 = vld [vmem:[%s610_s0] sm:$0xff]  ;;  %v372_v7 = vld [vmem:[%s610_s0 + $0x30] sm:$0xff]  ;;  %v369_v9 = vld [vmem:[%s610_s0 + $0x18] sm:$0xff] }
   0x4   :  { %v370_v6 = vld [vmem:[%s610_s0 + $0x20] sm:$0xff]  ;;  %v371_v10 = vld [vmem:[%s610_s0 + $0x28] sm:$0xff]  ;;  %v373_v11 = vld [vmem:[%s610_s0 + $0x38] sm:$0xff] }
   0x6   :  { %133 = vmatpush.bf16.msra.mxu0 %v376_v1  ;;  %381 = vmatpush.bf16.msra.mxu1 %v376_v1 }
   0x7   :  { %382 = vmatpush.bf16.msra.mxu2 %v376_v1  ;;  %383 = vmatpush.bf16.msra.mxu3 %v376_v1 }
   0xa   :  { %134 = vmatpush.bf16.msra.mxu0 %v375_v2  ;;  %384 = vmatpush.bf16.msra.mxu1 %v375_v2 }
   0xb   :  { %385 = vmatpush.bf16.msra.mxu2 %v375_v2  ;;  %386 = vmatpush.bf16.msra.mxu3 %v375_v2 }
   0xe   :  { %135 = vmatpush.bf16.msra.mxu0 %v374_v3  ;;  %387 = vmatpush.bf16.msra.mxu1 %v374_v3 }
   0xf   :  { %388 = vmatpush.bf16.msra.mxu2 %v374_v3  ;;  %389 = vmatpush.bf16.msra.mxu3 %v374_v3 }
  0x11   :  { %358 = vmatmul.msk.bf16.vlgmr.msra.gmra.mxu0 %vm103_vm0, %v366_v4  ;;  %360 = vmatmul.msk.bf16.vlgmr.msra.gmra.mxu1 %vm103_vm0, %v368_v5 }
  0x12   :  { %362 = vmatmul.msk.bf16.vlgmr.msra.gmra.mxu2 %vm103_vm0, %v370_v6  ;;  %364 = vmatmul.msk.bf16.vlgmr.msra.gmra.mxu3 %vm103_vm0, %v372_v7 }
  0x21   :  { %359 = vmatmul.msk.bf16.gmra.mxu0 %vm103_vm0, %v367_v8  ;;  %361 = vmatmul.msk.bf16.gmra.mxu1 %vm103_vm0, %v369_v9 }
  0x22   :  { %363 = vmatmul.msk.bf16.gmra.mxu2 %vm103_vm0, %v371_v10  ;;  %365 = vmatmul.msk.bf16.gmra.mxu3 %vm103_vm0, %v373_v11 }
  0x8e   :  { %v137_v12 = vpop.f32.mrf.mxu0  ;;  %v147_v13 = vpop.f32.mrf.mxu1 }
  0x8f   :  { %178 = vst.msk [vmem:[%s611_s2] sm:$0xff] %vm177_vm1, %v137_v12  ;;  %v243_v23 = vmul.f32 %v137_v12, %v137_v12  ;;  %v202_v27 = vsel %vm177_vm1, %v137_v12, 0.0  ;;  %v247_v39 = vmul.f32 %v147_v13, %v147_v13  ;;  %v209_v44 = vsel %vm177_vm1, %v147_v13, 0.0 }
  0x90   :  { %182 = vst.msk [vmem:[%s611_s2 + $0x20] sm:$0xff] %vm177_vm1, %v147_v13 }
  0x91   :  { %v259_v31 = vsel %vm177_vm1, %v243_v23, 0.0  ;;  %v266_v49 = vsel %vm177_vm1, %v247_v39, 0.0 }
  0x95   :  { %v469_v14 = vpop.f32.mrf.mxu2  ;;  %v471_v15 = vpop.f32.mrf.mxu3 }
  0x96   :  { %v139_v16 = vpop.f32.mrf.mxu0  ;;  %v149_v17 = vpop.f32.mrf.mxu1  ;;  %186 = vst.msk [vmem:[%s611_s2 + $0x40] sm:$0xff] %vm177_vm1, %v469_v14  ;;  %v251_v61 = vmul.f32 %v469_v14, %v469_v14  ;;  %v217_v2 = vsel %vm177_vm1, %v469_v14, 0.0 }
  0x97   :  { %179 = vst.msk [vmem:[%s611_s2 + $0x8] sm:$0xff] %vm177_vm1, %v139_v16  ;;  %v244_v22 = vmul.f32 %v139_v16, %v139_v16  ;;  %v203_v24 = vsel %vm177_vm1, %v139_v16, 0.0  ;;  %v248_v45 = vmul.f32 %v149_v17, %v149_v17  ;;  %v211_v50 = vsel %vm177_vm1, %v149_v17, 0.0 }
  0x98   :  { %183 = vst.msk [vmem:[%s611_s2 + $0x28] sm:$0xff] %vm177_vm1, %v149_v17  ;;  %v204_v30 = vadd.f32 %v203_v24, %v202_v27  ;;  %v274_v7 = vsel %vm177_vm1, %v251_v61, 0.0 }
  0x99   :  { %190 = vst.msk [vmem:[%s611_s2 + $0x60] sm:$0xff] %vm177_vm1, %v471_v15  ;;  %v260_v28 = vsel %vm177_vm1, %v244_v22, 0.0  ;;  %v268_v54 = vsel %vm177_vm1, %v248_v45, 0.0 }
  0x9a   :  { %v261_v35 = vadd.f32 %v260_v28, %v259_v31 }
  0x9d   :  { %v491_v18 = vpop.f32.mrf.mxu2  ;;  %v493_v19 = vpop.f32.mrf.mxu3 }
  0x9e   :  { %v142_v20 = vpop.f32.mrf.mxu0  ;;  %v152_v21 = vpop.f32.mrf.mxu1  ;;  %187 = vst.msk [vmem:[%s611_s2 + $0x48] sm:$0xff] %vm177_vm1, %v491_v18  ;;  %v252_v3 = vmul.f32 %v491_v18, %v491_v18  ;;  %v219_v8 = vsel %vm177_vm1, %v491_v18, 0.0  ;;  %v225_v18 = vsel %vm177_vm1, %v471_v15, 0.0 }
  0x9f   :  { %180 = vst.msk [vmem:[%s611_s2 + $0x10] sm:$0xff] %vm177_vm1, %v142_v20  ;;  %v245_v25 = vmul.f32 %v142_v20, %v142_v20  ;;  %v205_v29 = vsel %vm177_vm1, %v142_v20, 0.0  ;;  %v249_v51 = vmul.f32 %v152_v21, %v152_v21  ;;  %v213_v55 = vsel %vm177_vm1, %v152_v21, 0.0 }
  0xa0   :  { %184 = vst.msk [vmem:[%s611_s2 + $0x30] sm:$0xff] %vm177_vm1, %v152_v21  ;;  %v206_v36 = vadd.f32 %v205_v29, %v204_v30  ;;  %v276_v12 = vsel %vm177_vm1, %v252_v3, 0.0  ;;  %v255_v20 = vmul.f32 %v471_v15, %v471_v15  ;;  %v227_v30 = vsel %vm177_vm1, %v493_v19, 0.0 }
  0xa1   :  { %191 = vst.msk [vmem:[%s611_s2 + $0x68] sm:$0xff] %vm177_vm1, %v493_v19  ;;  %v262_v32 = vsel %vm177_vm1, %v245_v25, 0.0  ;;  %v270_v62 = vsel %vm177_vm1, %v249_v51, 0.0  ;;  %v256_v25 = vmul.f32 %v493_v19, %v493_v19 }
  0xa2   :  { %v263_v42 = vadd.f32 %v262_v32, %v261_v35  ;;  %v282_v29 = vsel %vm177_vm1, %v255_v20, 0.0 }
  0xa3   :  { %v284_v35 = vsel %vm177_vm1, %v256_v25, 0.0 }
  0xa5   :  { %v162_v33 = vpop.f32.mrf.mxu2  ;;  %v527_v34 = vpop.f32.mrf.mxu3 }
  0xa6   :  { %v144_v37 = vpop.f32.mrf.mxu0  ;;  %v154_v38 = vpop.f32.mrf.mxu1  ;;  %188 = vst.msk [vmem:[%s611_s2 + $0x50] sm:$0xff] %vm177_vm1, %v162_v33  ;;  %v253_v9 = vmul.f32 %v162_v33, %v162_v33  ;;  %v221_v13 = vsel %vm177_vm1, %v162_v33, 0.0  ;;  %v257_v31 = vmul.f32 %v527_v34, %v527_v34  ;;  %v229_v15 = vsel %vm177_vm1, %v527_v34, 0.0 }
  0xa7   :  { %181 = vst.msk [vmem:[%s611_s2 + $0x18] sm:$0xff] %vm177_vm1, %v144_v37  ;;  %v207_v40 = vsel %vm177_vm1, %v144_v37, 0.0  ;;  %v246_v41 = vmul.f32 %v144_v37, %v144_v37  ;;  %v250_v56 = vmul.f32 %v154_v38, %v154_v38  ;;  %v215_v63 = vsel %vm177_vm1, %v154_v38, 0.0 }
  0xa8   :  { %v208_v43 = vadd.f32 %v207_v40, %v206_v36  ;;  %185 = vst.msk [vmem:[%s611_s2 + $0x38] sm:$0xff] %vm177_vm1, %v154_v38  ;;  %v278_v21 = vsel %vm177_vm1, %v253_v9, 0.0  ;;  %v286_v39 = vsel %vm177_vm1, %v257_v31, 0.0 }
  0xa9   :  { %v264_v46 = vsel %vm177_vm1, %v246_v41, 0.0  ;;  %192 = vst.msk [vmem:[%s611_s2 + $0x70] sm:$0xff] %vm177_vm1, %v527_v34  ;;  %v272_v4 = vsel %vm177_vm1, %v250_v56, 0.0 }
  0xaa   :  { %v210_v47 = vadd.f32 %v209_v44, %v208_v43  ;;  %v265_v48 = vadd.f32 %v264_v46, %v263_v42 }
  0xac   :  { %v267_v52 = vadd.f32 %v266_v49, %v265_v48  ;;  %v212_v53 = vadd.f32 %v211_v50, %v210_v47 }
  0xad   :  { %v164_v57 = vpop.f32.mrf.mxu2  ;;  %v174_v58 = vpop.f32.mrf.mxu3 }
  0xae   :  { %v214_v59 = vadd.f32 %v213_v55, %v212_v53  ;;  %v269_v60 = vadd.f32 %v268_v54, %v267_v52  ;;  %189 = vst.msk [vmem:[%s611_s2 + $0x58] sm:$0xff] %vm177_vm1, %v164_v57  ;;  %v254_v14 = vmul.f32 %v164_v57, %v164_v57  ;;  %v223_v22 = vsel %vm177_vm1, %v164_v57, 0.0  ;;  %v201_v52 = vld [vmem:[%s612_s3] sm:$0x1] }
  0xaf   :  { %193 = vst.msk [vmem:[%s611_s2 + $0x78] sm:$0xff] %vm177_vm1, %v174_v58  ;;  %v258_v36 = vmul.f32 %v174_v58, %v174_v58  ;;  %v231_v40 = vsel %vm177_vm1, %v174_v58, 0.0  ;;  %v242_v55 = vld [vmem:[%s613_s4] sm:$0x1] }
  0xb0   :  { %v216_v0 = vadd.f32 %v215_v63, %v214_v59  ;;  %v271_v1 = vadd.f32 %v270_v62, %v269_v60  ;;  %v280_v26 = vsel %vm177_vm1, %v254_v14, 0.0 }
  0xb1   :  { %v288_v19 = vsel %vm177_vm1, %v258_v36, 0.0 }
  0xb2   :  { %v218_v5 = vadd.f32 %v217_v2, %v216_v0  ;;  %v273_v6 = vadd.f32 %v272_v4, %v271_v1 }
  0xb4   :  { %v275_v10 = vadd.f32 %v274_v7, %v273_v6  ;;  %v220_v11 = vadd.f32 %v219_v8, %v218_v5 }
  0xb6   :  { %v222_v16 = vadd.f32 %v221_v13, %v220_v11  ;;  %v277_v17 = vadd.f32 %v276_v12, %v275_v10 }
  0xb8   :  { %v279_v23 = vadd.f32 %v278_v21, %v277_v17  ;;  %v224_v24 = vadd.f32 %v223_v22, %v222_v16 }
  0xba   :  { %v226_v27 = vadd.f32 %v225_v18, %v224_v24  ;;  %v281_v28 = vadd.f32 %v280_v26, %v279_v23 }
  0xbc   :  { %v283_v32 = vadd.f32 %v282_v29, %v281_v28  ;;  %v228_v33 = vadd.f32 %v227_v30, %v226_v27 }
  0xbe   :  { %v230_v37 = vadd.f32 %v229_v15, %v228_v33  ;;  %v285_v38 = vadd.f32 %v284_v35, %v283_v32 }
  0xc0   :  { %v287_v41 = vadd.f32 %v286_v39, %v285_v38  ;;  %v232_v42 = vadd.f32 %v231_v40, %v230_v37 }
  0xc2   :  { %v233_v43 = vrot.slane %v232_v42, 4  ;;  %v289_v44 = vadd.f32 %v288_v19, %v287_v41 }
  0xc4   :  { %v234_v45 = vadd.f32 %v233_v43, %v232_v42  ;;  %v290_v46 = vrot.slane %v289_v44, 4 }
  0xc6   :  { %v235_v47 = vrot.slane %v234_v45, 2  ;;  %v291_v48 = vadd.f32 %v290_v46, %v289_v44 }
  0xc8   :  { %v236_v49 = vadd.f32 %v235_v47, %v234_v45  ;;  %v292_v50 = vrot.slane %v291_v48, 2 }
  0xca   :  { %v237_v34 = vrot.slane %v236_v49, 1  ;;  %v293_v51 = vadd.f32 %v292_v50, %v291_v48 }
  0xcc   :  { %v238_v53 = vadd.f32 %v237_v34, %v236_v49  ;;  %v294_v54 = vrot.slane %v293_v51, 1 }
  0xce   :  { %v239_v56 = vadd.f32 %v238_v53, %v201_v52  ;;  %v295_v57 = vadd.f32 %v294_v54, %v293_v51 }
  0xd0   :  { %241 = vst.msk [vmem:[%s612_s3] sm:$0x1] %vm198_vm2, %v239_v56  ;;  %v296_v58 = vadd.f32 %v295_v57, %v242_v55 }
  0xd2   :  { %297 = vst.msk [vmem:[%s613_s4] sm:$0x1] %vm198_vm2, %v296_v58 }

// kernel: resnet_generator_forward.37
= control target key start
LH: loop header
LB: loop body
LE: loop exit
PB: predicated region body
PF: predicated region fallthrough
CT: control target
= control target key end

     0   :  { %s1846_s12 = smov 0   ;;  %s2191_s0 = inlined_call_operand.vmem [shape: bf16[512,392], index: 0, kind: input, shape index: {}]   ;;  %s2192_s1 = inlined_call_operand.vmem [shape: bf16[392,3], index: 1, kind: input, shape index: {}]   ;;  %s2193_s2 = inlined_call_operand.vmem [shape: f32[1,3], index: 2, kind: input, shape index: {}]   ;;  %s2194_s3 = inlined_call_operand.vmem [shape: f32[512,3], index: 3, kind: output, shape index: {}]  }
   0x1 LB: > { %s1276_s13 = sadd.s32 4294967295, %s1824_s12   ;;  %p1280_p0 = scmp.ge.s32.totalorder %s1824_s12, 1  ;;  %s1824_s12 = sphi %s1846_s12, %s13_s12  }
   0x2   : > { %p139_p1 = scmp.lt.s32.totalorder %s1824_s12, 3 }
   0x4   : > { %p140_p2 = pnand %p1280_p0, %p139_p1 }
   0x5   : > { %s1281_s20 = sshll.u32 (!%p140_p2), %s1276_s13, 5 }
   0x6   : > { %143 = sbr.rel (%p140_p2) target bundleno = 437 (0x1b5), region = 32  ;;  %p165_p3 = scmp.lt.s32.totalorder (!%p140_p2), %s1281_s20, 63 }
   0xb   : > { %v1728_v0 = vld [vmem:[%s2192_s1 + $0x38] sm:$0xff]  ;;  %v1727_v3 = vld [vmem:[%s2192_s1 + $0x30] sm:$0xff]  ;;  %s2196_s20 = smov (!%p165_p3, %s1281_s20), 63  ;;  %v1726_v6 = vld [vmem:[%s2192_s1 + $0x28] sm:$0xff]  ;;  %vm795_vm0 = vcmask 1043456   ;;  %vm746_vm1 = vcmask 64512  }
   0xc   : > { %v1736_v1 = vld [vmem:[%s2192_s1 + $0x78] sm:$0xff]  ;;  %799 = vmatpush.bf16.msra.mxu0 %v1728_v0  ;;  %v1735_v4 = vld [vmem:[%s2192_s1 + $0x70] sm:$0xff]  ;;  %s1656_s27 = sshll.u32 %s2196_s20, 4  ;;  %v1734_v7 = vld [vmem:[%s2192_s1 + $0x68] sm:$0xff]  ;;  %s1285_s22 = sshll.u32 %s2196_s20, 3  ;;  %vm1187_vm2 = vcmask 23552  }
   0xd   : > { %v1744_v2 = vld [vmem:[%s2192_s1 + $0xb8] sm:$0xff]  ;;  %888 = vmatpush.bf16.msra.mxu1 %v1736_v1  ;;  %v1743_v5 = vld [vmem:[%s2192_s1 + $0xb0] sm:$0xff]  ;;  %v290_v8 = vld [vmem:[%s2192_s1 + $0xc0] sm:$0xf]  ;;  %s1887_s9 = scalar_lea.vmem %s2191_s0, %s1656_s27  ;;  %s2040_s25 = scalar_lea.vmem %s2194_s3, %s1285_s22 }
   0xe   : > { %977 = vmatpush.bf16.msra.mxu2 %v1744_v2  ;;  %v1742_v9 = vld [vmem:[%s2192_s1 + $0xa8] sm:$0xff]  ;;  %v696_v10 = vunpack.c.l.b16 %v290_v8  ;;  %v1298_v12 = vld [vmem:[%s1887_s9 + $0x18] sm:$0xf0]  ;;  %v1725_v14 = vld [vmem:[%s2192_s1 + $0x20] sm:$0xff] }
   0xf   : > { %v1658_v11 = vld [vmem:[%s1887_s9 + $0xc] sm:$0xf]  ;;  %v1733_v15 = vld [vmem:[%s2192_s1 + $0x60] sm:$0xff]  ;;  %v1724_v19 = vld [vmem:[%s2192_s1 + $0x18] sm:$0xff] }
  0x10   : > { %800 = vmatpush.bf16.msra.mxu0 %v1727_v3  ;;  %v721_v13 = vpack.c.b16 %v696_v10, %v696_v10  ;;  %v1741_v16 = vld [vmem:[%s2192_s1 + $0xa0] sm:$0xff]  ;;  %v1301_v18 = vor.u32 %v1658_v11, %v1298_v12  ;;  %v1732_v20 = vld [vmem:[%s2192_s1 + $0x58] sm:$0xff]  ;;  %v1723_v22 = vld [vmem:[%s2192_s1 + $0x10] sm:$0xff] }
  0x11   : > { %889 = vmatpush.bf16.msra.mxu1 %v1735_v4  ;;  %v1740_v21 = vld [vmem:[%s2192_s1 + $0x98] sm:$0xff]  ;;  %v1731_v23 = vld [vmem:[%s2192_s1 + $0x50] sm:$0xff]  ;;  %v1722_v25 = vld [vmem:[%s2192_s1 + $0x8] sm:$0xff] }
  0x12   : > { %978 = vmatpush.bf16.msra.mxu2 %v1743_v5  ;;  %v797_v17 = vsel %vm795_vm0, %v721_v13, 0  ;;  %v1739_v24 = vld [vmem:[%s2192_s1 + $0x90] sm:$0xff]  ;;  %v1730_v26 = vld [vmem:[%s2192_s1 + $0x48] sm:$0xff]  ;;  %v1314_v29 = vld [vmem:[%s1887_s9 + $0x38] sm:$0xf0] }
  0x13   : > { %1073 = vmatpush.bf16.msra.mxu3 %v797_v17  ;;  %v1738_v27 = vld [vmem:[%s2192_s1 + $0x88] sm:$0xff]  ;;  %v1721_v30 = vld [vmem:[%s2192_s1] sm:$0xff]  ;;  %v1659_v33 = vld [vmem:[%s1887_s9 + $0xc] sm:$0xf0] }
  0x14   : > { %801 = vmatpush.bf16.msra.mxu0 %v1726_v6  ;;  %v1662_v28 = vld [vmem:[%s1887_s9 + $0x2c] sm:$0xf]  ;;  %v1729_v31 = vld [vmem:[%s2192_s1 + $0x40] sm:$0xff]  ;;  %v1290_v35 = vld [vmem:[%s1887_s9 + $0x10] sm:$0xf0] }
  0x15   : > { %890 = vmatpush.bf16.msra.mxu1 %v1734_v7  ;;  %v1288_v32 = vld [vmem:[%s1887_s9] sm:$0xf]  ;;  %v1657_v34 = vld [vmem:[%s1887_s9 + $0x4] sm:$0xf]  ;;  %v1296_v37 = vld [vmem:[%s1887_s9 + $0x8] sm:$0xf]  ;;  %v1317_v39 = vor.u32 %v1662_v28, %v1314_v29 }
  0x16   : > { %979 = vmatpush.bf16.msra.mxu2 %v1742_v9  ;;  %1638 = vmatmul.msk.bf16.vlgmr.msra.gmra.mxu3 %vm746_vm1, %v1301_v18  ;;  %v1737_v36 = vld [vmem:[%s2192_s1 + $0x80] sm:$0xff]  ;;  %v1660_v38 = vld [vmem:[%s1887_s9 + $0x14] sm:$0xf0]  ;;  %v1289_v40 = vor.u32 %v1659_v33, %v1288_v32  ;;  %v1293_v41 = vor.u32 %v1657_v34, %v1290_v35  ;;  %v1666_v43 = vld [vmem:[%s1887_s9 + $0x4c] sm:$0xf] }
  0x17   : > { %v1297_v42 = vor.u32 %v1660_v38, %v1296_v37  ;;  %v1330_v44 = vld [vmem:[%s1887_s9 + $0x58] sm:$0xf0]  ;;  %v1304_v45 = vld [vmem:[%s1887_s9 + $0x20] sm:$0xf]  ;;  %v1663_v46 = vld [vmem:[%s1887_s9 + $0x2c] sm:$0xf0] }
  0x18   : > { %802 = vmatpush.bf16.msra.mxu0 %v1725_v14  ;;  %v1661_v47 = vld [vmem:[%s1887_s9 + $0x24] sm:$0xf]  ;;  %v1306_v48 = vld [vmem:[%s1887_s9 + $0x30] sm:$0xf0]  ;;  %v1312_v49 = vld [vmem:[%s1887_s9 + $0x28] sm:$0xf]  ;;  %v1333_v51 = vor.u32 %v1666_v43, %v1330_v44  ;;  %v1305_v52 = vor.u32 %v1663_v46, %v1304_v45 }
  0x19   : > { %891 = vmatpush.bf16.msra.mxu1 %v1733_v15  ;;  %v1664_v50 = vld [vmem:[%s1887_s9 + $0x34] sm:$0xf0]  ;;  %v1309_v53 = vor.u32 %v1661_v47, %v1306_v48  ;;  %v1670_v55 = vld [vmem:[%s1887_s9 + $0x6c] sm:$0xf]  ;;  %v1346_v56 = vld [vmem:[%s1887_s9 + $0x78] sm:$0xf0] }
  0x1a   : > { %980 = vmatpush.bf16.msra.mxu2 %v1741_v16  ;;  %v1313_v54 = vor.u32 %v1664_v50, %v1312_v49  ;;  %v1320_v57 = vld [vmem:[%s1887_s9 + $0x40] sm:$0xf]  ;;  %v1667_v58 = vld [vmem:[%s1887_s9 + $0x4c] sm:$0xf0]  ;;  %v1665_v59 = vld [vmem:[%s1887_s9 + $0x44] sm:$0xf]  ;;  %v1349_v63 = vor.u32 %v1670_v55, %v1346_v56 }
  0x1b   : > { %v1322_v60 = vld [vmem:[%s1887_s9 + $0x50] sm:$0xf0]  ;;  %v1328_v61 = vld [vmem:[%s1887_s9 + $0x48] sm:$0xf]  ;;  %v1668_v62 = vld [vmem:[%s1887_s9 + $0x54] sm:$0xf0]  ;;  %v1321_v0 = vor.u32 %v1667_v58, %v1320_v57 }
  0x1c   : > { %803 = vmatpush.bf16.msra.mxu0 %v1724_v19  ;;  %v1325_v1 = vor.u32 %v1665_v59, %v1322_v60  ;;  %v1329_v2 = vor.u32 %v1668_v62, %v1328_v61  ;;  %v1674_v3 = vld [vmem:[%s1887_s9 + $0x8c] sm:$0xf]  ;;  %v1362_v4 = vld [vmem:[%s1887_s9 + $0x98] sm:$0xf0]  ;;  %v1336_v5 = vld [vmem:[%s1887_s9 + $0x60] sm:$0xf] }
  0x1d   : > { %892 = vmatpush.bf16.msra.mxu1 %v1732_v20  ;;  %v1671_v6 = vld [vmem:[%s1887_s9 + $0x6c] sm:$0xf0]  ;;  %v1669_v7 = vld [vmem:[%s1887_s9 + $0x64] sm:$0xf]  ;;  %v1338_v8 = vld [vmem:[%s1887_s9 + $0x70] sm:$0xf0]  ;;  %v1365_v11 = vor.u32 %v1674_v3, %v1362_v4 }
  0x1e   : > { %981 = vmatpush.bf16.msra.mxu2 %v1740_v21  ;;  %v1344_v9 = vld [vmem:[%s1887_s9 + $0x68] sm:$0xf]  ;;  %v1672_v10 = vld [vmem:[%s1887_s9 + $0x74] sm:$0xf0]  ;;  %v1337_v12 = vor.u32 %v1671_v6, %v1336_v5  ;;  %v1341_v13 = vor.u32 %v1669_v7, %v1338_v8  ;;  %v1678_v15 = vld [vmem:[%s1887_s9 + $0xac] sm:$0xf] }
  0x1f   : > { %v1345_v14 = vor.u32 %v1672_v10, %v1344_v9  ;;  %v1378_v16 = vld [vmem:[%s1887_s9 + $0xb8] sm:$0xf0]  ;;  %v1352_v17 = vld [vmem:[%s1887_s9 + $0x80] sm:$0xf]  ;;  %v1675_v18 = vld [vmem:[%s1887_s9 + $0x8c] sm:$0xf0] }
  0x20   : > { %804 = vmatpush.bf16.msra.mxu0 %v1723_v22  ;;  %v1673_v19 = vld [vmem:[%s1887_s9 + $0x84] sm:$0xf]  ;;  %v1354_v20 = vld [vmem:[%s1887_s9 + $0x90] sm:$0xf0]  ;;  %v1360_v21 = vld [vmem:[%s1887_s9 + $0x88] sm:$0xf] }
  0x21   : > { %893 = vmatpush.bf16.msra.mxu1 %v1731_v23  ;;  %v1676_v22 = vld [vmem:[%s1887_s9 + $0x94] sm:$0xf0]  ;;  %v1381_v23 = vor.u32 %v1678_v15, %v1378_v16  ;;  %v1394_v28 = vld [vmem:[%s1887_s9 + $0xd8] sm:$0xf0]  ;;  %v1368_v29 = vld [vmem:[%s1887_s9 + $0xa0] sm:$0xf] }
  0x22   : > { %982 = vmatpush.bf16.msra.mxu2 %v1739_v24  ;;  %v1353_v24 = vor.u32 %v1675_v18, %v1352_v17  ;;  %v1370_v32 = vld [vmem:[%s1887_s9 + $0xb0] sm:$0xf0]  ;;  %v1376_v33 = vld [vmem:[%s1887_s9 + $0xa8] sm:$0xf]  ;;  %v1680_v34 = vld [vmem:[%s1887_s9 + $0xb4] sm:$0xf0] }
  0x23   : > { %v1377_v38 = vor.u32 %v1680_v34, %v1376_v33  ;;  %v1681_v43 = vld [vmem:[%s1887_s9 + $0xc4] sm:$0xf]  ;;  %v1386_v44 = vld [vmem:[%s1887_s9 + $0xd0] sm:$0xf0]  ;;  %v1392_v45 = vld [vmem:[%s1887_s9 + $0xc8] sm:$0xf] }
  0x24   : > { %805 = vmatpush.bf16.msra.mxu0 %v1722_v25  ;;  %v1357_v25 = vor.u32 %v1673_v19, %v1354_v20  ;;  %v1684_v46 = vld [vmem:[%s1887_s9 + $0xd4] sm:$0xf0]  ;;  %v1389_v49 = vor.u32 %v1681_v43, %v1386_v44  ;;  %v1685_v55 = vld [vmem:[%s1887_s9 + $0xe4] sm:$0xf]  ;;  %v1402_v56 = vld [vmem:[%s1887_s9 + $0xf0] sm:$0xf0] }
  0x25   : > { %894 = vmatpush.bf16.msra.mxu1 %v1730_v26  ;;  %v1361_v26 = vor.u32 %v1676_v22, %v1360_v21  ;;  %v1393_v50 = vor.u32 %v1684_v46, %v1392_v45  ;;  %v1408_v57 = vld [vmem:[%s1887_s9 + $0xe8] sm:$0xf]  ;;  %v1688_v58 = vld [vmem:[%s1887_s9 + $0xf4] sm:$0xf0]  ;;  %v1405_v61 = vor.u32 %v1685_v55, %v1402_v56  ;;  %v1691_v3 = vld [vmem:[%s1887_s9 + $0x10c] sm:$0xf0] }
  0x26   : > { %983 = vmatpush.bf16.msra.mxu2 %v1738_v27  ;;  %1639 = vmatmul.msk.bf16.gmra.mxu3 %vm746_vm1, %v1317_v39  ;;  %v1682_v27 = vld [vmem:[%s1887_s9 + $0xcc] sm:$0xf]  ;;  %v1409_v62 = vor.u32 %v1688_v58, %v1408_v57  ;;  %v1689_v4 = vld [vmem:[%s1887_s9 + $0x104] sm:$0xf]  ;;  %v1418_v5 = vld [vmem:[%s1887_s9 + $0x110] sm:$0xf0] }
  0x27   : > { %v1397_v35 = vor.u32 %v1682_v27, %v1394_v28  ;;  %v1686_v39 = vld [vmem:[%s1887_s9 + $0xec] sm:$0xf]  ;;  %v2021_v7 = vld [vmem:[%s2193_s2] ss:$0 sm:$0xff]  ;;  %v1424_v8 = vld [vmem:[%s1887_s9 + $0x108] sm:$0xf] }
  0x28   : > { %806 = vmatpush.bf16.msra.mxu0 %v1721_v30  ;;  %v1679_v30 = vld [vmem:[%s1887_s9 + $0xac] sm:$0xf0]  ;;  %v1692_v9 = vld [vmem:[%s1887_s9 + $0x114] sm:$0xf0]  ;;  %v1432_v27 = vld [vmem:[%s1887_s9 + $0x120] sm:$0xf] }
  0x29   : > { %895 = vmatpush.bf16.msra.mxu1 %v1729_v31  ;;  %v1677_v31 = vld [vmem:[%s1887_s9 + $0xa4] sm:$0xf]  ;;  %v1425_v15 = vor.u32 %v1692_v9, %v1424_v8  ;;  %v1695_v28 = vld [vmem:[%s1887_s9 + $0x12c] sm:$0xf0]  ;;  %v1696_v33 = vld [vmem:[%s1887_s9 + $0x134] sm:$0xf0] }
  0x2a   : > { %984 = vmatpush.bf16.msra.mxu2 %v1737_v36  ;;  %v1369_v36 = vor.u32 %v1679_v30, %v1368_v29  ;;  %v1373_v37 = vor.u32 %v1677_v31, %v1370_v32  ;;  %v1693_v29 = vld [vmem:[%s1887_s9 + $0x124] sm:$0xf]  ;;  %v1434_v30 = vld [vmem:[%s1887_s9 + $0x130] sm:$0xf0]  ;;  %v1440_v32 = vld [vmem:[%s1887_s9 + $0x128] sm:$0xf] }
  0x2b   : > { %807 = vmatmul.bf16.vlgmr.msra.gmra.mxu0 %v1289_v40  ;;  %v1410_v40 = vld [vmem:[%s1887_s9 + $0xf8] sm:$0xf0]  ;;  %v1702_v55 = vld [vmem:[%s1887_s9 + $0x16c] sm:$0xf]  ;;  %v1448_v57 = vld [vmem:[%s1887_s9 + $0x140] sm:$0xf] }
  0x2c   : > { %896 = vmatmul.bf16.vlgmr.msra.gmra.mxu1 %v1293_v41  ;;  %v1384_v41 = vld [vmem:[%s1887_s9 + $0xc0] sm:$0xf]  ;;  %v1413_v47 = vor.u32 %v1686_v39, %v1410_v40  ;;  %v1474_v56 = vld [vmem:[%s1887_s9 + $0x178] sm:$0xf0]  ;;  %v1699_v58 = vld [vmem:[%s1887_s9 + $0x14c] sm:$0xf0] }
  0x2d   : > { %985 = vmatmul.bf16.vlgmr.msra.gmra.mxu2 %v1297_v42  ;;  %v1683_v42 = vld [vmem:[%s1887_s9 + $0xcc] sm:$0xf0] }
  0x2e   : > { %v1385_v48 = vor.u32 %v1683_v42, %v1384_v41  ;;  %v1441_v42 = vor.u32 %v1696_v33, %v1440_v32 }
  0x36   : > { %1640 = vmatmul.msk.bf16.gmra.mxu3 %vm746_vm1, %v1333_v51  ;;  %v1690_v51 = vld [vmem:[%s1887_s9 + $0x10c] sm:$0xf] }
  0x3b   : > { %812 = vmatmul.bf16.gmra.mxu0 %v1305_v52  ;;  %v1426_v52 = vld [vmem:[%s1887_s9 + $0x118] sm:$0xf0] }
  0x3c   : > { %901 = vmatmul.bf16.gmra.mxu1 %v1309_v53  ;;  %v1400_v53 = vld [vmem:[%s1887_s9 + $0xe0] sm:$0xf]  ;;  %v1429_v59 = vor.u32 %v1690_v51, %v1426_v52 }
  0x3d   : > { %990 = vmatmul.bf16.gmra.mxu2 %v1313_v54  ;;  %v1687_v54 = vld [vmem:[%s1887_s9 + $0xec] sm:$0xf0] }
  0x3e   : > { %v1401_v60 = vor.u32 %v1687_v54, %v1400_v53 }
  0x46   : > { %1641 = vmatmul.msk.bf16.gmra.mxu3 %vm746_vm1, %v1349_v63 }
  0x4b   : > { %817 = vmatmul.bf16.gmra.mxu0 %v1321_v0  ;;  %v1694_v0 = vld [vmem:[%s1887_s9 + $0x12c] sm:$0xf] }
  0x4c   : > { %906 = vmatmul.bf16.gmra.mxu1 %v1325_v1  ;;  %v1442_v1 = vld [vmem:[%s1887_s9 + $0x138] sm:$0xf0] }
  0x4d   : > { %995 = vmatmul.bf16.gmra.mxu2 %v1329_v2  ;;  %v1416_v2 = vld [vmem:[%s1887_s9 + $0x100] sm:$0xf]  ;;  %v1445_v10 = vor.u32 %v1694_v0, %v1442_v1  ;;  %v1477_v0 = vor.u32 %v1702_v55, %v1474_v56  ;;  %v1707_v55 = vld [vmem:[%s1887_s9 + $0x18c] sm:$0xf0]  ;;  %v1705_v56 = vld [vmem:[%s1887_s9 + $0x184] sm:$0xf] }
  0x56   : > { %1642 = vmatmul.msk.bf16.gmra.mxu3 %vm746_vm1, %v1365_v11  ;;  %v1417_v11 = vor.u32 %v1691_v3, %v1416_v2  ;;  %v1449_v3 = vor.u32 %v1699_v58, %v1448_v57  ;;  %v1482_v57 = vld [vmem:[%s1887_s9 + $0x190] sm:$0xf0] }
  0x5b   : > { %822 = vmatmul.bf16.gmra.mxu0 %v1337_v12  ;;  %v1421_v12 = vor.u32 %v1689_v4, %v1418_v5 }
  0x5c   : > { %911 = vmatmul.bf16.gmra.mxu1 %v1341_v13 }
  0x5d   : > { %1000 = vmatmul.bf16.gmra.mxu2 %v1345_v14 }
  0x66   : > { %1643 = vmatmul.msk.bf16.gmra.mxu3 %vm746_vm1, %v1381_v23 }
  0x6b   : > { %827 = vmatmul.bf16.gmra.mxu0 %v1353_v24 }
  0x6c   : > { %916 = vmatmul.bf16.gmra.mxu1 %v1357_v25  ;;  %v1698_v25 = vld [vmem:[%s1887_s9 + $0x14c] sm:$0xf] }
  0x6d   : > { %1005 = vmatmul.bf16.gmra.mxu2 %v1361_v26  ;;  %v1458_v26 = vld [vmem:[%s1887_s9 + $0x158] sm:$0xf0] }
  0x6e   : > { %v1461_v34 = vor.u32 %v1698_v25, %v1458_v26  ;;  %v1703_v25 = vld [vmem:[%s1887_s9 + $0x16c] sm:$0xf0]  ;;  %v1701_v26 = vld [vmem:[%s1887_s9 + $0x164] sm:$0xf] }
  0x76   : > { %1644 = vmatmul.msk.bf16.gmra.mxu3 %vm746_vm1, %v1397_v35 }
  0x7b   : > { %832 = vmatmul.bf16.gmra.mxu0 %v1369_v36 }
  0x7c   : > { %921 = vmatmul.bf16.gmra.mxu1 %v1373_v37  ;;  %v1433_v37 = vor.u32 %v1695_v28, %v1432_v27  ;;  %v1466_v27 = vld [vmem:[%s1887_s9 + $0x170] sm:$0xf0] }
  0x7d   : > { %1010 = vmatmul.bf16.gmra.mxu2 %v1377_v38  ;;  %v1437_v38 = vor.u32 %v1693_v29, %v1434_v30  ;;  %v1472_v29 = vld [vmem:[%s1887_s9 + $0x168] sm:$0xf]  ;;  %v1704_v30 = vld [vmem:[%s1887_s9 + $0x174] sm:$0xf0] }
  0x86   : > { %1645 = vmatmul.msk.bf16.gmra.mxu3 %vm746_vm1, %v1413_v47 }
  0x8b   : > { %837 = vmatmul.bf16.gmra.mxu0 %v1385_v48 }
  0x8c   : > { %926 = vmatmul.bf16.gmra.mxu1 %v1389_v49 }
  0x8d   : > { %1015 = vmatmul.bf16.gmra.mxu2 %v1393_v50 }
  0x96   : > { %1646 = vmatmul.msk.bf16.gmra.mxu3 %vm746_vm1, %v1429_v59  ;;  %v1697_v59 = vld [vmem:[%s1887_s9 + $0x144] sm:$0xf] }
  0x99   : > { %v1075_v63 = vpop.f32.mrf.mxu3 }
  0x9b   : > { %842 = vmatmul.bf16.gmra.mxu0 %v1401_v60  ;;  %v1450_v60 = vld [vmem:[%s1887_s9 + $0x150] sm:$0xf0] }
  0x9c   : > { %931 = vmatmul.bf16.gmra.mxu1 %v1405_v61  ;;  %v1453_v4 = vor.u32 %v1697_v59, %v1450_v60  ;;  %v1488_v59 = vld [vmem:[%s1887_s9 + $0x188] sm:$0xf]  ;;  %v1708_v60 = vld [vmem:[%s1887_s9 + $0x194] sm:$0xf0] }
  0x9d   : > { %1020 = vmatmul.bf16.gmra.mxu2 %v1409_v62  ;;  %v1456_v62 = vld [vmem:[%s1887_s9 + $0x148] sm:$0xf] }
  0xa1   : > { %v1077_v6 = vpop.f32.mrf.mxu3 }
  0xa6   : > { %1647 = vmatmul.msk.bf16.gmra.mxu3 %vm746_vm1, %v1445_v10 }
  0xa8   : > { %v808_v13 = vpop.f32.mrf.mxu0 }
  0xa9   : > { %v897_v14 = vpop.f32.mrf.mxu1  ;;  %v809_v16 = vadd.f32 %v2021_v7, %v808_v13  ;;  %v1080_v18 = vpop.f32.mrf.mxu3 }
  0xab   : > { %847 = vmatmul.bf16.gmra.mxu0 %v1417_v11  ;;  %v898_v17 = vadd.f32 %v897_v14, %v809_v16 }
  0xac   : > { %936 = vmatmul.bf16.gmra.mxu1 %v1421_v12 }
  0xad   : > { %1025 = vmatmul.bf16.gmra.mxu2 %v1425_v15 }
  0xb0   : > { %v986_v19 = vpop.f32.mrf.mxu2  ;;  %v810_v21 = vpop.f32.mrf.mxu0 }
  0xb1   : > { %v987_v20 = vadd.f32 %v986_v19, %v898_v17  ;;  %v899_v22 = vpop.f32.mrf.mxu1  ;;  %v811_v24 = vadd.f32 %v2021_v7, %v810_v21  ;;  %v1082_v31 = vpop.f32.mrf.mxu3 }
  0xb3   : > { %v1076_v23 = vadd.f32 %v1075_v63, %v987_v20  ;;  %v900_v35 = vadd.f32 %v899_v22, %v811_v24  ;;  %v1700_v63 = vld [vmem:[%s1887_s9 + $0x154] sm:$0xf0]  ;;  %v1706_v22 = vld [vmem:[%s1887_s9 + $0x18c] sm:$0xf]  ;;  %v1464_v24 = vld [vmem:[%s1887_s9 + $0x160] sm:$0xf] }
  0xb4   : > { %v1457_v9 = vor.u32 %v1700_v63, %v1456_v62 }
  0xb5   : > { %1754 = vtanh.f32 %v1076_v23  ;;  %v1490_v23 = vld [vmem:[%s1887_s9 + $0x198] sm:$0xf0] }
  0xb6   : > { %1648 = vmatmul.msk.bf16.gmra.mxu3 %vm746_vm1, %v1461_v34  ;;  %v1465_v34 = vor.u32 %v1703_v25, %v1464_v24  ;;  %v1498_v24 = vld [vmem:[%s1887_s9 + $0x1b0] sm:$0xf0] }
  0xb8   : > { %v988_v36 = vpop.f32.mrf.mxu2  ;;  %v813_v40 = vpop.f32.mrf.mxu0 }
  0xb9   : > { %v989_v39 = vadd.f32 %v988_v36, %v900_v35  ;;  %v902_v41 = vpop.f32.mrf.mxu1  ;;  %v814_v43 = vadd.f32 %v2021_v7, %v813_v40  ;;  %v1085_v47 = vpop.f32.mrf.mxu3  ;;  %v1469_v35 = vor.u32 %v1701_v26, %v1466_v27  ;;  %v1504_v26 = vld [vmem:[%s1887_s9 + $0x1a8] sm:$0xf]  ;;  %v1712_v27 = vld [vmem:[%s1887_s9 + $0x1b4] sm:$0xf0] }
  0xbb   : > { %v1755_v44 = vpop.eup %1754  ;;  %v1078_v45 = vadd.f32 %v1077_v6, %v989_v39  ;;  %852 = vmatmul.bf16.gmra.mxu0 %v1433_v37  ;;  %v903_v46 = vadd.f32 %v902_v41, %v814_v43  ;;  %v1473_v39 = vor.u32 %v1704_v30, %v1472_v29 }
  0xbc   : > { %1188 = vst.msk [vmem:[%s2040_s25] sm:$0xff] %vm1187_vm2, %v1755_v44  ;;  %941 = vmatmul.bf16.gmra.mxu1 %v1437_v38 }
  0xbd   : > { %1756 = vtanh.f32 %v1078_v45  ;;  %1030 = vmatmul.bf16.gmra.mxu2 %v1441_v42 }
  0xc0   : > { %v991_v48 = vpop.f32.mrf.mxu2  ;;  %v815_v50 = vpop.f32.mrf.mxu0 }
  0xc1   : > { %v992_v49 = vadd.f32 %v991_v48, %v903_v46  ;;  %v904_v51 = vpop.f32.mrf.mxu1  ;;  %v816_v54 = vadd.f32 %v2021_v7, %v815_v50  ;;  %v1087_v61 = vpop.f32.mrf.mxu3 }
  0xc3   : > { %v1757_v52 = vpop.eup %1756  ;;  %v1081_v53 = vadd.f32 %v1080_v18, %v992_v49  ;;  %v905_v1 = vadd.f32 %v904_v51, %v816_v54  ;;  %v1480_v54 = vld [vmem:[%s1887_s9 + $0x180] sm:$0xf] }
  0xc4   : > { %1189 = vst.msk [vmem:[%s2040_s25 + $0x8] sm:$0xff] %vm1187_vm2, %v1757_v52  ;;  %v1710_v52 = vld [vmem:[%s1887_s9 + $0x1ac] sm:$0xf] }
  0xc5   : > { %1758 = vtanh.f32 %v1081_v53  ;;  %v1506_v53 = vld [vmem:[%s1887_s9 + $0x1b8] sm:$0xf0] }
  0xc6   : > { %1649 = vmatmul.msk.bf16.gmra.mxu3 %vm746_vm1, %v1477_v0  ;;  %v1481_v0 = vor.u32 %v1707_v55, %v1480_v54  ;;  %v1514_v54 = vld [vmem:[%s1887_s9 + $0x1d0] sm:$0xf0] }
  0xc8   : > { %v993_v2 = vpop.f32.mrf.mxu2  ;;  %v818_v6 = vpop.f32.mrf.mxu0 }
  0xc9   : > { %v994_v5 = vadd.f32 %v993_v2, %v905_v1  ;;  %v907_v8 = vpop.f32.mrf.mxu1  ;;  %v819_v10 = vadd.f32 %v2021_v7, %v818_v6  ;;  %v1090_v14 = vpop.f32.mrf.mxu3  ;;  %v1485_v1 = vor.u32 %v1705_v56, %v1482_v57  ;;  %v1520_v56 = vld [vmem:[%s1887_s9 + $0x1c8] sm:$0xf]  ;;  %v1716_v57 = vld [vmem:[%s1887_s9 + $0x1d4] sm:$0xf0] }
  0xcb   : > { %v1759_v11 = vpop.eup %1758  ;;  %v1083_v12 = vadd.f32 %v1082_v31, %v994_v5  ;;  %857 = vmatmul.bf16.gmra.mxu0 %v1449_v3  ;;  %v908_v13 = vadd.f32 %v907_v8, %v819_v10  ;;  %v1493_v31 = vor.u32 %v1706_v22, %v1490_v23  ;;  %v1489_v5 = vor.u32 %v1708_v60, %v1488_v59  ;;  %v1711_v22 = vld [vmem:[%s1887_s9 + $0x1ac] sm:$0xf0]  ;;  %v1709_v23 = vld [vmem:[%s1887_s9 + $0x1a4] sm:$0xf] }
  0xcc   : > { %1190 = vst.msk [vmem:[%s2040_s25 + $0x10] sm:$0xff] %vm1187_vm2, %v1759_v11  ;;  %946 = vmatmul.bf16.gmra.mxu1 %v1453_v4 }
  0xcd   : > { %1760 = vtanh.f32 %v1083_v12  ;;  %1035 = vmatmul.bf16.gmra.mxu2 %v1457_v9 }
  0xd0   : > { %v996_v15 = vpop.f32.mrf.mxu2  ;;  %v820_v17 = vpop.f32.mrf.mxu0 }
  0xd1   : > { %v997_v16 = vadd.f32 %v996_v15, %v908_v13  ;;  %v909_v18 = vpop.f32.mrf.mxu1  ;;  %v821_v21 = vadd.f32 %v2021_v7, %v820_v17  ;;  %v1092_v28 = vpop.f32.mrf.mxu3 }
  0xd3   : > { %v1761_v19 = vpop.eup %1760  ;;  %v1086_v20 = vadd.f32 %v1085_v47, %v997_v16  ;;  %v910_v32 = vadd.f32 %v909_v18, %v821_v21  ;;  %v1496_v21 = vld [vmem:[%s1887_s9 + $0x1a0] sm:$0xf] }
  0xd4   : > { %1191 = vst.msk [vmem:[%s2040_s25 + $0x18] sm:$0xff] %vm1187_vm2, %v1761_v19  ;;  %v1714_v19 = vld [vmem:[%s1887_s9 + $0x1cc] sm:$0xf] }
  0xd5   : > { %1762 = vtanh.f32 %v1086_v20  ;;  %v1522_v20 = vld [vmem:[%s1887_s9 + $0x1d8] sm:$0xf0] }
  0xd6   : > { %1650 = vmatmul.msk.bf16.gmra.mxu3 %vm746_vm1, %v1493_v31  ;;  %v1497_v31 = vor.u32 %v1711_v22, %v1496_v21  ;;  %v1536_v21 = vld [vmem:[%s1887_s9 + $0x1e8] sm:$0xf]  ;;  %v1720_v22 = vld [vmem:[%s1887_s9 + $0x1f4] sm:$0xf0] }
  0xd8   : > { %v998_v33 = vpop.f32.mrf.mxu2  ;;  %v823_v37 = vpop.f32.mrf.mxu0 }
  0xd9   : > { %v999_v36 = vadd.f32 %v998_v33, %v910_v32  ;;  %v912_v38 = vpop.f32.mrf.mxu1  ;;  %v824_v40 = vadd.f32 %v2021_v7, %v823_v37  ;;  %v1095_v44 = vpop.f32.mrf.mxu3  ;;  %v1501_v32 = vor.u32 %v1709_v23, %v1498_v24 }
  0xdb   : > { %v1763_v41 = vpop.eup %1762  ;;  %v1088_v42 = vadd.f32 %v1087_v61, %v999_v36  ;;  %862 = vmatmul.bf16.gmra.mxu0 %v1465_v34  ;;  %v913_v43 = vadd.f32 %v912_v38, %v824_v40  ;;  %v1509_v61 = vor.u32 %v1710_v52, %v1506_v53  ;;  %v1505_v36 = vor.u32 %v1712_v27, %v1504_v26  ;;  %v1715_v52 = vld [vmem:[%s1887_s9 + $0x1cc] sm:$0xf0]  ;;  %v1713_v53 = vld [vmem:[%s1887_s9 + $0x1c4] sm:$0xf] }
  0xdc   : > { %1192 = vst.msk [vmem:[%s2040_s25 + $0x20] sm:$0xff] %vm1187_vm2, %v1763_v41  ;;  %951 = vmatmul.bf16.gmra.mxu1 %v1469_v35 }
  0xdd   : > { %1764 = vtanh.f32 %v1088_v42  ;;  %1040 = vmatmul.bf16.gmra.mxu2 %v1473_v39 }
  0xe0   : > { %v1001_v45 = vpop.f32.mrf.mxu2  ;;  %v825_v47 = vpop.f32.mrf.mxu0 }
  0xe1   : > { %v1002_v46 = vadd.f32 %v1001_v45, %v913_v43  ;;  %v914_v48 = vpop.f32.mrf.mxu1  ;;  %v826_v51 = vadd.f32 %v2021_v7, %v825_v47  ;;  %v1097_v58 = vpop.f32.mrf.mxu3 }
  0xe3   : > { %v1765_v49 = vpop.eup %1764  ;;  %v1091_v50 = vadd.f32 %v1090_v14, %v1002_v46  ;;  %v915_v62 = vadd.f32 %v914_v48, %v826_v51  ;;  %v1512_v51 = vld [vmem:[%s1887_s9 + $0x1c0] sm:$0xf] }
  0xe4   : > { %1193 = vst.msk [vmem:[%s2040_s25 + $0x28] sm:$0xff] %vm1187_vm2, %v1765_v49  ;;  %v1718_v49 = vld [vmem:[%s1887_s9 + $0x1ec] sm:$0xf] }
  0xe5   : > { %1766 = vtanh.f32 %v1091_v50  ;;  %v1538_v50 = vld [vmem:[%s1887_s9 + $0x1f8] sm:$0xf0] }
  0xe6   : > { %1651 = vmatmul.msk.bf16.gmra.mxu3 %vm746_vm1, %v1509_v61  ;;  %v1513_v61 = vor.u32 %v1715_v52, %v1512_v51 }
  0xe8   : > { %v1003_v63 = vpop.f32.mrf.mxu2  ;;  %v828_v3 = vpop.f32.mrf.mxu0 }
  0xe9   : > { %v1004_v2 = vadd.f32 %v1003_v63, %v915_v62  ;;  %v917_v4 = vpop.f32.mrf.mxu1  ;;  %v829_v6 = vadd.f32 %v2021_v7, %v828_v3  ;;  %v1100_v11 = vpop.f32.mrf.mxu3  ;;  %v1517_v62 = vor.u32 %v1713_v53, %v1514_v54 }
  0xeb   : > { %v1767_v8 = vpop.eup %1766  ;;  %v1093_v9 = vadd.f32 %v1092_v28, %v1004_v2  ;;  %867 = vmatmul.bf16.gmra.mxu0 %v1481_v0  ;;  %v918_v10 = vadd.f32 %v917_v4, %v829_v6  ;;  %v1525_v28 = vor.u32 %v1714_v19, %v1522_v20  ;;  %v1521_v2 = vor.u32 %v1716_v57, %v1520_v56  ;;  %v1530_v19 = vld [vmem:[%s1887_s9 + $0x1f0] sm:$0xf0] }
  0xec   : > { %1194 = vst.msk [vmem:[%s2040_s25 + $0x30] sm:$0xff] %vm1187_vm2, %v1767_v8  ;;  %956 = vmatmul.bf16.gmra.mxu1 %v1485_v1 }
  0xed   : > { %1768 = vtanh.f32 %v1093_v9  ;;  %1045 = vmatmul.bf16.gmra.mxu2 %v1489_v5 }
  0xf0   : > { %v1006_v12 = vpop.f32.mrf.mxu2  ;;  %v830_v14 = vpop.f32.mrf.mxu0 }
  0xf1   : > { %v1007_v13 = vadd.f32 %v1006_v12, %v918_v10  ;;  %v919_v15 = vpop.f32.mrf.mxu1  ;;  %v831_v18 = vadd.f32 %v2021_v7, %v830_v14  ;;  %v1102_v25 = vpop.f32.mrf.mxu3 }
  0xf3   : > { %v1769_v16 = vpop.eup %1768  ;;  %v1096_v17 = vadd.f32 %v1095_v44, %v1007_v13  ;;  %v920_v29 = vadd.f32 %v919_v15, %v831_v18  ;;  %v1717_v18 = vld [vmem:[%s1887_s9 + $0x1e4] sm:$0xf] }
  0xf4   : > { %1195 = vst.msk [vmem:[%s2040_s25 + $0x38] sm:$0xff] %vm1187_vm2, %v1769_v16  ;;  %v1528_v16 = vld [vmem:[%s1887_s9 + $0x1e0] sm:$0xf]  ;;  %v1533_v26 = vor.u32 %v1717_v18, %v1530_v19 }
  0xf5   : > { %1770 = vtanh.f32 %v1096_v17  ;;  %v1719_v17 = vld [vmem:[%s1887_s9 + $0x1ec] sm:$0xf0] }
  0xf6   : > { %1652 = vmatmul.msk.bf16.gmra.mxu3 %vm746_vm1, %v1525_v28 }
  0xf8   : > { %v1008_v30 = vpop.f32.mrf.mxu2  ;;  %v833_v34 = vpop.f32.mrf.mxu0 }
  0xf9   : > { %v1009_v33 = vadd.f32 %v1008_v30, %v920_v29  ;;  %v922_v35 = vpop.f32.mrf.mxu1  ;;  %v834_v37 = vadd.f32 %v2021_v7, %v833_v34  ;;  %v1105_v41 = vpop.f32.mrf.mxu3  ;;  %v1537_v30 = vor.u32 %v1720_v22, %v1536_v21 }
  0xfb   : > { %v1771_v38 = vpop.eup %1770  ;;  %v1098_v39 = vadd.f32 %v1097_v58, %v1009_v33  ;;  %872 = vmatmul.bf16.gmra.mxu0 %v1497_v31  ;;  %v923_v40 = vadd.f32 %v922_v35, %v834_v37  ;;  %v1541_v58 = vor.u32 %v1718_v49, %v1538_v50 }
  0xfc   : > { %1196 = vst.msk [vmem:[%s2040_s25 + $0x40] sm:$0xff] %vm1187_vm2, %v1771_v38  ;;  %961 = vmatmul.bf16.gmra.mxu1 %v1501_v32 }
  0xfd   : > { %1772 = vtanh.f32 %v1098_v39  ;;  %1050 = vmatmul.bf16.gmra.mxu2 %v1505_v36 }
 0x100   : > { %v1011_v42 = vpop.f32.mrf.mxu2  ;;  %v835_v44 = vpop.f32.mrf.mxu0 }
 0x101   : > { %v1012_v43 = vadd.f32 %v1011_v42, %v923_v40  ;;  %v924_v45 = vpop.f32.mrf.mxu1  ;;  %v836_v48 = vadd.f32 %v2021_v7, %v835_v44  ;;  %v1107_v55 = vpop.f32.mrf.mxu3 }
 0x103   : > { %v1773_v46 = vpop.eup %1772  ;;  %v1101_v47 = vadd.f32 %v1100_v11, %v1012_v43  ;;  %v925_v59 = vadd.f32 %v924_v45, %v836_v48 }
 0x104   : > { %1197 = vst.msk [vmem:[%s2040_s25 + $0x48] sm:$0xff] %vm1187_vm2, %v1773_v46 }
 0x105   : > { %1774 = vtanh.f32 %v1101_v47 }
 0x106   : > { %1653 = vmatmul.msk.bf16.gmra.mxu3 %vm746_vm1, %v1541_v58 }
 0x108   : > { %v1013_v60 = vpop.f32.mrf.mxu2  ;;  %v838_v0 = vpop.f32.mrf.mxu0 }
 0x109   : > { %v1014_v63 = vadd.f32 %v1013_v60, %v925_v59  ;;  %v927_v1 = vpop.f32.mrf.mxu1  ;;  %v839_v3 = vadd.f32 %v2021_v7, %v838_v0  ;;  %v1110_v8 = vpop.f32.mrf.mxu3 }
 0x10b   : > { %v1775_v4 = vpop.eup %1774  ;;  %v1103_v5 = vadd.f32 %v1102_v25, %v1014_v63  ;;  %877 = vmatmul.bf16.gmra.mxu0 %v1513_v61  ;;  %v928_v6 = vadd.f32 %v927_v1, %v839_v3  ;;  %v1529_v25 = vor.u32 %v1719_v17, %v1528_v16 }
 0x10c   : > { %1198 = vst.msk [vmem:[%s2040_s25 + $0x50] sm:$0xff] %vm1187_vm2, %v1775_v4  ;;  %966 = vmatmul.bf16.gmra.mxu1 %v1517_v62 }
 0x10d   : > { %1776 = vtanh.f32 %v1103_v5  ;;  %1055 = vmatmul.bf16.gmra.mxu2 %v1521_v2 }
 0x110   : > { %v1016_v9 = vpop.f32.mrf.mxu2  ;;  %v840_v11 = vpop.f32.mrf.mxu0 }
 0x111   : > { %v1017_v10 = vadd.f32 %v1016_v9, %v928_v6  ;;  %v929_v12 = vpop.f32.mrf.mxu1  ;;  %v841_v15 = vadd.f32 %v2021_v7, %v840_v11  ;;  %v1112_v20 = vpop.f32.mrf.mxu3 }
 0x113   : > { %v1777_v13 = vpop.eup %1776  ;;  %v1106_v14 = vadd.f32 %v1105_v41, %v1017_v10  ;;  %v930_v23 = vadd.f32 %v929_v12, %v841_v15 }
 0x114   : > { %1199 = vst.msk [vmem:[%s2040_s25 + $0x58] sm:$0xff] %vm1187_vm2, %v1777_v13 }
 0x115   : > { %1778 = vtanh.f32 %v1106_v14 }
 0x118   : > { %v1018_v24 = vpop.f32.mrf.mxu2  ;;  %v843_v28 = vpop.f32.mrf.mxu0 }
 0x119   : > { %v1019_v27 = vadd.f32 %v1018_v24, %v930_v23  ;;  %v932_v29 = vpop.f32.mrf.mxu1  ;;  %v844_v31 = vadd.f32 %v2021_v7, %v843_v28  ;;  %v1115_v35 = vpop.f32.mrf.mxu3 }
 0x11b   : > { %v1779_v32 = vpop.eup %1778  ;;  %v1108_v33 = vadd.f32 %v1107_v55, %v1019_v27  ;;  %882 = vmatmul.bf16.gmra.mxu0 %v1529_v25  ;;  %v933_v34 = vadd.f32 %v932_v29, %v844_v31 }
 0x11c   : > { %1200 = vst.msk [vmem:[%s2040_s25 + $0x60] sm:$0xff] %vm1187_vm2, %v1779_v32  ;;  %971 = vmatmul.bf16.gmra.mxu1 %v1533_v26 }
 0x11d   : > { %1780 = vtanh.f32 %v1108_v33  ;;  %1060 = vmatmul.bf16.gmra.mxu2 %v1537_v30 }
 0x120   : > { %v1021_v36 = vpop.f32.mrf.mxu2  ;;  %v845_v38 = vpop.f32.mrf.mxu0 }
 0x121   : > { %v1022_v37 = vadd.f32 %v1021_v36, %v933_v34  ;;  %v934_v39 = vpop.f32.mrf.mxu1  ;;  %v846_v42 = vadd.f32 %v2021_v7, %v845_v38  ;;  %v1117_v43 = vpop.f32.mrf.mxu3 }
 0x123   : > { %v1781_v40 = vpop.eup %1780  ;;  %v1111_v41 = vadd.f32 %v1110_v8, %v1022_v37  ;;  %v935_v44 = vadd.f32 %v934_v39, %v846_v42 }
 0x124   : > { %1201 = vst.msk [vmem:[%s2040_s25 + $0x68] sm:$0xff] %vm1187_vm2, %v1781_v40 }
 0x125   : > { %1782 = vtanh.f32 %v1111_v41 }
 0x128   : > { %v1023_v45 = vpop.f32.mrf.mxu2  ;;  %v848_v47 = vpop.f32.mrf.mxu0 }
 0x129   : > { %v1024_v46 = vadd.f32 %v1023_v45, %v935_v44  ;;  %v937_v48 = vpop.f32.mrf.mxu1  ;;  %v849_v49 = vadd.f32 %v2021_v7, %v848_v47  ;;  %v1120_v53 = vpop.f32.mrf.mxu3 }
 0x12b   : > { %v1783_v50 = vpop.eup %1782  ;;  %v1113_v51 = vadd.f32 %v1112_v20, %v1024_v46  ;;  %v938_v52 = vadd.f32 %v937_v48, %v849_v49 }
 0x12c   : > { %1202 = vst.msk [vmem:[%s2040_s25 + $0x70] sm:$0xff] %vm1187_vm2, %v1783_v50 }
 0x12d   : > { %1784 = vtanh.f32 %v1113_v51 }
 0x130   : > { %v1026_v54 = vpop.f32.mrf.mxu2  ;;  %v850_v56 = vpop.f32.mrf.mxu0 }
 0x131   : > { %v1027_v55 = vadd.f32 %v1026_v54, %v938_v52  ;;  %v939_v57 = vpop.f32.mrf.mxu1  ;;  %v851_v60 = vadd.f32 %v2021_v7, %v850_v56  ;;  %v1122_v61 = vpop.f32.mrf.mxu3 }
 0x133   : > { %v1785_v58 = vpop.eup %1784  ;;  %v1116_v59 = vadd.f32 %v1115_v35, %v1027_v55  ;;  %v940_v62 = vadd.f32 %v939_v57, %v851_v60 }
 0x134   : > { %1203 = vst.msk [vmem:[%s2040_s25 + $0x78] sm:$0xff] %vm1187_vm2, %v1785_v58 }
 0x135   : > { %1786 = vtanh.f32 %v1116_v59 }
 0x138   : > { %v1028_v63 = vpop.f32.mrf.mxu2  ;;  %v853_v1 = vpop.f32.mrf.mxu0 }
 0x139   : > { %v1029_v0 = vadd.f32 %v1028_v63, %v940_v62  ;;  %v942_v2 = vpop.f32.mrf.mxu1  ;;  %v854_v3 = vadd.f32 %v2021_v7, %v853_v1  ;;  %v1125_v8 = vpop.f32.mrf.mxu3 }
 0x13b   : > { %v1787_v4 = vpop.eup %1786  ;;  %v1118_v5 = vadd.f32 %v1117_v43, %v1029_v0  ;;  %v943_v6 = vadd.f32 %v942_v2, %v854_v3 }
 0x13c   : > { %1204 = vst.msk [vmem:[%s2040_s25 + $0x80] sm:$0xff] %vm1187_vm2, %v1787_v4 }
 0x13d   : > { %1788 = vtanh.f32 %v1118_v5 }
 0x140   : > { %v1031_v9 = vpop.f32.mrf.mxu2  ;;  %v855_v11 = vpop.f32.mrf.mxu0 }
 0x141   : > { %v1032_v10 = vadd.f32 %v1031_v9, %v943_v6  ;;  %v944_v12 = vpop.f32.mrf.mxu1  ;;  %v856_v15 = vadd.f32 %v2021_v7, %v855_v11  ;;  %v1127_v16 = vpop.f32.mrf.mxu3 }
 0x143   : > { %v1789_v13 = vpop.eup %1788  ;;  %v1121_v14 = vadd.f32 %v1120_v53, %v1032_v10  ;;  %v945_v17 = vadd.f32 %v944_v12, %v856_v15 }
 0x144   : > { %1205 = vst.msk [vmem:[%s2040_s25 + $0x88] sm:$0xff] %vm1187_vm2, %v1789_v13 }
 0x145   : > { %1790 = vtanh.f32 %v1121_v14 }
 0x148   : > { %v1033_v18 = vpop.f32.mrf.mxu2  ;;  %v858_v20 = vpop.f32.mrf.mxu0 }
 0x149   : > { %v1034_v19 = vadd.f32 %v1033_v18, %v945_v17  ;;  %v947_v21 = vpop.f32.mrf.mxu1  ;;  %v859_v22 = vadd.f32 %v2021_v7, %v858_v20  ;;  %v1130_v27 = vpop.f32.mrf.mxu3 }
 0x14b   : > { %v1791_v23 = vpop.eup %1790  ;;  %v1123_v24 = vadd.f32 %v1122_v61, %v1034_v19  ;;  %v948_v25 = vadd.f32 %v947_v21, %v859_v22 }
 0x14c   : > { %1206 = vst.msk [vmem:[%s2040_s25 + $0x90] sm:$0xff] %vm1187_vm2, %v1791_v23 }
 0x14d   : > { %1792 = vtanh.f32 %v1123_v24 }
 0x150   : > { %v1036_v26 = vpop.f32.mrf.mxu2  ;;  %v860_v29 = vpop.f32.mrf.mxu0 }
 0x151   : > { %v1037_v28 = vadd.f32 %v1036_v26, %v948_v25  ;;  %v949_v30 = vpop.f32.mrf.mxu1  ;;  %v861_v33 = vadd.f32 %v2021_v7, %v860_v29  ;;  %v1132_v40 = vpop.f32.mrf.mxu3 }
 0x153   : > { %v1793_v31 = vpop.eup %1792  ;;  %v1126_v32 = vadd.f32 %v1125_v8, %v1037_v28  ;;  %v950_v34 = vadd.f32 %v949_v30, %v861_v33 }
 0x154   : > { %1207 = vst.msk [vmem:[%s2040_s25 + $0x98] sm:$0xff] %vm1187_vm2, %v1793_v31 }
 0x155   : > { %1794 = vtanh.f32 %v1126_v32 }
 0x158   : > { %v1038_v35 = vpop.f32.mrf.mxu2  ;;  %v863_v37 = vpop.f32.mrf.mxu0 }
 0x159   : > { %v1039_v36 = vadd.f32 %v1038_v35, %v950_v34  ;;  %v952_v38 = vpop.f32.mrf.mxu1  ;;  %v864_v39 = vadd.f32 %v2021_v7, %v863_v37  ;;  %v1135_v51 = vpop.f32.mrf.mxu3 }
 0x15b   : > { %v1795_v41 = vpop.eup %1794  ;;  %v1128_v42 = vadd.f32 %v1127_v16, %v1039_v36  ;;  %v953_v43 = vadd.f32 %v952_v38, %v864_v39 }
 0x15c   : > { %1208 = vst.msk [vmem:[%s2040_s25 + $0xa0] sm:$0xff] %vm1187_vm2, %v1795_v41 }
 0x15d   : > { %1796 = vtanh.f32 %v1128_v42 }
 0x160   : > { %v1041_v44 = vpop.f32.mrf.mxu2  ;;  %v865_v46 = vpop.f32.mrf.mxu0 }
 0x161   : > { %v1042_v45 = vadd.f32 %v1041_v44, %v953_v43  ;;  %v954_v47 = vpop.f32.mrf.mxu1  ;;  %v866_v50 = vadd.f32 %v2021_v7, %v865_v46  ;;  %v1137_v61 = vpop.f32.mrf.mxu3 }
 0x163   : > { %v1797_v48 = vpop.eup %1796  ;;  %v1131_v49 = vadd.f32 %v1130_v27, %v1042_v45  ;;  %v955_v52 = vadd.f32 %v954_v47, %v866_v50 }
 0x164   : > { %1209 = vst.msk [vmem:[%s2040_s25 + $0xa8] sm:$0xff] %vm1187_vm2, %v1797_v48 }
 0x165   : > { %1798 = vtanh.f32 %v1131_v49 }
 0x168   : > { %v1043_v53 = vpop.f32.mrf.mxu2  ;;  %v868_v55 = vpop.f32.mrf.mxu0 }
 0x169   : > { %v1044_v54 = vadd.f32 %v1043_v53, %v955_v52  ;;  %v957_v56 = vpop.f32.mrf.mxu1  ;;  %v869_v57 = vadd.f32 %v2021_v7, %v868_v55  ;;  %v1140_v8 = vpop.f32.mrf.mxu3 }
 0x16b   : > { %v1799_v58 = vpop.eup %1798  ;;  %v1133_v59 = vadd.f32 %v1132_v40, %v1044_v54  ;;  %v958_v60 = vadd.f32 %v957_v56, %v869_v57 }
 0x16c   : > { %1210 = vst.msk [vmem:[%s2040_s25 + $0xb0] sm:$0xff] %vm1187_vm2, %v1799_v58 }
 0x16d   : > { %1800 = vtanh.f32 %v1133_v59 }
 0x170   : > { %v1046_v62 = vpop.f32.mrf.mxu2  ;;  %v870_v0 = vpop.f32.mrf.mxu0 }
 0x171   : > { %v1047_v63 = vadd.f32 %v1046_v62, %v958_v60  ;;  %v959_v1 = vpop.f32.mrf.mxu1  ;;  %v871_v4 = vadd.f32 %v2021_v7, %v870_v0  ;;  %v1142_v20 = vpop.f32.mrf.mxu3 }
 0x173   : > { %v1801_v2 = vpop.eup %1800  ;;  %v1136_v3 = vadd.f32 %v1135_v51, %v1047_v63  ;;  %v960_v5 = vadd.f32 %v959_v1, %v871_v4 }
 0x174   : > { %1211 = vst.msk [vmem:[%s2040_s25 + $0xb8] sm:$0xff] %vm1187_vm2, %v1801_v2 }
 0x175   : > { %1802 = vtanh.f32 %v1136_v3 }
 0x178   : > { %v1048_v6 = vpop.f32.mrf.mxu2  ;;  %v873_v10 = vpop.f32.mrf.mxu0 }
 0x179   : > { %v1049_v9 = vadd.f32 %v1048_v6, %v960_v5  ;;  %v962_v11 = vpop.f32.mrf.mxu1  ;;  %v874_v12 = vadd.f32 %v2021_v7, %v873_v10  ;;  %v1145_v32 = vpop.f32.mrf.mxu3 }
 0x17b   : > { %v1803_v13 = vpop.eup %1802  ;;  %v1138_v14 = vadd.f32 %v1137_v61, %v1049_v9  ;;  %v963_v15 = vadd.f32 %v962_v11, %v874_v12 }
 0x17c   : > { %1212 = vst.msk [vmem:[%s2040_s25 + $0xc0] sm:$0xff] %vm1187_vm2, %v1803_v13 }
 0x17d   : > { %1804 = vtanh.f32 %v1138_v14 }
 0x180   : > { %v1051_v16 = vpop.f32.mrf.mxu2  ;;  %v875_v18 = vpop.f32.mrf.mxu0 }
 0x181   : > { %v1052_v17 = vadd.f32 %v1051_v16, %v963_v15  ;;  %v964_v19 = vpop.f32.mrf.mxu1  ;;  %v876_v23 = vadd.f32 %v2021_v7, %v875_v18  ;;  %v1147_v41 = vpop.f32.mrf.mxu3 }
 0x183   : > { %v1805_v21 = vpop.eup %1804  ;;  %v1141_v22 = vadd.f32 %v1140_v8, %v1052_v17  ;;  %v965_v24 = vadd.f32 %v964_v19, %v876_v23 }
 0x184   : > { %1213 = vst.msk [vmem:[%s2040_s25 + $0xc8] sm:$0xff] %vm1187_vm2, %v1805_v21 }
 0x185   : > { %1806 = vtanh.f32 %v1141_v22 }
 0x188   : > { %v1053_v25 = vpop.f32.mrf.mxu2  ;;  %v878_v27 = vpop.f32.mrf.mxu0 }
 0x189   : > { %v1054_v26 = vadd.f32 %v1053_v25, %v965_v24  ;;  %v967_v28 = vpop.f32.mrf.mxu1  ;;  %v879_v29 = vadd.f32 %v2021_v7, %v878_v27  ;;  %v1150_v51 = vpop.f32.mrf.mxu3 }
 0x18b   : > { %v1807_v30 = vpop.eup %1806  ;;  %v1143_v31 = vadd.f32 %v1142_v20, %v1054_v26  ;;  %v968_v33 = vadd.f32 %v967_v28, %v879_v29 }
 0x18c   : > { %1214 = vst.msk [vmem:[%s2040_s25 + $0xd0] sm:$0xff] %vm1187_vm2, %v1807_v30 }
 0x18d   : > { %1808 = vtanh.f32 %v1143_v31 }
 0x190   : > { %v1056_v34 = vpop.f32.mrf.mxu2  ;;  %v880_v36 = vpop.f32.mrf.mxu0 }
 0x191   : > { %v1057_v35 = vadd.f32 %v1056_v34, %v968_v33  ;;  %v969_v37 = vpop.f32.mrf.mxu1  ;;  %v881_v40 = vadd.f32 %v2021_v7, %v880_v36  ;;  %v1152_v62 = vpop.f32.mrf.mxu3 }
 0x193   : > { %v1809_v38 = vpop.eup %1808  ;;  %v1146_v39 = vadd.f32 %v1145_v32, %v1057_v35  ;;  %v970_v42 = vadd.f32 %v969_v37, %v881_v40 }
 0x194   : > { %1215 = vst.msk [vmem:[%s2040_s25 + $0xd8] sm:$0xff] %vm1187_vm2, %v1809_v38 }
 0x195   : > { %1810 = vtanh.f32 %v1146_v39 }
 0x198   : > { %v1058_v43 = vpop.f32.mrf.mxu2  ;;  %v883_v45 = vpop.f32.mrf.mxu0 }
 0x199   : > { %v1059_v44 = vadd.f32 %v1058_v43, %v970_v42  ;;  %v884_v46 = vadd.f32 %v2021_v7, %v883_v45  ;;  %v972_v49 = vpop.f32.mrf.mxu1 }
 0x19b   : > { %v1811_v47 = vpop.eup %1810  ;;  %v1148_v48 = vadd.f32 %v1147_v41, %v1059_v44  ;;  %v973_v50 = vadd.f32 %v972_v49, %v884_v46 }
 0x19c   : > { %1216 = vst.msk [vmem:[%s2040_s25 + $0xe0] sm:$0xff] %vm1187_vm2, %v1811_v47 }
 0x19d   : > { %1812 = vtanh.f32 %v1148_v48 }
 0x1a0   : > { %v1061_v52 = vpop.f32.mrf.mxu2  ;;  %v885_v54 = vpop.f32.mrf.mxu0 }
 0x1a1   : > { %v1062_v53 = vadd.f32 %v1061_v52, %v973_v50  ;;  %v886_v57 = vadd.f32 %v2021_v7, %v885_v54  ;;  %v974_v58 = vpop.f32.mrf.mxu1 }
 0x1a3   : > { %v1813_v55 = vpop.eup %1812  ;;  %v1151_v56 = vadd.f32 %v1150_v51, %v1062_v53  ;;  %v975_v59 = vadd.f32 %v974_v58, %v886_v57 }
 0x1a4   : > { %1217 = vst.msk [vmem:[%s2040_s25 + $0xe8] sm:$0xff] %vm1187_vm2, %v1813_v55 }
 0x1a5   : > { %1814 = vtanh.f32 %v1151_v56 }
 0x1a8   : > { %v1063_v60 = vpop.f32.mrf.mxu2 }
 0x1a9   : > { %v1064_v61 = vadd.f32 %v1063_v60, %v975_v59 }
 0x1ab   : > { %v1815_v63 = vpop.eup %1814  ;;  %v1153_v0 = vadd.f32 %v1152_v62, %v1064_v61 }
 0x1ac   : > { %1218 = vst.msk [vmem:[%s2040_s25 + $0xf0] sm:$0xff] %vm1187_vm2, %v1815_v63 }
 0x1ad   : > { %1816 = vtanh.f32 %v1153_v0 }
 0x1b3   : > { %v1817_v1 = vpop.eup %1816 }
 0x1b4   : > { %1219 = vst.msk [vmem:[%s2040_s25 + $0xf8] sm:$0xff] %vm1187_vm2, %v1817_v1 }
 0x1b5 PF: > { %s13_s12 = sadd.s32 1, %s1824_s12  }
 0x1b6   : > { %p10_p4 = scmp.ge.s32.totalorder %s13_s12, 4  }
 0x1b8   :  { %12 = sbr.rel (!%p10_p4) target bundleno = 1 (0x1), region = 62 }

</bundles_post_ra>
